<compile_context>
chip_gen: v5e
topology: v5e:2x2
jax: 0.10.0
libtpu: 0.0.40
codegen_flags: <defaults>
</compile_context>

<pallas_src>
import jax
import jax.numpy as jnp
import numpy as np
from jax.experimental import pallas as pl
from jax.experimental.pallas import tpu as pltpu

KSIZE = 8              # filter_length
PAD_L, PAD_R = 3, 4    # torch 'same' padding for even kernel
BN_EPS = 1e-5
HEAD_PAD = 128         # lane-dense head width
DATA_ROW = 8           # activations start at this (sublane-aligned) row per item

# MXU input dtype. f32 is safe everywhere (v5e has no bf16 VPU/EUP path anyway);
# on v6e/v7x this can be set to jnp.bfloat16 for the dots (f32 accumulation kept).
MXU_DTYPE = jnp.float32


# ---------------------------------------------------------------------------
# Fused Pallas kernel (one grid step == one batch tile, fully VMEM resident)
# ---------------------------------------------------------------------------
def _make_fused_kernel(Bt, L, Cin, conv_dim, item_rows):
    L1, L2, L3 = L, L // 2, L // 4
    Lf = L3 // 3
    assert Lf == 1, "flatten order matches torch only when the pooled length is 1"
    # TODO(synk): general vid_length would need NCL-order flatten before the head.
    Cmax = max(Cin, conv_dim)

    def kernel(x_ref, w1_ref, t1_ref, wr_ref, tr_ref,
               fw1_ref, fb1_ref, fw2_ref, fb2_ref,
               o_ref, pad_ref, col_ref, act_ref, feat_ref):
        # pad_ref : (Bt*item_rows, Cmax)  padded layer input, one region per item
        # col_ref : (Bt*L, K*Cmax)        im2col slab
        # act_ref : (Bt*L, conv_dim)      conv output staging for the pools
        # feat_ref: (Bt, conv_dim)        flattened features for the head

        # ---- zero ONLY the pad rows (left pad + right pad for L1), then stage x
        for b in range(Bt):
            rs = b * item_rows
            pad_ref[rs + DATA_ROW - PAD_L: rs + DATA_ROW, :] = (
                jnp.zeros((PAD_L, Cmax), jnp.float32))
            pad_ref[rs + DATA_ROW + L1: rs + DATA_ROW + L1 + PAD_R, :] = (
                jnp.zeros((PAD_R, Cmax), jnp.float32))
            # data rows start at a multiple of 8 -> unmasked full-sublane store
            pad_ref[rs + DATA_ROW: rs + DATA_ROW + L1, 0:Cin] = x_ref[b]

        def conv_bn_relu(Lc, Cin_l, w_col, shift):
            # im2col: K contiguous (Lc, Cin_l) copies per item at column offset k*Cin_l
            for b in range(Bt):
                win = b * item_rows + DATA_ROW - PAD_L      # padded-window start row
                for k in range(KSIZE):
                    col_ref[b * Lc:(b + 1) * Lc, k * Cin_l:(k + 1) * Cin_l] = (
                        pad_ref[win + k: win + k + Lc, 0:Cin_l])
            s = col_ref[0:Bt * Lc, 0:KSIZE * Cin_l]
            y = jnp.dot(s.astype(MXU_DTYPE), w_col.astype(MXU_DTYPE),
                        preferred_element_type=jnp.float32)  # ONE MXU matmul per layer
            return jnp.maximum(y + shift, 0.0)               # (Bt*Lc, conv_dim)

        def stage(y, Lc):
            # restage conv output as the next conv's padded input (aligned store)
            for b in range(Bt):
                rs = b * item_rows
                pad_ref[rs + DATA_ROW: rs + DATA_ROW + Lc, 0:conv_dim] = (
                    y[b * Lc:(b + 1) * Lc, :])

        def pool_and_stage(y, Lc, p):
            # MaxPool1d(kernel=stride=p) as whole-slab strided row loads + one max,
            # then one block store; refresh the right-pad zeros for the new length.
            Lout = Lc // p
            act_ref[0:Bt * Lc, :] = y
            for b in range(Bt):
                rs = b * item_rows
                r = act_ref[pl.ds(b * Lc, Lout, stride=p), :]
                for j in range(1, p):
                    r = jnp.maximum(r, act_ref[pl.ds(b * Lc + j, Lout, stride=p), :])
                pad_ref[rs + DATA_ROW: rs + DATA_ROW + Lout, 0:conv_dim] = r
                pad_ref[rs + DATA_ROW + Lout: rs + DATA_ROW + Lout + PAD_R, 0:conv_dim] = (
                    jnp.zeros((PAD_R, conv_dim), jnp.float32))

        # ---- conv tower (BN folded, Dropout = identity in eval mode) ----
        y = conv_bn_relu(L1, Cin, w1_ref[...], t1_ref[...])        # conv1+bn1+relu
        stage(y, L1)
        y = conv_bn_relu(L1, conv_dim, wr_ref[0], tr_ref[0])       # conv2+bn2+relu
        pool_and_stage(y, L1, 2)                                   # pool1 (+drop1)
        y = conv_bn_relu(L2, conv_dim, wr_ref[1], tr_ref[1])       # conv3+bn3+relu
        stage(y, L2)
        y = conv_bn_relu(L2, conv_dim, wr_ref[2], tr_ref[2])       # conv4+bn4+relu
        pool_and_stage(y, L2, 2)                                   # pool2 (+drop2)
        y = conv_bn_relu(L3, conv_dim, wr_ref[3], tr_ref[3])       # conv5+bn5+relu
        stage(y, L3)
        y = conv_bn_relu(L3, conv_dim, wr_ref[4], tr_ref[4])       # conv6+bn6+relu

        # pool3 (k=3, floor semantics) -> one feature row per item (+drop3, flatten)
        act_ref[0:Bt * L3, :] = y
        for b in range(Bt):
            v = act_ref[b * L3: b * L3 + 3, :]                     # remainder row dropped
            feat_ref[b:b + 1, :] = jnp.max(v, axis=0, keepdims=True)

        # ---- MLP head, lane-dense 128-wide end-to-end ----
        feats = feat_ref[...]                                      # (Bt, conv_dim)
        h = jnp.maximum(
            jnp.dot(feats.astype(MXU_DTYPE), fw1_ref[...].astype(MXU_DTYPE),
                    preferred_element_type=jnp.float32) + fb1_ref[...], 0.0)
        logits = (jnp.dot(h.astype(MXU_DTYPE), fw2_ref[...].astype(MXU_DTYPE),
                          preferred_element_type=jnp.float32) + fb2_ref[...])
        o_ref[0] = logits.astype(o_ref.dtype)                      # unmasked (Bt,128) store

    return kernel


# ---------------------------------------------------------------------------
# Wrapper
# ---------------------------------------------------------------------------
def cnn_forward(params, x_ncl, batch_tile=None):
    """x_ncl: (B, C, L) torch layout -> (B, 2) logits (inference mode)."""
    x = jnp.transpose(x_ncl, (0, 2, 1)).astype(jnp.float32)   # NCL -> NLC (one boundary op)
    B, L, Cin = x.shape
    conv_dim = params["t1"].shape[-1]

    if batch_tile is None:
        # >=2 grid steps so v7x's second TensorCore takes half the batch ("parallel");
        # within each step the batch tile is folded into the matmul M dimension.
        # On v5e/v6e pass batch_tile=B to fold the whole batch into one step.
        batch_tile = B // 2 if (B >= 2 and B % 2 == 0) else 1
    assert B % batch_tile == 0
    num_tiles = B // batch_tile
    # TODO(synk): for much larger batch_tile, switch the in-kernel per-item Python
    # unrolls to lax.fori_loop to bound live ranges.

    item_rows = ((DATA_ROW + L + PAD_R) + 7) // 8 * 8         # sublane-aligned item region
    Cmax = max(Cin, conv_dim)

    w1, t1 = params["w1"], params["t1"]
    wrest, trest = params["wrest"], params["trest"]
    fw1, fb1, fw2, fb2 = params["fw1"], params["fb1"], params["fw2"], params["fb2"]

    kernel = _make_fused_kernel(batch_tile, L, Cin, conv_dim, item_rows)
    out = pl.pallas_call(
        kernel,
        grid=(num_tiles,),
        in_specs=[
            pl.BlockSpec((batch_tile, L, Cin), lambda i: (i, 0, 0)),
            # weights: constant block index -> fetched once, VMEM resident across steps
            pl.BlockSpec(w1.shape, lambda i: (0, 0)),
            pl.BlockSpec(t1.shape, lambda i: (0, 0)),
            pl.BlockSpec(wrest.shape, lambda i: (0, 0, 0)),
            pl.BlockSpec(trest.shape, lambda i: (0, 0, 0)),
            pl.BlockSpec(fw1.shape, lambda i: (0, 0)),
            pl.BlockSpec(fb1.shape, lambda i: (0, 0)),
            pl.BlockSpec(fw2.shape, lambda i: (0, 0)),
            pl.BlockSpec(fb2.shape, lambda i: (0, 0)),
        ],
        out_specs=pl.BlockSpec((1, batch_tile, HEAD_PAD), lambda i: (i, 0, 0)),
        out_shape=jax.ShapeDtypeStruct((num_tiles, batch_tile, HEAD_PAD), jnp.float32),
        scratch_shapes=[
            pltpu.VMEM((batch_tile * item_rows, Cmax), jnp.float32),   # padded layer input
            pltpu.VMEM((batch_tile * L, KSIZE * Cmax), jnp.float32),   # im2col slab
            pltpu.VMEM((batch_tile * L, conv_dim), jnp.float32),       # conv-out / pool staging
            pltpu.VMEM((batch_tile, conv_dim), jnp.float32),           # flattened features
        ],
        compiler_params=pltpu.CompilerParams(dimension_semantics=("parallel",)),
    )(x, w1, t1, wrest, trest, fw1, fb1, fw2, fb2)
    return out.reshape(B, HEAD_PAD)[:, :2]


# ---------------------------------------------------------------------------
# Parameters (deterministic, synthetic; BN scale folded; im2col weight layout)
# ---------------------------------------------------------------------------
def init_params(key, input_dim, conv_dim=32, vid_length=16, last_layer_dim=10,
                l2_lambda=10 ** (-3.5)):
    keys = jax.random.split(key, 16)
    cins = [input_dim] + [conv_dim] * 5
    w_cols, shifts = [], []
    for i, cin in enumerate(cins):
        bound = 1.0 / (cin * KSIZE) ** 0.5
        w = jax.random.uniform(keys[2 * i], (KSIZE, cin, conv_dim), jnp.float32,
                               -bound, bound)
        if i >= 2:  # conv3..conv6 get the (1 + l2_lambda) rescale from __init__
            w = w * (1.0 + l2_lambda)
        b = jax.random.uniform(keys[2 * i + 1], (conv_dim,), jnp.float32, -bound, bound)
        gamma = jnp.ones((conv_dim,), jnp.float32)
        beta = jnp.zeros((conv_dim,), jnp.float32)
        mean = jnp.zeros((conv_dim,), jnp.float32)
        var = jnp.ones((conv_dim,), jnp.float32)
        scale = gamma / jnp.sqrt(var + BN_EPS)
        # fold BN scale and reshape to im2col layout: W_col[k*cin + c, o]
        w_cols.append((w * scale[None, None, :]).reshape(KSIZE * cin, conv_dim))
        shifts.append((beta + (b - mean) * scale)[None, :])

    params = {
        "w1": w_cols[0], "t1": shifts[0],
        "wrest": jnp.stack(w_cols[1:]),   # (5, K*conv_dim, conv_dim)
        "trest": jnp.stack(shifts[1:]),   # (5, 1, conv_dim)
    }

    fc1_in = conv_dim * (vid_length // 12)
    b1v = 1.0 / fc1_in ** 0.5
    w1 = jax.random.uniform(keys[12], (fc1_in, last_layer_dim), jnp.float32, -b1v, b1v)
    b1 = jax.random.uniform(keys[13], (1, last_layer_dim), jnp.float32, -b1v, b1v)
    b2v = 1.0 / last_layer_dim ** 0.5
    w2 = jax.random.uniform(keys[14], (last_layer_dim, 2), jnp.float32, -b2v, b2v)
    b2 = jax.random.uniform(keys[15], (1, 2), jnp.float32, -b2v, b2v)
    # lane-dense head: zero-pad everything to 128 lanes (padded lanes stay exactly 0)
    params["fw1"] = jnp.zeros((fc1_in, HEAD_PAD), jnp.float32).at[:, :last_layer_dim].set(w1)
    params["fb1"] = jnp.zeros((1, HEAD_PAD), jnp.float32).at[:, :last_layer_dim].set(b1)
    params["fw2"] = jnp.zeros((HEAD_PAD, HEAD_PAD), jnp.float32).at[:last_layer_dim, :2].set(w2)
    params["fb2"] = jnp.zeros((1, HEAD_PAD), jnp.float32).at[:, :2].set(b2)
    return params


# ---------------------------------------------------------------------------
# Pure-JAX reference (same folded params) for a structural correctness check
# ---------------------------------------------------------------------------
def cnn_reference(params, x_ncl):
    x = jnp.transpose(x_ncl, (0, 2, 1)).astype(jnp.float32)   # (B, L, C)
    B = x.shape[0]

    def conv(h, w_col, shift):
        Lc = h.shape[1]
        hp = jnp.pad(h, ((0, 0), (PAD_L, PAD_R), (0, 0)))
        cols = jnp.concatenate([hp[:, k:k + Lc, :] for k in range(KSIZE)], axis=-1)
        y = jnp.einsum("blk,ko->blo", cols, w_col,
                       precision=jax.lax.Precision.HIGHEST) + shift
        return jnp.maximum(y, 0.0)

    def pool(h, p):
        Lout = h.shape[1] // p
        return h[:, :Lout * p, :].reshape(B, Lout, p, -1).max(axis=2)

    h = conv(x, params["w1"], params["t1"])
    h = conv(h, params["wrest"][0], params["trest"][0])
    h = pool(h, 2)
    h = conv(h, params["wrest"][1], params["trest"][1])
    h = conv(h, params["wrest"][2], params["trest"][2])
    h = pool(h, 2)
    h = conv(h, params["wrest"][3], params["trest"][3])
    h = conv(h, params["wrest"][4], params["trest"][4])
    h = pool(h, 3)
    feats = h.reshape(B, -1)
    hh = jnp.maximum(feats @ params["fw1"] + params["fb1"], 0.0)
    return (hh @ params["fw2"] + params["fb2"])[:, :2]


if __name__ == "__main__":
    key = jax.random.PRNGKey(0)
    k_param, k_x = jax.random.split(key)

    BATCH, INPUT_DIM, VID_LEN = 4, 64, 16          # small shapes; vid_length=16 as in module
    params = init_params(k_param, input_dim=INPUT_DIM, vid_length=VID_LEN)
    x = jax.random.normal(k_x, (BATCH, INPUT_DIM, VID_LEN), jnp.float32)  # torch NCL layout

    out = jax.block_until_ready(jax.jit(cnn_forward)(params, x))
    assert out.shape == (BATCH, 2), out.shape

    ref = cnn_reference(params, x)
    np.testing.assert_allclose(np.asarray(out), np.asarray(ref), rtol=1e-1, atol=3e-2)
    print("KERNEL_OK")
</pallas_src>

<mosaic_0001>
module attributes {stable_mosaic.version = 11 : i64} {
  func.func @kernel(%arg0: i32, %arg1: memref<2x16x64xf32, #tpu.memory_space<vmem>>, %arg2: memref<512x32xf32, #tpu.memory_space<vmem>>, %arg3: memref<1x32xf32, #tpu.memory_space<vmem>>, %arg4: memref<5x256x32xf32, #tpu.memory_space<vmem>>, %arg5: memref<5x1x32xf32, #tpu.memory_space<vmem>>, %arg6: memref<32x128xf32, #tpu.memory_space<vmem>>, %arg7: memref<1x128xf32, #tpu.memory_space<vmem>>, %arg8: memref<128x128xf32, #tpu.memory_space<vmem>>, %arg9: memref<1x128xf32, #tpu.memory_space<vmem>>, %arg10: memref<1x2x128xf32, #tpu.memory_space<vmem>>, %arg11: memref<64x64xf32, #tpu.memory_space<vmem>>, %arg12: memref<32x512xf32, #tpu.memory_space<vmem>>, %arg13: memref<32x32xf32, #tpu.memory_space<vmem>>, %arg14: memref<2x32xf32, #tpu.memory_space<vmem>>) attributes {dimension_semantics = [#tpu.dimension_semantics<parallel>], iteration_bounds = array<i64: 2>, scalar_prefetch = 0 : i64, scratch_operands = 4 : i64, tpu.core_type = #tpu.core_type<tc>, window_params = [{transform_indices = @transform_0, window_bounds = array<i64: 2, 16, 64>}, {pipeline_mode = #tpu.pipeline_mode<synchronous>, transform_indices = @transform_1, window_bounds = array<i64: 512, 32>}, {pipeline_mode = #tpu.pipeline_mode<synchronous>, transform_indices = @transform_2, window_bounds = array<i64: 1, 32>}, {pipeline_mode = #tpu.pipeline_mode<synchronous>, transform_indices = @transform_3, window_bounds = array<i64: 5, 256, 32>}, {pipeline_mode = #tpu.pipeline_mode<synchronous>, transform_indices = @transform_4, window_bounds = array<i64: 5, 1, 32>}, {pipeline_mode = #tpu.pipeline_mode<synchronous>, transform_indices = @transform_5, window_bounds = array<i64: 32, 128>}, {pipeline_mode = #tpu.pipeline_mode<synchronous>, transform_indices = @transform_6, window_bounds = array<i64: 1, 128>}, {pipeline_mode = #tpu.pipeline_mode<synchronous>, transform_indices = @transform_7, window_bounds = array<i64: 128, 128>}, {pipeline_mode = #tpu.pipeline_mode<synchronous>, transform_indices = @transform_8, window_bounds = array<i64: 1, 128>}, {transform_indices = @transform_9, window_bounds = array<i64: 1, 2, 128>}]} {
    %cst = arith.constant 0.000000e+00 : f32
    %0 = vector.broadcast %cst : f32 to vector<3x64xf32>
    %c5 = arith.constant 5 : index
    %c0 = arith.constant 0 : index
    %1 = vector.load %arg11[%c5, %c0] : memref<64x64xf32, #tpu.memory_space<vmem>>, vector<3x64xf32>
    tpu.vector_store %arg11[%c5, %c0], %0 {strides = array<i32>} : memref<64x64xf32, #tpu.memory_space<vmem>>, vector<3x64xf32>,
    %cst_0 = arith.constant 0.000000e+00 : f32
    %2 = vector.broadcast %cst_0 : f32 to vector<4x64xf32>
    %c24 = arith.constant 24 : index
    %c0_1 = arith.constant 0 : index
    %3 = vector.load %arg11[%c24, %c0_1] : memref<64x64xf32, #tpu.memory_space<vmem>>, vector<4x64xf32>
    tpu.vector_store %arg11[%c24, %c0_1], %2 {strides = array<i32>} : memref<64x64xf32, #tpu.memory_space<vmem>>, vector<4x64xf32>,
    %c0_2 = arith.constant 0 : index
    %c0_3 = arith.constant 0 : index
    %c0_4 = arith.constant 0 : index
    %4 = vector.load %arg1[%c0_2, %c0_3, %c0_4] : memref<2x16x64xf32, #tpu.memory_space<vmem>>, vector<1x16x64xf32>
    %5 = vector.shape_cast %4 : vector<1x16x64xf32> to vector<16x64xf32>
    %c8 = arith.constant 8 : index
    %c0_5 = arith.constant 0 : index
    %6 = vector.load %arg11[%c8, %c0_5] : memref<64x64xf32, #tpu.memory_space<vmem>>, vector<16x64xf32>
    tpu.vector_store %arg11[%c8, %c0_5], %5 {strides = array<i32>} : memref<64x64xf32, #tpu.memory_space<vmem>>, vector<16x64xf32>,
    %cst_6 = arith.constant 0.000000e+00 : f32
    %7 = vector.broadcast %cst_6 : f32 to vector<3x64xf32>
    %c37 = arith.constant 37 : index
    %c0_7 = arith.constant 0 : index
    %8 = vector.load %arg11[%c37, %c0_7] : memref<64x64xf32, #tpu.memory_space<vmem>>, vector<3x64xf32>
    tpu.vector_store %arg11[%c37, %c0_7], %7 {strides = array<i32>} : memref<64x64xf32, #tpu.memory_space<vmem>>, vector<3x64xf32>,
    %cst_8 = arith.constant 0.000000e+00 : f32
    %9 = vector.broadcast %cst_8 : f32 to vector<4x64xf32>
    %c56 = arith.constant 56 : index
    %c0_9 = arith.constant 0 : index
    %10 = vector.load %arg11[%c56, %c0_9] : memref<64x64xf32, #tpu.memory_space<vmem>>, vector<4x64xf32>
    tpu.vector_store %arg11[%c56, %c0_9], %9 {strides = array<i32>} : memref<64x64xf32, #tpu.memory_space<vmem>>, vector<4x64xf32>,
    %c1 = arith.constant 1 : index
    %c0_10 = arith.constant 0 : index
    %c0_11 = arith.constant 0 : index
    %11 = vector.load %arg1[%c1, %c0_10, %c0_11] : memref<2x16x64xf32, #tpu.memory_space<vmem>>, vector<1x16x64xf32>
    %12 = vector.shape_cast %11 : vector<1x16x64xf32> to vector<16x64xf32>
    %c40 = arith.constant 40 : index
    %c0_12 = arith.constant 0 : index
    %13 = vector.load %arg11[%c40, %c0_12] : memref<64x64xf32, #tpu.memory_space<vmem>>, vector<16x64xf32>
    tpu.vector_store %arg11[%c40, %c0_12], %12 {strides = array<i32>} : memref<64x64xf32, #tpu.memory_space<vmem>>, vector<16x64xf32>,
    %c0_13 = arith.constant 0 : index
    %c0_14 = arith.constant 0 : index
    %14 = vector.load %arg2[%c0_13, %c0_14] : memref<512x32xf32, #tpu.memory_space<vmem>>, vector<512x32xf32>
    %c0_15 = arith.constant 0 : index
    %c0_16 = arith.constant 0 : index
    %15 = vector.load %arg3[%c0_15, %c0_16] : memref<1x32xf32, #tpu.memory_space<vmem>>, vector<1x32xf32>
    %c5_17 = arith.constant 5 : index
    %c0_18 = arith.constant 0 : index
    %16 = vector.load %arg11[%c5_17, %c0_18] : memref<64x64xf32, #tpu.memory_space<vmem>>, vector<16x64xf32>
    %c0_19 = arith.constant 0 : index
    %c0_20 = arith.constant 0 : index
    %17 = vector.load %arg12[%c0_19, %c0_20] : memref<32x512xf32, #tpu.memory_space<vmem>>, vector<16x64xf32>
    tpu.vector_store %arg12[%c0_19, %c0_20], %16 {strides = array<i32>} : memref<32x512xf32, #tpu.memory_space<vmem>>, vector<16x64xf32>,
    %c6 = arith.constant 6 : index
    %c0_21 = arith.constant 0 : index
    %18 = vector.load %arg11[%c6, %c0_21] : memref<64x64xf32, #tpu.memory_space<vmem>>, vector<16x64xf32>
    %c0_22 = arith.constant 0 : index
    %c64 = arith.constant 64 : index
    %19 = vector.load %arg12[%c0_22, %c64] : memref<32x512xf32, #tpu.memory_space<vmem>>, vector<16x64xf32>
    tpu.vector_store %arg12[%c0_22, %c64], %18 {strides = array<i32>} : memref<32x512xf32, #tpu.memory_space<vmem>>, vector<16x64xf32>,
    %c7 = arith.constant 7 : index
    %c0_23 = arith.constant 0 : index
    %20 = vector.load %arg11[%c7, %c0_23] : memref<64x64xf32, #tpu.memory_space<vmem>>, vector<16x64xf32>
    %c0_24 = arith.constant 0 : index
    %c128 = arith.constant 128 : index
    %21 = vector.load %arg12[%c0_24, %c128] : memref<32x512xf32, #tpu.memory_space<vmem>>, vector<16x64xf32>
    tpu.vector_store %arg12[%c0_24, %c128], %20 {strides = array<i32>} : memref<32x512xf32, #tpu.memory_space<vmem>>, vector<16x64xf32>,
    %c8_25 = arith.constant 8 : index
    %c0_26 = arith.constant 0 : index
    %22 = vector.load %arg11[%c8_25, %c0_26] : memref<64x64xf32, #tpu.memory_space<vmem>>, vector<16x64xf32>
    %c0_27 = arith.constant 0 : index
    %c192 = arith.constant 192 : index
    %23 = vector.load %arg12[%c0_27, %c192] : memref<32x512xf32, #tpu.memory_space<vmem>>, vector<16x64xf32>
    tpu.vector_store %arg12[%c0_27, %c192], %22 {strides = array<i32>} : memref<32x512xf32, #tpu.memory_space<vmem>>, vector<16x64xf32>,
    %c9 = arith.constant 9 : index
    %c0_28 = arith.constant 0 : index
    %24 = vector.load %arg11[%c9, %c0_28] : memref<64x64xf32, #tpu.memory_space<vmem>>, vector<16x64xf32>
    %c0_29 = arith.constant 0 : index
    %c256 = arith.constant 256 : index
    %25 = vector.load %arg12[%c0_29, %c256] : memref<32x512xf32, #tpu.memory_space<vmem>>, vector<16x64xf32>
    tpu.vector_store %arg12[%c0_29, %c256], %24 {strides = array<i32>} : memref<32x512xf32, #tpu.memory_space<vmem>>, vector<16x64xf32>,
    %c10 = arith.constant 10 : index
    %c0_30 = arith.constant 0 : index
    %26 = vector.load %arg11[%c10, %c0_30] : memref<64x64xf32, #tpu.memory_space<vmem>>, vector<16x64xf32>
    %c0_31 = arith.constant 0 : index
    %c320 = arith.constant 320 : index
    %27 = vector.load %arg12[%c0_31, %c320] : memref<32x512xf32, #tpu.memory_space<vmem>>, vector<16x64xf32>
    tpu.vector_store %arg12[%c0_31, %c320], %26 {strides = array<i32>} : memref<32x512xf32, #tpu.memory_space<vmem>>, vector<16x64xf32>,
    %c11 = arith.constant 11 : index
    %c0_32 = arith.constant 0 : index
    %28 = vector.load %arg11[%c11, %c0_32] : memref<64x64xf32, #tpu.memory_space<vmem>>, vector<16x64xf32>
    %c0_33 = arith.constant 0 : index
    %c384 = arith.constant 384 : index
    %29 = vector.load %arg12[%c0_33, %c384] : memref<32x512xf32, #tpu.memory_space<vmem>>, vector<16x64xf32>
    tpu.vector_store %arg12[%c0_33, %c384], %28 {strides = array<i32>} : memref<32x512xf32, #tpu.memory_space<vmem>>, vector<16x64xf32>,
    %c12 = arith.constant 12 : index
    %c0_34 = arith.constant 0 : index
    %30 = vector.load %arg11[%c12, %c0_34] : memref<64x64xf32, #tpu.memory_space<vmem>>, vector<16x64xf32>
    %c0_35 = arith.constant 0 : index
    %c448 = arith.constant 448 : index
    %31 = vector.load %arg12[%c0_35, %c448] : memref<32x512xf32, #tpu.memory_space<vmem>>, vector<16x64xf32>
    tpu.vector_store %arg12[%c0_35, %c448], %30 {strides = array<i32>} : memref<32x512xf32, #tpu.memory_space<vmem>>, vector<16x64xf32>,
    %c37_36 = arith.constant 37 : index
    %c0_37 = arith.constant 0 : index
    %32 = vector.load %arg11[%c37_36, %c0_37] : memref<64x64xf32, #tpu.memory_space<vmem>>, vector<16x64xf32>
    %c16 = arith.constant 16 : index
    %c0_38 = arith.constant 0 : index
    %33 = vector.load %arg12[%c16, %c0_38] : memref<32x512xf32, #tpu.memory_space<vmem>>, vector<16x64xf32>
    tpu.vector_store %arg12[%c16, %c0_38], %32 {strides = array<i32>} : memref<32x512xf32, #tpu.memory_space<vmem>>, vector<16x64xf32>,
    %c38 = arith.constant 38 : index
    %c0_39 = arith.constant 0 : index
    %34 = vector.load %arg11[%c38, %c0_39] : memref<64x64xf32, #tpu.memory_space<vmem>>, vector<16x64xf32>
    %c16_40 = arith.constant 16 : index
    %c64_41 = arith.constant 64 : index
    %35 = vector.load %arg12[%c16_40, %c64_41] : memref<32x512xf32, #tpu.memory_space<vmem>>, vector<16x64xf32>
    tpu.vector_store %arg12[%c16_40, %c64_41], %34 {strides = array<i32>} : memref<32x512xf32, #tpu.memory_space<vmem>>, vector<16x64xf32>,
    %c39 = arith.constant 39 : index
    %c0_42 = arith.constant 0 : index
    %36 = vector.load %arg11[%c39, %c0_42] : memref<64x64xf32, #tpu.memory_space<vmem>>, vector<16x64xf32>
    %c16_43 = arith.constant 16 : index
    %c128_44 = arith.constant 128 : index
    %37 = vector.load %arg12[%c16_43, %c128_44] : memref<32x512xf32, #tpu.memory_space<vmem>>, vector<16x64xf32>
    tpu.vector_store %arg12[%c16_43, %c128_44], %36 {strides = array<i32>} : memref<32x512xf32, #tpu.memory_space<vmem>>, vector<16x64xf32>,
    %c40_45 = arith.constant 40 : index
    %c0_46 = arith.constant 0 : index
    %38 = vector.load %arg11[%c40_45, %c0_46] : memref<64x64xf32, #tpu.memory_space<vmem>>, vector<16x64xf32>
    %c16_47 = arith.constant 16 : index
    %c192_48 = arith.constant 192 : index
    %39 = vector.load %arg12[%c16_47, %c192_48] : memref<32x512xf32, #tpu.memory_space<vmem>>, vector<16x64xf32>
    tpu.vector_store %arg12[%c16_47, %c192_48], %38 {strides = array<i32>} : memref<32x512xf32, #tpu.memory_space<vmem>>, vector<16x64xf32>,
    %c41 = arith.constant 41 : index
    %c0_49 = arith.constant 0 : index
    %40 = vector.load %arg11[%c41, %c0_49] : memref<64x64xf32, #tpu.memory_space<vmem>>, vector<16x64xf32>
    %c16_50 = arith.constant 16 : index
    %c256_51 = arith.constant 256 : index
    %41 = vector.load %arg12[%c16_50, %c256_51] : memref<32x512xf32, #tpu.memory_space<vmem>>, vector<16x64xf32>
    tpu.vector_store %arg12[%c16_50, %c256_51], %40 {strides = array<i32>} : memref<32x512xf32, #tpu.memory_space<vmem>>, vector<16x64xf32>,
    %c42 = arith.constant 42 : index
    %c0_52 = arith.constant 0 : index
    %42 = vector.load %arg11[%c42, %c0_52] : memref<64x64xf32, #tpu.memory_space<vmem>>, vector<16x64xf32>
    %c16_53 = arith.constant 16 : index
    %c320_54 = arith.constant 320 : index
    %43 = vector.load %arg12[%c16_53, %c320_54] : memref<32x512xf32, #tpu.memory_space<vmem>>, vector<16x64xf32>
    tpu.vector_store %arg12[%c16_53, %c320_54], %42 {strides = array<i32>} : memref<32x512xf32, #tpu.memory_space<vmem>>, vector<16x64xf32>,
    %c43 = arith.constant 43 : index
    %c0_55 = arith.constant 0 : index
    %44 = vector.load %arg11[%c43, %c0_55] : memref<64x64xf32, #tpu.memory_space<vmem>>, vector<16x64xf32>
    %c16_56 = arith.constant 16 : index
    %c384_57 = arith.constant 384 : index
    %45 = vector.load %arg12[%c16_56, %c384_57] : memref<32x512xf32, #tpu.memory_space<vmem>>, vector<16x64xf32>
    tpu.vector_store %arg12[%c16_56, %c384_57], %44 {strides = array<i32>} : memref<32x512xf32, #tpu.memory_space<vmem>>, vector<16x64xf32>,
    %c44 = arith.constant 44 : index
    %c0_58 = arith.constant 0 : index
    %46 = vector.load %arg11[%c44, %c0_58] : memref<64x64xf32, #tpu.memory_space<vmem>>, vector<16x64xf32>
    %c16_59 = arith.constant 16 : index
    %c448_60 = arith.constant 448 : index
    %47 = vector.load %arg12[%c16_59, %c448_60] : memref<32x512xf32, #tpu.memory_space<vmem>>, vector<16x64xf32>
    tpu.vector_store %arg12[%c16_59, %c448_60], %46 {strides = array<i32>} : memref<32x512xf32, #tpu.memory_space<vmem>>, vector<16x64xf32>,
    %c0_61 = arith.constant 0 : index
    %c0_62 = arith.constant 0 : index
    %48 = vector.load %arg12[%c0_61, %c0_62] : memref<32x512xf32, #tpu.memory_space<vmem>>, vector<32x512xf32>
    %cst_63 = arith.constant dense<0.000000e+00> : vector<32x32xf32>
    %49 = tpu.matmul %48, %14, %cst_63 {dimension_numbers = #tpu.dot_dimension_numbers<[1], [0], [0], [1], [0, 0, 1, 1], [], []>} : vector<32x512xf32>, vector<512x32xf32>, vector<32x32xf32> -> vector<32x32xf32>
    %50 = vector.broadcast %15 : vector<1x32xf32> to vector<32x32xf32>
    %51 = arith.addf %49, %50 : vector<32x32xf32>
    %cst_64 = arith.constant 0.000000e+00 : f32
    %52 = vector.broadcast %cst_64 : f32 to vector<32x32xf32>
    %53 = arith.maximumf %51, %52 : vector<32x32xf32>
    %54 = vector.extract_strided_slice %53 {offsets = [0, 0], sizes = [16, 32], strides = [1, 1]} : vector<32x32xf32> to vector<16x32xf32>
    %c8_65 = arith.constant 8 : index
    %c0_66 = arith.constant 0 : index
    %55 = vector.load %arg11[%c8_65, %c0_66] : memref<64x64xf32, #tpu.memory_space<vmem>>, vector<16x32xf32>
    tpu.vector_store %arg11[%c8_65, %c0_66], %54 {strides = array<i32>} : memref<64x64xf32, #tpu.memory_space<vmem>>, vector<16x32xf32>,
    %56 = vector.extract_strided_slice %53 {offsets = [16, 0], sizes = [16, 32], strides = [1, 1]} : vector<32x32xf32> to vector<16x32xf32>
    %c40_67 = arith.constant 40 : index
    %c0_68 = arith.constant 0 : index
    %57 = vector.load %arg11[%c40_67, %c0_68] : memref<64x64xf32, #tpu.memory_space<vmem>>, vector<16x32xf32>
    tpu.vector_store %arg11[%c40_67, %c0_68], %56 {strides = array<i32>} : memref<64x64xf32, #tpu.memory_space<vmem>>, vector<16x32xf32>,
    %c0_69 = arith.constant 0 : index
    %c0_70 = arith.constant 0 : index
    %c0_71 = arith.constant 0 : index
    %58 = vector.load %arg4[%c0_69, %c0_70, %c0_71] : memref<5x256x32xf32, #tpu.memory_space<vmem>>, vector<1x256x32xf32>
    %59 = vector.shape_cast %58 : vector<1x256x32xf32> to vector<256x32xf32>
    %c0_72 = arith.constant 0 : index
    %c0_73 = arith.constant 0 : index
    %c0_74 = arith.constant 0 : index
    %60 = vector.load %arg5[%c0_72, %c0_73, %c0_74] : memref<5x1x32xf32, #tpu.memory_space<vmem>>, vector<1x1x32xf32>
    %61 = vector.shape_cast %60 : vector<1x1x32xf32> to vector<1x32xf32>
    %c5_75 = arith.constant 5 : index
    %c0_76 = arith.constant 0 : index
    %62 = vector.load %arg11[%c5_75, %c0_76] : memref<64x64xf32, #tpu.memory_space<vmem>>, vector<16x32xf32>
    %c0_77 = arith.constant 0 : index
    %c0_78 = arith.constant 0 : index
    %63 = vector.load %arg12[%c0_77, %c0_78] : memref<32x512xf32, #tpu.memory_space<vmem>>, vector<16x32xf32>
    tpu.vector_store %arg12[%c0_77, %c0_78], %62 {strides = array<i32>} : memref<32x512xf32, #tpu.memory_space<vmem>>, vector<16x32xf32>,
    %c6_79 = arith.constant 6 : index
    %c0_80 = arith.constant 0 : index
    %64 = vector.load %arg11[%c6_79, %c0_80] : memref<64x64xf32, #tpu.memory_space<vmem>>, vector<16x32xf32>
    %c0_81 = arith.constant 0 : index
    %c32 = arith.constant 32 : index
    %65 = vector.load %arg12[%c0_81, %c32] : memref<32x512xf32, #tpu.memory_space<vmem>>, vector<16x32xf32>
    tpu.vector_store %arg12[%c0_81, %c32], %64 {strides = array<i32>} : memref<32x512xf32, #tpu.memory_space<vmem>>, vector<16x32xf32>,
    %c7_82 = arith.constant 7 : index
    %c0_83 = arith.constant 0 : index
    %66 = vector.load %arg11[%c7_82, %c0_83] : memref<64x64xf32, #tpu.memory_space<vmem>>, vector<16x32xf32>
    %c0_84 = arith.constant 0 : index
    %c64_85 = arith.constant 64 : index
    %67 = vector.load %arg12[%c0_84, %c64_85] : memref<32x512xf32, #tpu.memory_space<vmem>>, vector<16x32xf32>
    tpu.vector_store %arg12[%c0_84, %c64_85], %66 {strides = array<i32>} : memref<32x512xf32, #tpu.memory_space<vmem>>, vector<16x32xf32>,
    %c8_86 = arith.constant 8 : index
    %c0_87 = arith.constant 0 : index
    %68 = vector.load %arg11[%c8_86, %c0_87] : memref<64x64xf32, #tpu.memory_space<vmem>>, vector<16x32xf32>
    %c0_88 = arith.constant 0 : index
    %c96 = arith.constant 96 : index
    %69 = vector.load %arg12[%c0_88, %c96] : memref<32x512xf32, #tpu.memory_space<vmem>>, vector<16x32xf32>
    tpu.vector_store %arg12[%c0_88, %c96], %68 {strides = array<i32>} : memref<32x512xf32, #tpu.memory_space<vmem>>, vector<16x32xf32>,
    %c9_89 = arith.constant 9 : index
    %c0_90 = arith.constant 0 : index
    %70 = vector.load %arg11[%c9_89, %c0_90] : memref<64x64xf32, #tpu.memory_space<vmem>>, vector<16x32xf32>
    %c0_91 = arith.constant 0 : index
    %c128_92 = arith.constant 128 : index
    %71 = vector.load %arg12[%c0_91, %c128_92] : memref<32x512xf32, #tpu.memory_space<vmem>>, vector<16x32xf32>
    tpu.vector_store %arg12[%c0_91, %c128_92], %70 {strides = array<i32>} : memref<32x512xf32, #tpu.memory_space<vmem>>, vector<16x32xf32>,
    %c10_93 = arith.constant 10 : index
    %c0_94 = arith.constant 0 : index
    %72 = vector.load %arg11[%c10_93, %c0_94] : memref<64x64xf32, #tpu.memory_space<vmem>>, vector<16x32xf32>
    %c0_95 = arith.constant 0 : index
    %c160 = arith.constant 160 : index
    %73 = vector.load %arg12[%c0_95, %c160] : memref<32x512xf32, #tpu.memory_space<vmem>>, vector<16x32xf32>
    tpu.vector_store %arg12[%c0_95, %c160], %72 {strides = array<i32>} : memref<32x512xf32, #tpu.memory_space<vmem>>, vector<16x32xf32>,
    %c11_96 = arith.constant 11 : index
    %c0_97 = arith.constant 0 : index
    %74 = vector.load %arg11[%c11_96, %c0_97] : memref<64x64xf32, #tpu.memory_space<vmem>>, vector<16x32xf32>
    %c0_98 = arith.constant 0 : index
    %c192_99 = arith.constant 192 : index
    %75 = vector.load %arg12[%c0_98, %c192_99] : memref<32x512xf32, #tpu.memory_space<vmem>>, vector<16x32xf32>
    tpu.vector_store %arg12[%c0_98, %c192_99], %74 {strides = array<i32>} : memref<32x512xf32, #tpu.memory_space<vmem>>, vector<16x32xf32>,
    %c12_100 = arith.constant 12 : index
    %c0_101 = arith.constant 0 : index
    %76 = vector.load %arg11[%c12_100, %c0_101] : memref<64x64xf32, #tpu.memory_space<vmem>>, vector<16x32xf32>
    %c0_102 = arith.constant 0 : index
    %c224 = arith.constant 224 : index
    %77 = vector.load %arg12[%c0_102, %c224] : memref<32x512xf32, #tpu.memory_space<vmem>>, vector<16x32xf32>
    tpu.vector_store %arg12[%c0_102, %c224], %76 {strides = array<i32>} : memref<32x512xf32, #tpu.memory_space<vmem>>, vector<16x32xf32>,
    %c37_103 = arith.constant 37 : index
    %c0_104 = arith.constant 0 : index
    %78 = vector.load %arg11[%c37_103, %c0_104] : memref<64x64xf32, #tpu.memory_space<vmem>>, vector<16x32xf32>
    %c16_105 = arith.constant 16 : index
    %c0_106 = arith.constant 0 : index
    %79 = vector.load %arg12[%c16_105, %c0_106] : memref<32x512xf32, #tpu.memory_space<vmem>>, vector<16x32xf32>
    tpu.vector_store %arg12[%c16_105, %c0_106], %78 {strides = array<i32>} : memref<32x512xf32, #tpu.memory_space<vmem>>, vector<16x32xf32>,
    %c38_107 = arith.constant 38 : index
    %c0_108 = arith.constant 0 : index
    %80 = vector.load %arg11[%c38_107, %c0_108] : memref<64x64xf32, #tpu.memory_space<vmem>>, vector<16x32xf32>
    %c16_109 = arith.constant 16 : index
    %c32_110 = arith.constant 32 : index
    %81 = vector.load %arg12[%c16_109, %c32_110] : memref<32x512xf32, #tpu.memory_space<vmem>>, vector<16x32xf32>
    tpu.vector_store %arg12[%c16_109, %c32_110], %80 {strides = array<i32>} : memref<32x512xf32, #tpu.memory_space<vmem>>, vector<16x32xf32>,
    %c39_111 = arith.constant 39 : index
    %c0_112 = arith.constant 0 : index
    %82 = vector.load %arg11[%c39_111, %c0_112] : memref<64x64xf32, #tpu.memory_space<vmem>>, vector<16x32xf32>
    %c16_113 = arith.constant 16 : index
    %c64_114 = arith.constant 64 : index
    %83 = vector.load %arg12[%c16_113, %c64_114] : memref<32x512xf32, #tpu.memory_space<vmem>>, vector<16x32xf32>
    tpu.vector_store %arg12[%c16_113, %c64_114], %82 {strides = array<i32>} : memref<32x512xf32, #tpu.memory_space<vmem>>, vector<16x32xf32>,
    %c40_115 = arith.constant 40 : index
    %c0_116 = arith.constant 0 : index
    %84 = vector.load %arg11[%c40_115, %c0_116] : memref<64x64xf32, #tpu.memory_space<vmem>>, vector<16x32xf32>
    %c16_117 = arith.constant 16 : index
    %c96_118 = arith.constant 96 : index
    %85 = vector.load %arg12[%c16_117, %c96_118] : memref<32x512xf32, #tpu.memory_space<vmem>>, vector<16x32xf32>
    tpu.vector_store %arg12[%c16_117, %c96_118], %84 {strides = array<i32>} : memref<32x512xf32, #tpu.memory_space<vmem>>, vector<16x32xf32>,
    %c41_119 = arith.constant 41 : index
    %c0_120 = arith.constant 0 : index
    %86 = vector.load %arg11[%c41_119, %c0_120] : memref<64x64xf32, #tpu.memory_space<vmem>>, vector<16x32xf32>
    %c16_121 = arith.constant 16 : index
    %c128_122 = arith.constant 128 : index
    %87 = vector.load %arg12[%c16_121, %c128_122] : memref<32x512xf32, #tpu.memory_space<vmem>>, vector<16x32xf32>
    tpu.vector_store %arg12[%c16_121, %c128_122], %86 {strides = array<i32>} : memref<32x512xf32, #tpu.memory_space<vmem>>, vector<16x32xf32>,
    %c42_123 = arith.constant 42 : index
    %c0_124 = arith.constant 0 : index
    %88 = vector.load %arg11[%c42_123, %c0_124] : memref<64x64xf32, #tpu.memory_space<vmem>>, vector<16x32xf32>
    %c16_125 = arith.constant 16 : index
    %c160_126 = arith.constant 160 : index
    %89 = vector.load %arg12[%c16_125, %c160_126] : memref<32x512xf32, #tpu.memory_space<vmem>>, vector<16x32xf32>
    tpu.vector_store %arg12[%c16_125, %c160_126], %88 {strides = array<i32>} : memref<32x512xf32, #tpu.memory_space<vmem>>, vector<16x32xf32>,
    %c43_127 = arith.constant 43 : index
    %c0_128 = arith.constant 0 : index
    %90 = vector.load %arg11[%c43_127, %c0_128] : memref<64x64xf32, #tpu.memory_space<vmem>>, vector<16x32xf32>
    %c16_129 = arith.constant 16 : index
    %c192_130 = arith.constant 192 : index
    %91 = vector.load %arg12[%c16_129, %c192_130] : memref<32x512xf32, #tpu.memory_space<vmem>>, vector<16x32xf32>
    tpu.vector_store %arg12[%c16_129, %c192_130], %90 {strides = array<i32>} : memref<32x512xf32, #tpu.memory_space<vmem>>, vector<16x32xf32>,
    %c44_131 = arith.constant 44 : index
    %c0_132 = arith.constant 0 : index
    %92 = vector.load %arg11[%c44_131, %c0_132] : memref<64x64xf32, #tpu.memory_space<vmem>>, vector<16x32xf32>
    %c16_133 = arith.constant 16 : index
    %c224_134 = arith.constant 224 : index
    %93 = vector.load %arg12[%c16_133, %c224_134] : memref<32x512xf32, #tpu.memory_space<vmem>>, vector<16x32xf32>
    tpu.vector_store %arg12[%c16_133, %c224_134], %92 {strides = array<i32>} : memref<32x512xf32, #tpu.memory_space<vmem>>, vector<16x32xf32>,
    %c0_135 = arith.constant 0 : index
    %c0_136 = arith.constant 0 : index
    %94 = vector.load %arg12[%c0_135, %c0_136] : memref<32x512xf32, #tpu.memory_space<vmem>>, vector<32x256xf32>
    %cst_137 = arith.constant dense<0.000000e+00> : vector<32x32xf32>
    %95 = tpu.matmul %94, %59, %cst_137 {dimension_numbers = #tpu.dot_dimension_numbers<[1], [0], [0], [1], [0, 0, 1, 1], [], []>} : vector<32x256xf32>, vector<256x32xf32>, vector<32x32xf32> -> vector<32x32xf32>
    %96 = vector.broadcast %61 : vector<1x32xf32> to vector<32x32xf32>
    %97 = arith.addf %95, %96 : vector<32x32xf32>
    %cst_138 = arith.constant 0.000000e+00 : f32
    %98 = vector.broadcast %cst_138 : f32 to vector<32x32xf32>
    %99 = arith.maximumf %97, %98 : vector<32x32xf32>
    %c0_139 = arith.constant 0 : index
    %c0_140 = arith.constant 0 : index
    %100 = vector.load %arg13[%c0_139, %c0_140] : memref<32x32xf32, #tpu.memory_space<vmem>>, vector<32x32xf32>
    tpu.vector_store %arg13[%c0_139, %c0_140], %99 {strides = array<i32>} : memref<32x32xf32, #tpu.memory_space<vmem>>, vector<32x32xf32>,
    %c0_141 = arith.constant 0 : index
    %c0_142 = arith.constant 0 : index
    %101 = tpu.strided_load %arg13[%c0_141, %c0_142] {strides = array<i32: 2, 1>} : memref<32x32xf32, #tpu.memory_space<vmem>>, vector<8x32xf32>
    %c1_143 = arith.constant 1 : index
    %c0_144 = arith.constant 0 : index
    %102 = tpu.strided_load %arg13[%c1_143, %c0_144] {strides = array<i32: 2, 1>} : memref<32x32xf32, #tpu.memory_space<vmem>>, vector<8x32xf32>
    %103 = arith.maximumf %101, %102 : vector<8x32xf32>
    %c8_145 = arith.constant 8 : index
    %c0_146 = arith.constant 0 : index
    %104 = vector.load %arg11[%c8_145, %c0_146] : memref<64x64xf32, #tpu.memory_space<vmem>>, vector<8x32xf32>
    tpu.vector_store %arg11[%c8_145, %c0_146], %103 {strides = array<i32>} : memref<64x64xf32, #tpu.memory_space<vmem>>, vector<8x32xf32>,
    %cst_147 = arith.constant 0.000000e+00 : f32
    %105 = vector.broadcast %cst_147 : f32 to vector<4x32xf32>
    %c16_148 = arith.constant 16 : index
    %c0_149 = arith.constant 0 : index
    %106 = vector.load %arg11[%c16_148, %c0_149] : memref<64x64xf32, #tpu.memory_space<vmem>>, vector<4x32xf32>
    tpu.vector_store %arg11[%c16_148, %c0_149], %105 {strides = array<i32>} : memref<64x64xf32, #tpu.memory_space<vmem>>, vector<4x32xf32>,
    %c16_150 = arith.constant 16 : index
    %c0_151 = arith.constant 0 : index
    %107 = tpu.strided_load %arg13[%c16_150, %c0_151] {strides = array<i32: 2, 1>} : memref<32x32xf32, #tpu.memory_space<vmem>>, vector<8x32xf32>
    %c17 = arith.constant 17 : index
    %c0_152 = arith.constant 0 : index
    %108 = tpu.strided_load %arg13[%c17, %c0_152] {strides = array<i32: 2, 1>} : memref<32x32xf32, #tpu.memory_space<vmem>>, vector<8x32xf32>
    %109 = arith.maximumf %107, %108 : vector<8x32xf32>
    %c40_153 = arith.constant 40 : index
    %c0_154 = arith.constant 0 : index
    %110 = vector.load %arg11[%c40_153, %c0_154] : memref<64x64xf32, #tpu.memory_space<vmem>>, vector<8x32xf32>
    tpu.vector_store %arg11[%c40_153, %c0_154], %109 {strides = array<i32>} : memref<64x64xf32, #tpu.memory_space<vmem>>, vector<8x32xf32>,
    %cst_155 = arith.constant 0.000000e+00 : f32
    %111 = vector.broadcast %cst_155 : f32 to vector<4x32xf32>
    %c48 = arith.constant 48 : index
    %c0_156 = arith.constant 0 : index
    %112 = vector.load %arg11[%c48, %c0_156] : memref<64x64xf32, #tpu.memory_space<vmem>>, vector<4x32xf32>
    tpu.vector_store %arg11[%c48, %c0_156], %111 {strides = array<i32>} : memref<64x64xf32, #tpu.memory_space<vmem>>, vector<4x32xf32>,
    %c1_157 = arith.constant 1 : index
    %c0_158 = arith.constant 0 : index
    %c0_159 = arith.constant 0 : index
    %113 = vector.load %arg4[%c1_157, %c0_158, %c0_159] : memref<5x256x32xf32, #tpu.memory_space<vmem>>, vector<1x256x32xf32>
    %114 = vector.shape_cast %113 : vector<1x256x32xf32> to vector<256x32xf32>
    %c1_160 = arith.constant 1 : index
    %c0_161 = arith.constant 0 : index
    %c0_162 = arith.constant 0 : index
    %115 = vector.load %arg5[%c1_160, %c0_161, %c0_162] : memref<5x1x32xf32, #tpu.memory_space<vmem>>, vector<1x1x32xf32>
    %116 = vector.shape_cast %115 : vector<1x1x32xf32> to vector<1x32xf32>
    %c5_163 = arith.constant 5 : index
    %c0_164 = arith.constant 0 : index
    %117 = vector.load %arg11[%c5_163, %c0_164] : memref<64x64xf32, #tpu.memory_space<vmem>>, vector<8x32xf32>
    %c0_165 = arith.constant 0 : index
    %c0_166 = arith.constant 0 : index
    %118 = vector.load %arg12[%c0_165, %c0_166] : memref<32x512xf32, #tpu.memory_space<vmem>>, vector<8x32xf32>
    tpu.vector_store %arg12[%c0_165, %c0_166], %117 {strides = array<i32>} : memref<32x512xf32, #tpu.memory_space<vmem>>, vector<8x32xf32>,
    %c6_167 = arith.constant 6 : index
    %c0_168 = arith.constant 0 : index
    %119 = vector.load %arg11[%c6_167, %c0_168] : memref<64x64xf32, #tpu.memory_space<vmem>>, vector<8x32xf32>
    %c0_169 = arith.constant 0 : index
    %c32_170 = arith.constant 32 : index
    %120 = vector.load %arg12[%c0_169, %c32_170] : memref<32x512xf32, #tpu.memory_space<vmem>>, vector<8x32xf32>
    tpu.vector_store %arg12[%c0_169, %c32_170], %119 {strides = array<i32>} : memref<32x512xf32, #tpu.memory_space<vmem>>, vector<8x32xf32>,
    %c7_171 = arith.constant 7 : index
    %c0_172 = arith.constant 0 : index
    %121 = vector.load %arg11[%c7_171, %c0_172] : memref<64x64xf32, #tpu.memory_space<vmem>>, vector<8x32xf32>
    %c0_173 = arith.constant 0 : index
    %c64_174 = arith.constant 64 : index
    %122 = vector.load %arg12[%c0_173, %c64_174] : memref<32x512xf32, #tpu.memory_space<vmem>>, vector<8x32xf32>
    tpu.vector_store %arg12[%c0_173, %c64_174], %121 {strides = array<i32>} : memref<32x512xf32, #tpu.memory_space<vmem>>, vector<8x32xf32>,
    %c8_175 = arith.constant 8 : index
    %c0_176 = arith.constant 0 : index
    %123 = vector.load %arg11[%c8_175, %c0_176] : memref<64x64xf32, #tpu.memory_space<vmem>>, vector<8x32xf32>
    %c0_177 = arith.constant 0 : index
    %c96_178 = arith.constant 96 : index
    %124 = vector.load %arg12[%c0_177, %c96_178] : memref<32x512xf32, #tpu.memory_space<vmem>>, vector<8x32xf32>
    tpu.vector_store %arg12[%c0_177, %c96_178], %123 {strides = array<i32>} : memref<32x512xf32, #tpu.memory_space<vmem>>, vector<8x32xf32>,
    %c9_179 = arith.constant 9 : index
    %c0_180 = arith.constant 0 : index
    %125 = vector.load %arg11[%c9_179, %c0_180] : memref<64x64xf32, #tpu.memory_space<vmem>>, vector<8x32xf32>
    %c0_181 = arith.constant 0 : index
    %c128_182 = arith.constant 128 : index
    %126 = vector.load %arg12[%c0_181, %c128_182] : memref<32x512xf32, #tpu.memory_space<vmem>>, vector<8x32xf32>
    tpu.vector_store %arg12[%c0_181, %c128_182], %125 {strides = array<i32>} : memref<32x512xf32, #tpu.memory_space<vmem>>, vector<8x32xf32>,
    %c10_183 = arith.constant 10 : index
    %c0_184 = arith.constant 0 : index
    %127 = vector.load %arg11[%c10_183, %c0_184] : memref<64x64xf32, #tpu.memory_space<vmem>>, vector<8x32xf32>
    %c0_185 = arith.constant 0 : index
    %c160_186 = arith.constant 160 : index
    %128 = vector.load %arg12[%c0_185, %c160_186] : memref<32x512xf32, #tpu.memory_space<vmem>>, vector<8x32xf32>
    tpu.vector_store %arg12[%c0_185, %c160_186], %127 {strides = array<i32>} : memref<32x512xf32, #tpu.memory_space<vmem>>, vector<8x32xf32>,
    %c11_187 = arith.constant 11 : index
    %c0_188 = arith.constant 0 : index
    %129 = vector.load %arg11[%c11_187, %c0_188] : memref<64x64xf32, #tpu.memory_space<vmem>>, vector<8x32xf32>
    %c0_189 = arith.constant 0 : index
    %c192_190 = arith.constant 192 : index
    %130 = vector.load %arg12[%c0_189, %c192_190] : memref<32x512xf32, #tpu.memory_space<vmem>>, vector<8x32xf32>
    tpu.vector_store %arg12[%c0_189, %c192_190], %129 {strides = array<i32>} : memref<32x512xf32, #tpu.memory_space<vmem>>, vector<8x32xf32>,
    %c12_191 = arith.constant 12 : index
    %c0_192 = arith.constant 0 : index
    %131 = vector.load %arg11[%c12_191, %c0_192] : memref<64x64xf32, #tpu.memory_space<vmem>>, vector<8x32xf32>
    %c0_193 = arith.constant 0 : index
    %c224_194 = arith.constant 224 : index
    %132 = vector.load %arg12[%c0_193, %c224_194] : memref<32x512xf32, #tpu.memory_space<vmem>>, vector<8x32xf32>
    tpu.vector_store %arg12[%c0_193, %c224_194], %131 {strides = array<i32>} : memref<32x512xf32, #tpu.memory_space<vmem>>, vector<8x32xf32>,
    %c37_195 = arith.constant 37 : index
    %c0_196 = arith.constant 0 : index
    %133 = vector.load %arg11[%c37_195, %c0_196] : memref<64x64xf32, #tpu.memory_space<vmem>>, vector<8x32xf32>
    %c8_197 = arith.constant 8 : index
    %c0_198 = arith.constant 0 : index
    %134 = vector.load %arg12[%c8_197, %c0_198] : memref<32x512xf32, #tpu.memory_space<vmem>>, vector<8x32xf32>
    tpu.vector_store %arg12[%c8_197, %c0_198], %133 {strides = array<i32>} : memref<32x512xf32, #tpu.memory_space<vmem>>, vector<8x32xf32>,
    %c38_199 = arith.constant 38 : index
    %c0_200 = arith.constant 0 : index
    %135 = vector.load %arg11[%c38_199, %c0_200] : memref<64x64xf32, #tpu.memory_space<vmem>>, vector<8x32xf32>
    %c8_201 = arith.constant 8 : index
    %c32_202 = arith.constant 32 : index
    %136 = vector.load %arg12[%c8_201, %c32_202] : memref<32x512xf32, #tpu.memory_space<vmem>>, vector<8x32xf32>
    tpu.vector_store %arg12[%c8_201, %c32_202], %135 {strides = array<i32>} : memref<32x512xf32, #tpu.memory_space<vmem>>, vector<8x32xf32>,
    %c39_203 = arith.constant 39 : index
    %c0_204 = arith.constant 0 : index
    %137 = vector.load %arg11[%c39_203, %c0_204] : memref<64x64xf32, #tpu.memory_space<vmem>>, vector<8x32xf32>
    %c8_205 = arith.constant 8 : index
    %c64_206 = arith.constant 64 : index
    %138 = vector.load %arg12[%c8_205, %c64_206] : memref<32x512xf32, #tpu.memory_space<vmem>>, vector<8x32xf32>
    tpu.vector_store %arg12[%c8_205, %c64_206], %137 {strides = array<i32>} : memref<32x512xf32, #tpu.memory_space<vmem>>, vector<8x32xf32>,
    %c40_207 = arith.constant 40 : index
    %c0_208 = arith.constant 0 : index
    %139 = vector.load %arg11[%c40_207, %c0_208] : memref<64x64xf32, #tpu.memory_space<vmem>>, vector<8x32xf32>
    %c8_209 = arith.constant 8 : index
    %c96_210 = arith.constant 96 : index
    %140 = vector.load %arg12[%c8_209, %c96_210] : memref<32x512xf32, #tpu.memory_space<vmem>>, vector<8x32xf32>
    tpu.vector_store %arg12[%c8_209, %c96_210], %139 {strides = array<i32>} : memref<32x512xf32, #tpu.memory_space<vmem>>, vector<8x32xf32>,
    %c41_211 = arith.constant 41 : index
    %c0_212 = arith.constant 0 : index
    %141 = vector.load %arg11[%c41_211, %c0_212] : memref<64x64xf32, #tpu.memory_space<vmem>>, vector<8x32xf32>
    %c8_213 = arith.constant 8 : index
    %c128_214 = arith.constant 128 : index
    %142 = vector.load %arg12[%c8_213, %c128_214] : memref<32x512xf32, #tpu.memory_space<vmem>>, vector<8x32xf32>
    tpu.vector_store %arg12[%c8_213, %c128_214], %141 {strides = array<i32>} : memref<32x512xf32, #tpu.memory_space<vmem>>, vector<8x32xf32>,
    %c42_215 = arith.constant 42 : index
    %c0_216 = arith.constant 0 : index
    %143 = vector.load %arg11[%c42_215, %c0_216] : memref<64x64xf32, #tpu.memory_space<vmem>>, vector<8x32xf32>
    %c8_217 = arith.constant 8 : index
    %c160_218 = arith.constant 160 : index
    %144 = vector.load %arg12[%c8_217, %c160_218] : memref<32x512xf32, #tpu.memory_space<vmem>>, vector<8x32xf32>
    tpu.vector_store %arg12[%c8_217, %c160_218], %143 {strides = array<i32>} : memref<32x512xf32, #tpu.memory_space<vmem>>, vector<8x32xf32>,
    %c43_219 = arith.constant 43 : index
    %c0_220 = arith.constant 0 : index
    %145 = vector.load %arg11[%c43_219, %c0_220] : memref<64x64xf32, #tpu.memory_space<vmem>>, vector<8x32xf32>
    %c8_221 = arith.constant 8 : index
    %c192_222 = arith.constant 192 : index
    %146 = vector.load %arg12[%c8_221, %c192_222] : memref<32x512xf32, #tpu.memory_space<vmem>>, vector<8x32xf32>
    tpu.vector_store %arg12[%c8_221, %c192_222], %145 {strides = array<i32>} : memref<32x512xf32, #tpu.memory_space<vmem>>, vector<8x32xf32>,
    %c44_223 = arith.constant 44 : index
    %c0_224 = arith.constant 0 : index
    %147 = vector.load %arg11[%c44_223, %c0_224] : memref<64x64xf32, #tpu.memory_space<vmem>>, vector<8x32xf32>
    %c8_225 = arith.constant 8 : index
    %c224_226 = arith.constant 224 : index
    %148 = vector.load %arg12[%c8_225, %c224_226] : memref<32x512xf32, #tpu.memory_space<vmem>>, vector<8x32xf32>
    tpu.vector_store %arg12[%c8_225, %c224_226], %147 {strides = array<i32>} : memref<32x512xf32, #tpu.memory_space<vmem>>, vector<8x32xf32>,
    %c0_227 = arith.constant 0 : index
    %c0_228 = arith.constant 0 : index
    %149 = vector.load %arg12[%c0_227, %c0_228] : memref<32x512xf32, #tpu.memory_space<vmem>>, vector<16x256xf32>
    %cst_229 = arith.constant dense<0.000000e+00> : vector<16x32xf32>
    %150 = tpu.matmul %149, %114, %cst_229 {dimension_numbers = #tpu.dot_dimension_numbers<[1], [0], [0], [1], [0, 0, 1, 1], [], []>} : vector<16x256xf32>, vector<256x32xf32>, vector<16x32xf32> -> vector<16x32xf32>
    %151 = vector.broadcast %116 : vector<1x32xf32> to vector<16x32xf32>
    %152 = arith.addf %150, %151 : vector<16x32xf32>
    %cst_230 = arith.constant 0.000000e+00 : f32
    %153 = vector.broadcast %cst_230 : f32 to vector<16x32xf32>
    %154 = arith.maximumf %152, %153 : vector<16x32xf32>
    %155 = vector.extract_strided_slice %154 {offsets = [0, 0], sizes = [8, 32], strides = [1, 1]} : vector<16x32xf32> to vector<8x32xf32>
    %c8_231 = arith.constant 8 : index
    %c0_232 = arith.constant 0 : index
    %156 = vector.load %arg11[%c8_231, %c0_232] : memref<64x64xf32, #tpu.memory_space<vmem>>, vector<8x32xf32>
    tpu.vector_store %arg11[%c8_231, %c0_232], %155 {strides = array<i32>} : memref<64x64xf32, #tpu.memory_space<vmem>>, vector<8x32xf32>,
    %157 = vector.extract_strided_slice %154 {offsets = [8, 0], sizes = [8, 32], strides = [1, 1]} : vector<16x32xf32> to vector<8x32xf32>
    %c40_233 = arith.constant 40 : index
    %c0_234 = arith.constant 0 : index
    %158 = vector.load %arg11[%c40_233, %c0_234] : memref<64x64xf32, #tpu.memory_space<vmem>>, vector<8x32xf32>
    tpu.vector_store %arg11[%c40_233, %c0_234], %157 {strides = array<i32>} : memref<64x64xf32, #tpu.memory_space<vmem>>, vector<8x32xf32>,
    %c2 = arith.constant 2 : index
    %c0_235 = arith.constant 0 : index
    %c0_236 = arith.constant 0 : index
    %159 = vector.load %arg4[%c2, %c0_235, %c0_236] : memref<5x256x32xf32, #tpu.memory_space<vmem>>, vector<1x256x32xf32>
    %160 = vector.shape_cast %159 : vector<1x256x32xf32> to vector<256x32xf32>
    %c2_237 = arith.constant 2 : index
    %c0_238 = arith.constant 0 : index
    %c0_239 = arith.constant 0 : index
    %161 = vector.load %arg5[%c2_237, %c0_238, %c0_239] : memref<5x1x32xf32, #tpu.memory_space<vmem>>, vector<1x1x32xf32>
    %162 = vector.shape_cast %161 : vector<1x1x32xf32> to vector<1x32xf32>
    %c5_240 = arith.constant 5 : index
    %c0_241 = arith.constant 0 : index
    %163 = vector.load %arg11[%c5_240, %c0_241] : memref<64x64xf32, #tpu.memory_space<vmem>>, vector<8x32xf32>
    %c0_242 = arith.constant 0 : index
    %c0_243 = arith.constant 0 : index
    %164 = vector.load %arg12[%c0_242, %c0_243] : memref<32x512xf32, #tpu.memory_space<vmem>>, vector<8x32xf32>
    tpu.vector_store %arg12[%c0_242, %c0_243], %163 {strides = array<i32>} : memref<32x512xf32, #tpu.memory_space<vmem>>, vector<8x32xf32>,
    %c6_244 = arith.constant 6 : index
    %c0_245 = arith.constant 0 : index
    %165 = vector.load %arg11[%c6_244, %c0_245] : memref<64x64xf32, #tpu.memory_space<vmem>>, vector<8x32xf32>
    %c0_246 = arith.constant 0 : index
    %c32_247 = arith.constant 32 : index
    %166 = vector.load %arg12[%c0_246, %c32_247] : memref<32x512xf32, #tpu.memory_space<vmem>>, vector<8x32xf32>
    tpu.vector_store %arg12[%c0_246, %c32_247], %165 {strides = array<i32>} : memref<32x512xf32, #tpu.memory_space<vmem>>, vector<8x32xf32>,
    %c7_248 = arith.constant 7 : index
    %c0_249 = arith.constant 0 : index
    %167 = vector.load %arg11[%c7_248, %c0_249] : memref<64x64xf32, #tpu.memory_space<vmem>>, vector<8x32xf32>
    %c0_250 = arith.constant 0 : index
    %c64_251 = arith.constant 64 : index
    %168 = vector.load %arg12[%c0_250, %c64_251] : memref<32x512xf32, #tpu.memory_space<vmem>>, vector<8x32xf32>
    tpu.vector_store %arg12[%c0_250, %c64_251], %167 {strides = array<i32>} : memref<32x512xf32, #tpu.memory_space<vmem>>, vector<8x32xf32>,
    %c8_252 = arith.constant 8 : index
    %c0_253 = arith.constant 0 : index
    %169 = vector.load %arg11[%c8_252, %c0_253] : memref<64x64xf32, #tpu.memory_space<vmem>>, vector<8x32xf32>
    %c0_254 = arith.constant 0 : index
    %c96_255 = arith.constant 96 : index
    %170 = vector.load %arg12[%c0_254, %c96_255] : memref<32x512xf32, #tpu.memory_space<vmem>>, vector<8x32xf32>
    tpu.vector_store %arg12[%c0_254, %c96_255], %169 {strides = array<i32>} : memref<32x512xf32, #tpu.memory_space<vmem>>, vector<8x32xf32>,
    %c9_256 = arith.constant 9 : index
    %c0_257 = arith.constant 0 : index
    %171 = vector.load %arg11[%c9_256, %c0_257] : memref<64x64xf32, #tpu.memory_space<vmem>>, vector<8x32xf32>
    %c0_258 = arith.constant 0 : index
    %c128_259 = arith.constant 128 : index
    %172 = vector.load %arg12[%c0_258, %c128_259] : memref<32x512xf32, #tpu.memory_space<vmem>>, vector<8x32xf32>
    tpu.vector_store %arg12[%c0_258, %c128_259], %171 {strides = array<i32>} : memref<32x512xf32, #tpu.memory_space<vmem>>, vector<8x32xf32>,
    %c10_260 = arith.constant 10 : index
    %c0_261 = arith.constant 0 : index
    %173 = vector.load %arg11[%c10_260, %c0_261] : memref<64x64xf32, #tpu.memory_space<vmem>>, vector<8x32xf32>
    %c0_262 = arith.constant 0 : index
    %c160_263 = arith.constant 160 : index
    %174 = vector.load %arg12[%c0_262, %c160_263] : memref<32x512xf32, #tpu.memory_space<vmem>>, vector<8x32xf32>
    tpu.vector_store %arg12[%c0_262, %c160_263], %173 {strides = array<i32>} : memref<32x512xf32, #tpu.memory_space<vmem>>, vector<8x32xf32>,
    %c11_264 = arith.constant 11 : index
    %c0_265 = arith.constant 0 : index
    %175 = vector.load %arg11[%c11_264, %c0_265] : memref<64x64xf32, #tpu.memory_space<vmem>>, vector<8x32xf32>
    %c0_266 = arith.constant 0 : index
    %c192_267 = arith.constant 192 : index
    %176 = vector.load %arg12[%c0_266, %c192_267] : memref<32x512xf32, #tpu.memory_space<vmem>>, vector<8x32xf32>
    tpu.vector_store %arg12[%c0_266, %c192_267], %175 {strides = array<i32>} : memref<32x512xf32, #tpu.memory_space<vmem>>, vector<8x32xf32>,
    %c12_268 = arith.constant 12 : index
    %c0_269 = arith.constant 0 : index
    %177 = vector.load %arg11[%c12_268, %c0_269] : memref<64x64xf32, #tpu.memory_space<vmem>>, vector<8x32xf32>
    %c0_270 = arith.constant 0 : index
    %c224_271 = arith.constant 224 : index
    %178 = vector.load %arg12[%c0_270, %c224_271] : memref<32x512xf32, #tpu.memory_space<vmem>>, vector<8x32xf32>
    tpu.vector_store %arg12[%c0_270, %c224_271], %177 {strides = array<i32>} : memref<32x512xf32, #tpu.memory_space<vmem>>, vector<8x32xf32>,
    %c37_272 = arith.constant 37 : index
    %c0_273 = arith.constant 0 : index
    %179 = vector.load %arg11[%c37_272, %c0_273] : memref<64x64xf32, #tpu.memory_space<vmem>>, vector<8x32xf32>
    %c8_274 = arith.constant 8 : index
    %c0_275 = arith.constant 0 : index
    %180 = vector.load %arg12[%c8_274, %c0_275] : memref<32x512xf32, #tpu.memory_space<vmem>>, vector<8x32xf32>
    tpu.vector_store %arg12[%c8_274, %c0_275], %179 {strides = array<i32>} : memref<32x512xf32, #tpu.memory_space<vmem>>, vector<8x32xf32>,
    %c38_276 = arith.constant 38 : index
    %c0_277 = arith.constant 0 : index
    %181 = vector.load %arg11[%c38_276, %c0_277] : memref<64x64xf32, #tpu.memory_space<vmem>>, vector<8x32xf32>
    %c8_278 = arith.constant 8 : index
    %c32_279 = arith.constant 32 : index
    %182 = vector.load %arg12[%c8_278, %c32_279] : memref<32x512xf32, #tpu.memory_space<vmem>>, vector<8x32xf32>
    tpu.vector_store %arg12[%c8_278, %c32_279], %181 {strides = array<i32>} : memref<32x512xf32, #tpu.memory_space<vmem>>, vector<8x32xf32>,
    %c39_280 = arith.constant 39 : index
    %c0_281 = arith.constant 0 : index
    %183 = vector.load %arg11[%c39_280, %c0_281] : memref<64x64xf32, #tpu.memory_space<vmem>>, vector<8x32xf32>
    %c8_282 = arith.constant 8 : index
    %c64_283 = arith.constant 64 : index
    %184 = vector.load %arg12[%c8_282, %c64_283] : memref<32x512xf32, #tpu.memory_space<vmem>>, vector<8x32xf32>
    tpu.vector_store %arg12[%c8_282, %c64_283], %183 {strides = array<i32>} : memref<32x512xf32, #tpu.memory_space<vmem>>, vector<8x32xf32>,
    %c40_284 = arith.constant 40 : index
    %c0_285 = arith.constant 0 : index
    %185 = vector.load %arg11[%c40_284, %c0_285] : memref<64x64xf32, #tpu.memory_space<vmem>>, vector<8x32xf32>
    %c8_286 = arith.constant 8 : index
    %c96_287 = arith.constant 96 : index
    %186 = vector.load %arg12[%c8_286, %c96_287] : memref<32x512xf32, #tpu.memory_space<vmem>>, vector<8x32xf32>
    tpu.vector_store %arg12[%c8_286, %c96_287], %185 {strides = array<i32>} : memref<32x512xf32, #tpu.memory_space<vmem>>, vector<8x32xf32>,
    %c41_288 = arith.constant 41 : index
    %c0_289 = arith.constant 0 : index
    %187 = vector.load %arg11[%c41_288, %c0_289] : memref<64x64xf32, #tpu.memory_space<vmem>>, vector<8x32xf32>
    %c8_290 = arith.constant 8 : index
    %c128_291 = arith.constant 128 : index
    %188 = vector.load %arg12[%c8_290, %c128_291] : memref<32x512xf32, #tpu.memory_space<vmem>>, vector<8x32xf32>
    tpu.vector_store %arg12[%c8_290, %c128_291], %187 {strides = array<i32>} : memref<32x512xf32, #tpu.memory_space<vmem>>, vector<8x32xf32>,
    %c42_292 = arith.constant 42 : index
    %c0_293 = arith.constant 0 : index
    %189 = vector.load %arg11[%c42_292, %c0_293] : memref<64x64xf32, #tpu.memory_space<vmem>>, vector<8x32xf32>
    %c8_294 = arith.constant 8 : index
    %c160_295 = arith.constant 160 : index
    %190 = vector.load %arg12[%c8_294, %c160_295] : memref<32x512xf32, #tpu.memory_space<vmem>>, vector<8x32xf32>
    tpu.vector_store %arg12[%c8_294, %c160_295], %189 {strides = array<i32>} : memref<32x512xf32, #tpu.memory_space<vmem>>, vector<8x32xf32>,
    %c43_296 = arith.constant 43 : index
    %c0_297 = arith.constant 0 : index
    %191 = vector.load %arg11[%c43_296, %c0_297] : memref<64x64xf32, #tpu.memory_space<vmem>>, vector<8x32xf32>
    %c8_298 = arith.constant 8 : index
    %c192_299 = arith.constant 192 : index
    %192 = vector.load %arg12[%c8_298, %c192_299] : memref<32x512xf32, #tpu.memory_space<vmem>>, vector<8x32xf32>
    tpu.vector_store %arg12[%c8_298, %c192_299], %191 {strides = array<i32>} : memref<32x512xf32, #tpu.memory_space<vmem>>, vector<8x32xf32>,
    %c44_300 = arith.constant 44 : index
    %c0_301 = arith.constant 0 : index
    %193 = vector.load %arg11[%c44_300, %c0_301] : memref<64x64xf32, #tpu.memory_space<vmem>>, vector<8x32xf32>
    %c8_302 = arith.constant 8 : index
    %c224_303 = arith.constant 224 : index
    %194 = vector.load %arg12[%c8_302, %c224_303] : memref<32x512xf32, #tpu.memory_space<vmem>>, vector<8x32xf32>
    tpu.vector_store %arg12[%c8_302, %c224_303], %193 {strides = array<i32>} : memref<32x512xf32, #tpu.memory_space<vmem>>, vector<8x32xf32>,
    %c0_304 = arith.constant 0 : index
    %c0_305 = arith.constant 0 : index
    %195 = vector.load %arg12[%c0_304, %c0_305] : memref<32x512xf32, #tpu.memory_space<vmem>>, vector<16x256xf32>
    %cst_306 = arith.constant dense<0.000000e+00> : vector<16x32xf32>
    %196 = tpu.matmul %195, %160, %cst_306 {dimension_numbers = #tpu.dot_dimension_numbers<[1], [0], [0], [1], [0, 0, 1, 1], [], []>} : vector<16x256xf32>, vector<256x32xf32>, vector<16x32xf32> -> vector<16x32xf32>
    %197 = vector.broadcast %162 : vector<1x32xf32> to vector<16x32xf32>
    %198 = arith.addf %196, %197 : vector<16x32xf32>
    %cst_307 = arith.constant 0.000000e+00 : f32
    %199 = vector.broadcast %cst_307 : f32 to vector<16x32xf32>
    %200 = arith.maximumf %198, %199 : vector<16x32xf32>
    %c0_308 = arith.constant 0 : index
    %c0_309 = arith.constant 0 : index
    %201 = vector.load %arg13[%c0_308, %c0_309] : memref<32x32xf32, #tpu.memory_space<vmem>>, vector<16x32xf32>
    tpu.vector_store %arg13[%c0_308, %c0_309], %200 {strides = array<i32>} : memref<32x32xf32, #tpu.memory_space<vmem>>, vector<16x32xf32>,
    %c0_310 = arith.constant 0 : index
    %c0_311 = arith.constant 0 : index
    %202 = tpu.strided_load %arg13[%c0_310, %c0_311] {strides = array<i32: 2, 1>} : memref<32x32xf32, #tpu.memory_space<vmem>>, vector<4x32xf32>
    %c1_312 = arith.constant 1 : index
    %c0_313 = arith.constant 0 : index
    %203 = tpu.strided_load %arg13[%c1_312, %c0_313] {strides = array<i32: 2, 1>} : memref<32x32xf32, #tpu.memory_space<vmem>>, vector<4x32xf32>
    %204 = arith.maximumf %202, %203 : vector<4x32xf32>
    %c8_314 = arith.constant 8 : index
    %c0_315 = arith.constant 0 : index
    %205 = vector.load %arg11[%c8_314, %c0_315] : memref<64x64xf32, #tpu.memory_space<vmem>>, vector<4x32xf32>
    tpu.vector_store %arg11[%c8_314, %c0_315], %204 {strides = array<i32>} : memref<64x64xf32, #tpu.memory_space<vmem>>, vector<4x32xf32>,
    %cst_316 = arith.constant 0.000000e+00 : f32
    %206 = vector.broadcast %cst_316 : f32 to vector<4x32xf32>
    %c12_317 = arith.constant 12 : index
    %c0_318 = arith.constant 0 : index
    %207 = vector.load %arg11[%c12_317, %c0_318] : memref<64x64xf32, #tpu.memory_space<vmem>>, vector<4x32xf32>
    tpu.vector_store %arg11[%c12_317, %c0_318], %206 {strides = array<i32>} : memref<64x64xf32, #tpu.memory_space<vmem>>, vector<4x32xf32>,
    %c8_319 = arith.constant 8 : index
    %c0_320 = arith.constant 0 : index
    %208 = tpu.strided_load %arg13[%c8_319, %c0_320] {strides = array<i32: 2, 1>} : memref<32x32xf32, #tpu.memory_space<vmem>>, vector<4x32xf32>
    %c9_321 = arith.constant 9 : index
    %c0_322 = arith.constant 0 : index
    %209 = tpu.strided_load %arg13[%c9_321, %c0_322] {strides = array<i32: 2, 1>} : memref<32x32xf32, #tpu.memory_space<vmem>>, vector<4x32xf32>
    %210 = arith.maximumf %208, %209 : vector<4x32xf32>
    %c40_323 = arith.constant 40 : index
    %c0_324 = arith.constant 0 : index
    %211 = vector.load %arg11[%c40_323, %c0_324] : memref<64x64xf32, #tpu.memory_space<vmem>>, vector<4x32xf32>
    tpu.vector_store %arg11[%c40_323, %c0_324], %210 {strides = array<i32>} : memref<64x64xf32, #tpu.memory_space<vmem>>, vector<4x32xf32>,
    %cst_325 = arith.constant 0.000000e+00 : f32
    %212 = vector.broadcast %cst_325 : f32 to vector<4x32xf32>
    %c44_326 = arith.constant 44 : index
    %c0_327 = arith.constant 0 : index
    %213 = vector.load %arg11[%c44_326, %c0_327] : memref<64x64xf32, #tpu.memory_space<vmem>>, vector<4x32xf32>
    tpu.vector_store %arg11[%c44_326, %c0_327], %212 {strides = array<i32>} : memref<64x64xf32, #tpu.memory_space<vmem>>, vector<4x32xf32>,
    %c3 = arith.constant 3 : index
    %c0_328 = arith.constant 0 : index
    %c0_329 = arith.constant 0 : index
    %214 = vector.load %arg4[%c3, %c0_328, %c0_329] : memref<5x256x32xf32, #tpu.memory_space<vmem>>, vector<1x256x32xf32>
    %215 = vector.shape_cast %214 : vector<1x256x32xf32> to vector<256x32xf32>
    %c3_330 = arith.constant 3 : index
    %c0_331 = arith.constant 0 : index
    %c0_332 = arith.constant 0 : index
    %216 = vector.load %arg5[%c3_330, %c0_331, %c0_332] : memref<5x1x32xf32, #tpu.memory_space<vmem>>, vector<1x1x32xf32>
    %217 = vector.shape_cast %216 : vector<1x1x32xf32> to vector<1x32xf32>
    %c5_333 = arith.constant 5 : index
    %c0_334 = arith.constant 0 : index
    %218 = vector.load %arg11[%c5_333, %c0_334] : memref<64x64xf32, #tpu.memory_space<vmem>>, vector<4x32xf32>
    %c0_335 = arith.constant 0 : index
    %c0_336 = arith.constant 0 : index
    %219 = vector.load %arg12[%c0_335, %c0_336] : memref<32x512xf32, #tpu.memory_space<vmem>>, vector<4x32xf32>
    tpu.vector_store %arg12[%c0_335, %c0_336], %218 {strides = array<i32>} : memref<32x512xf32, #tpu.memory_space<vmem>>, vector<4x32xf32>,
    %c6_337 = arith.constant 6 : index
    %c0_338 = arith.constant 0 : index
    %220 = vector.load %arg11[%c6_337, %c0_338] : memref<64x64xf32, #tpu.memory_space<vmem>>, vector<4x32xf32>
    %c0_339 = arith.constant 0 : index
    %c32_340 = arith.constant 32 : index
    %221 = vector.load %arg12[%c0_339, %c32_340] : memref<32x512xf32, #tpu.memory_space<vmem>>, vector<4x32xf32>
    tpu.vector_store %arg12[%c0_339, %c32_340], %220 {strides = array<i32>} : memref<32x512xf32, #tpu.memory_space<vmem>>, vector<4x32xf32>,
    %c7_341 = arith.constant 7 : index
    %c0_342 = arith.constant 0 : index
    %222 = vector.load %arg11[%c7_341, %c0_342] : memref<64x64xf32, #tpu.memory_space<vmem>>, vector<4x32xf32>
    %c0_343 = arith.constant 0 : index
    %c64_344 = arith.constant 64 : index
    %223 = vector.load %arg12[%c0_343, %c64_344] : memref<32x512xf32, #tpu.memory_space<vmem>>, vector<4x32xf32>
    tpu.vector_store %arg12[%c0_343, %c64_344], %222 {strides = array<i32>} : memref<32x512xf32, #tpu.memory_space<vmem>>, vector<4x32xf32>,
    %c8_345 = arith.constant 8 : index
    %c0_346 = arith.constant 0 : index
    %224 = vector.load %arg11[%c8_345, %c0_346] : memref<64x64xf32, #tpu.memory_space<vmem>>, vector<4x32xf32>
    %c0_347 = arith.constant 0 : index
    %c96_348 = arith.constant 96 : index
    %225 = vector.load %arg12[%c0_347, %c96_348] : memref<32x512xf32, #tpu.memory_space<vmem>>, vector<4x32xf32>
    tpu.vector_store %arg12[%c0_347, %c96_348], %224 {strides = array<i32>} : memref<32x512xf32, #tpu.memory_space<vmem>>, vector<4x32xf32>,
    %c9_349 = arith.constant 9 : index
    %c0_350 = arith.constant 0 : index
    %226 = vector.load %arg11[%c9_349, %c0_350] : memref<64x64xf32, #tpu.memory_space<vmem>>, vector<4x32xf32>
    %c0_351 = arith.constant 0 : index
    %c128_352 = arith.constant 128 : index
    %227 = vector.load %arg12[%c0_351, %c128_352] : memref<32x512xf32, #tpu.memory_space<vmem>>, vector<4x32xf32>
    tpu.vector_store %arg12[%c0_351, %c128_352], %226 {strides = array<i32>} : memref<32x512xf32, #tpu.memory_space<vmem>>, vector<4x32xf32>,
    %c10_353 = arith.constant 10 : index
    %c0_354 = arith.constant 0 : index
    %228 = vector.load %arg11[%c10_353, %c0_354] : memref<64x64xf32, #tpu.memory_space<vmem>>, vector<4x32xf32>
    %c0_355 = arith.constant 0 : index
    %c160_356 = arith.constant 160 : index
    %229 = vector.load %arg12[%c0_355, %c160_356] : memref<32x512xf32, #tpu.memory_space<vmem>>, vector<4x32xf32>
    tpu.vector_store %arg12[%c0_355, %c160_356], %228 {strides = array<i32>} : memref<32x512xf32, #tpu.memory_space<vmem>>, vector<4x32xf32>,
    %c11_357 = arith.constant 11 : index
    %c0_358 = arith.constant 0 : index
    %230 = vector.load %arg11[%c11_357, %c0_358] : memref<64x64xf32, #tpu.memory_space<vmem>>, vector<4x32xf32>
    %c0_359 = arith.constant 0 : index
    %c192_360 = arith.constant 192 : index
    %231 = vector.load %arg12[%c0_359, %c192_360] : memref<32x512xf32, #tpu.memory_space<vmem>>, vector<4x32xf32>
    tpu.vector_store %arg12[%c0_359, %c192_360], %230 {strides = array<i32>} : memref<32x512xf32, #tpu.memory_space<vmem>>, vector<4x32xf32>,
    %c12_361 = arith.constant 12 : index
    %c0_362 = arith.constant 0 : index
    %232 = vector.load %arg11[%c12_361, %c0_362] : memref<64x64xf32, #tpu.memory_space<vmem>>, vector<4x32xf32>
    %c0_363 = arith.constant 0 : index
    %c224_364 = arith.constant 224 : index
    %233 = vector.load %arg12[%c0_363, %c224_364] : memref<32x512xf32, #tpu.memory_space<vmem>>, vector<4x32xf32>
    tpu.vector_store %arg12[%c0_363, %c224_364], %232 {strides = array<i32>} : memref<32x512xf32, #tpu.memory_space<vmem>>, vector<4x32xf32>,
    %c37_365 = arith.constant 37 : index
    %c0_366 = arith.constant 0 : index
    %234 = vector.load %arg11[%c37_365, %c0_366] : memref<64x64xf32, #tpu.memory_space<vmem>>, vector<4x32xf32>
    %c4 = arith.constant 4 : index
    %c0_367 = arith.constant 0 : index
    %235 = vector.load %arg12[%c4, %c0_367] : memref<32x512xf32, #tpu.memory_space<vmem>>, vector<4x32xf32>
    tpu.vector_store %arg12[%c4, %c0_367], %234 {strides = array<i32>} : memref<32x512xf32, #tpu.memory_space<vmem>>, vector<4x32xf32>,
    %c38_368 = arith.constant 38 : index
    %c0_369 = arith.constant 0 : index
    %236 = vector.load %arg11[%c38_368, %c0_369] : memref<64x64xf32, #tpu.memory_space<vmem>>, vector<4x32xf32>
    %c4_370 = arith.constant 4 : index
    %c32_371 = arith.constant 32 : index
    %237 = vector.load %arg12[%c4_370, %c32_371] : memref<32x512xf32, #tpu.memory_space<vmem>>, vector<4x32xf32>
    tpu.vector_store %arg12[%c4_370, %c32_371], %236 {strides = array<i32>} : memref<32x512xf32, #tpu.memory_space<vmem>>, vector<4x32xf32>,
    %c39_372 = arith.constant 39 : index
    %c0_373 = arith.constant 0 : index
    %238 = vector.load %arg11[%c39_372, %c0_373] : memref<64x64xf32, #tpu.memory_space<vmem>>, vector<4x32xf32>
    %c4_374 = arith.constant 4 : index
    %c64_375 = arith.constant 64 : index
    %239 = vector.load %arg12[%c4_374, %c64_375] : memref<32x512xf32, #tpu.memory_space<vmem>>, vector<4x32xf32>
    tpu.vector_store %arg12[%c4_374, %c64_375], %238 {strides = array<i32>} : memref<32x512xf32, #tpu.memory_space<vmem>>, vector<4x32xf32>,
    %c40_376 = arith.constant 40 : index
    %c0_377 = arith.constant 0 : index
    %240 = vector.load %arg11[%c40_376, %c0_377] : memref<64x64xf32, #tpu.memory_space<vmem>>, vector<4x32xf32>
    %c4_378 = arith.constant 4 : index
    %c96_379 = arith.constant 96 : index
    %241 = vector.load %arg12[%c4_378, %c96_379] : memref<32x512xf32, #tpu.memory_space<vmem>>, vector<4x32xf32>
    tpu.vector_store %arg12[%c4_378, %c96_379], %240 {strides = array<i32>} : memref<32x512xf32, #tpu.memory_space<vmem>>, vector<4x32xf32>,
    %c41_380 = arith.constant 41 : index
    %c0_381 = arith.constant 0 : index
    %242 = vector.load %arg11[%c41_380, %c0_381] : memref<64x64xf32, #tpu.memory_space<vmem>>, vector<4x32xf32>
    %c4_382 = arith.constant 4 : index
    %c128_383 = arith.constant 128 : index
    %243 = vector.load %arg12[%c4_382, %c128_383] : memref<32x512xf32, #tpu.memory_space<vmem>>, vector<4x32xf32>
    tpu.vector_store %arg12[%c4_382, %c128_383], %242 {strides = array<i32>} : memref<32x512xf32, #tpu.memory_space<vmem>>, vector<4x32xf32>,
    %c42_384 = arith.constant 42 : index
    %c0_385 = arith.constant 0 : index
    %244 = vector.load %arg11[%c42_384, %c0_385] : memref<64x64xf32, #tpu.memory_space<vmem>>, vector<4x32xf32>
    %c4_386 = arith.constant 4 : index
    %c160_387 = arith.constant 160 : index
    %245 = vector.load %arg12[%c4_386, %c160_387] : memref<32x512xf32, #tpu.memory_space<vmem>>, vector<4x32xf32>
    tpu.vector_store %arg12[%c4_386, %c160_387], %244 {strides = array<i32>} : memref<32x512xf32, #tpu.memory_space<vmem>>, vector<4x32xf32>,
    %c43_388 = arith.constant 43 : index
    %c0_389 = arith.constant 0 : index
    %246 = vector.load %arg11[%c43_388, %c0_389] : memref<64x64xf32, #tpu.memory_space<vmem>>, vector<4x32xf32>
    %c4_390 = arith.constant 4 : index
    %c192_391 = arith.constant 192 : index
    %247 = vector.load %arg12[%c4_390, %c192_391] : memref<32x512xf32, #tpu.memory_space<vmem>>, vector<4x32xf32>
    tpu.vector_store %arg12[%c4_390, %c192_391], %246 {strides = array<i32>} : memref<32x512xf32, #tpu.memory_space<vmem>>, vector<4x32xf32>,
    %c44_392 = arith.constant 44 : index
    %c0_393 = arith.constant 0 : index
    %248 = vector.load %arg11[%c44_392, %c0_393] : memref<64x64xf32, #tpu.memory_space<vmem>>, vector<4x32xf32>
    %c4_394 = arith.constant 4 : index
    %c224_395 = arith.constant 224 : index
    %249 = vector.load %arg12[%c4_394, %c224_395] : memref<32x512xf32, #tpu.memory_space<vmem>>, vector<4x32xf32>
    tpu.vector_store %arg12[%c4_394, %c224_395], %248 {strides = array<i32>} : memref<32x512xf32, #tpu.memory_space<vmem>>, vector<4x32xf32>,
    %c0_396 = arith.constant 0 : index
    %c0_397 = arith.constant 0 : index
    %250 = vector.load %arg12[%c0_396, %c0_397] : memref<32x512xf32, #tpu.memory_space<vmem>>, vector<8x256xf32>
    %cst_398 = arith.constant dense<0.000000e+00> : vector<8x32xf32>
    %251 = tpu.matmul %250, %215, %cst_398 {dimension_numbers = #tpu.dot_dimension_numbers<[1], [0], [0], [1], [0, 0, 1, 1], [], []>} : vector<8x256xf32>, vector<256x32xf32>, vector<8x32xf32> -> vector<8x32xf32>
    %252 = vector.broadcast %217 : vector<1x32xf32> to vector<8x32xf32>
    %253 = arith.addf %251, %252 : vector<8x32xf32>
    %cst_399 = arith.constant 0.000000e+00 : f32
    %254 = vector.broadcast %cst_399 : f32 to vector<8x32xf32>
    %255 = arith.maximumf %253, %254 : vector<8x32xf32>
    %256 = vector.extract_strided_slice %255 {offsets = [0, 0], sizes = [4, 32], strides = [1, 1]} : vector<8x32xf32> to vector<4x32xf32>
    %c8_400 = arith.constant 8 : index
    %c0_401 = arith.constant 0 : index
    %257 = vector.load %arg11[%c8_400, %c0_401] : memref<64x64xf32, #tpu.memory_space<vmem>>, vector<4x32xf32>
    tpu.vector_store %arg11[%c8_400, %c0_401], %256 {strides = array<i32>} : memref<64x64xf32, #tpu.memory_space<vmem>>, vector<4x32xf32>,
    %258 = vector.extract_strided_slice %255 {offsets = [4, 0], sizes = [4, 32], strides = [1, 1]} : vector<8x32xf32> to vector<4x32xf32>
    %c40_402 = arith.constant 40 : index
    %c0_403 = arith.constant 0 : index
    %259 = vector.load %arg11[%c40_402, %c0_403] : memref<64x64xf32, #tpu.memory_space<vmem>>, vector<4x32xf32>
    tpu.vector_store %arg11[%c40_402, %c0_403], %258 {strides = array<i32>} : memref<64x64xf32, #tpu.memory_space<vmem>>, vector<4x32xf32>,
    %c4_404 = arith.constant 4 : index
    %c0_405 = arith.constant 0 : index
    %c0_406 = arith.constant 0 : index
    %260 = vector.load %arg4[%c4_404, %c0_405, %c0_406] : memref<5x256x32xf32, #tpu.memory_space<vmem>>, vector<1x256x32xf32>
    %261 = vector.shape_cast %260 : vector<1x256x32xf32> to vector<256x32xf32>
    %c4_407 = arith.constant 4 : index
    %c0_408 = arith.constant 0 : index
    %c0_409 = arith.constant 0 : index
    %262 = vector.load %arg5[%c4_407, %c0_408, %c0_409] : memref<5x1x32xf32, #tpu.memory_space<vmem>>, vector<1x1x32xf32>
    %263 = vector.shape_cast %262 : vector<1x1x32xf32> to vector<1x32xf32>
    %c5_410 = arith.constant 5 : index
    %c0_411 = arith.constant 0 : index
    %264 = vector.load %arg11[%c5_410, %c0_411] : memref<64x64xf32, #tpu.memory_space<vmem>>, vector<4x32xf32>
    %c0_412 = arith.constant 0 : index
    %c0_413 = arith.constant 0 : index
    %265 = vector.load %arg12[%c0_412, %c0_413] : memref<32x512xf32, #tpu.memory_space<vmem>>, vector<4x32xf32>
    tpu.vector_store %arg12[%c0_412, %c0_413], %264 {strides = array<i32>} : memref<32x512xf32, #tpu.memory_space<vmem>>, vector<4x32xf32>,
    %c6_414 = arith.constant 6 : index
    %c0_415 = arith.constant 0 : index
    %266 = vector.load %arg11[%c6_414, %c0_415] : memref<64x64xf32, #tpu.memory_space<vmem>>, vector<4x32xf32>
    %c0_416 = arith.constant 0 : index
    %c32_417 = arith.constant 32 : index
    %267 = vector.load %arg12[%c0_416, %c32_417] : memref<32x512xf32, #tpu.memory_space<vmem>>, vector<4x32xf32>
    tpu.vector_store %arg12[%c0_416, %c32_417], %266 {strides = array<i32>} : memref<32x512xf32, #tpu.memory_space<vmem>>, vector<4x32xf32>,
    %c7_418 = arith.constant 7 : index
    %c0_419 = arith.constant 0 : index
    %268 = vector.load %arg11[%c7_418, %c0_419] : memref<64x64xf32, #tpu.memory_space<vmem>>, vector<4x32xf32>
    %c0_420 = arith.constant 0 : index
    %c64_421 = arith.constant 64 : index
    %269 = vector.load %arg12[%c0_420, %c64_421] : memref<32x512xf32, #tpu.memory_space<vmem>>, vector<4x32xf32>
    tpu.vector_store %arg12[%c0_420, %c64_421], %268 {strides = array<i32>} : memref<32x512xf32, #tpu.memory_space<vmem>>, vector<4x32xf32>,
    %c8_422 = arith.constant 8 : index
    %c0_423 = arith.constant 0 : index
    %270 = vector.load %arg11[%c8_422, %c0_423] : memref<64x64xf32, #tpu.memory_space<vmem>>, vector<4x32xf32>
    %c0_424 = arith.constant 0 : index
    %c96_425 = arith.constant 96 : index
    %271 = vector.load %arg12[%c0_424, %c96_425] : memref<32x512xf32, #tpu.memory_space<vmem>>, vector<4x32xf32>
    tpu.vector_store %arg12[%c0_424, %c96_425], %270 {strides = array<i32>} : memref<32x512xf32, #tpu.memory_space<vmem>>, vector<4x32xf32>,
    %c9_426 = arith.constant 9 : index
    %c0_427 = arith.constant 0 : index
    %272 = vector.load %arg11[%c9_426, %c0_427] : memref<64x64xf32, #tpu.memory_space<vmem>>, vector<4x32xf32>
    %c0_428 = arith.constant 0 : index
    %c128_429 = arith.constant 128 : index
    %273 = vector.load %arg12[%c0_428, %c128_429] : memref<32x512xf32, #tpu.memory_space<vmem>>, vector<4x32xf32>
    tpu.vector_store %arg12[%c0_428, %c128_429], %272 {strides = array<i32>} : memref<32x512xf32, #tpu.memory_space<vmem>>, vector<4x32xf32>,
    %c10_430 = arith.constant 10 : index
    %c0_431 = arith.constant 0 : index
    %274 = vector.load %arg11[%c10_430, %c0_431] : memref<64x64xf32, #tpu.memory_space<vmem>>, vector<4x32xf32>
    %c0_432 = arith.constant 0 : index
    %c160_433 = arith.constant 160 : index
    %275 = vector.load %arg12[%c0_432, %c160_433] : memref<32x512xf32, #tpu.memory_space<vmem>>, vector<4x32xf32>
    tpu.vector_store %arg12[%c0_432, %c160_433], %274 {strides = array<i32>} : memref<32x512xf32, #tpu.memory_space<vmem>>, vector<4x32xf32>,
    %c11_434 = arith.constant 11 : index
    %c0_435 = arith.constant 0 : index
    %276 = vector.load %arg11[%c11_434, %c0_435] : memref<64x64xf32, #tpu.memory_space<vmem>>, vector<4x32xf32>
    %c0_436 = arith.constant 0 : index
    %c192_437 = arith.constant 192 : index
    %277 = vector.load %arg12[%c0_436, %c192_437] : memref<32x512xf32, #tpu.memory_space<vmem>>, vector<4x32xf32>
    tpu.vector_store %arg12[%c0_436, %c192_437], %276 {strides = array<i32>} : memref<32x512xf32, #tpu.memory_space<vmem>>, vector<4x32xf32>,
    %c12_438 = arith.constant 12 : index
    %c0_439 = arith.constant 0 : index
    %278 = vector.load %arg11[%c12_438, %c0_439] : memref<64x64xf32, #tpu.memory_space<vmem>>, vector<4x32xf32>
    %c0_440 = arith.constant 0 : index
    %c224_441 = arith.constant 224 : index
    %279 = vector.load %arg12[%c0_440, %c224_441] : memref<32x512xf32, #tpu.memory_space<vmem>>, vector<4x32xf32>
    tpu.vector_store %arg12[%c0_440, %c224_441], %278 {strides = array<i32>} : memref<32x512xf32, #tpu.memory_space<vmem>>, vector<4x32xf32>,
    %c37_442 = arith.constant 37 : index
    %c0_443 = arith.constant 0 : index
    %280 = vector.load %arg11[%c37_442, %c0_443] : memref<64x64xf32, #tpu.memory_space<vmem>>, vector<4x32xf32>
    %c4_444 = arith.constant 4 : index
    %c0_445 = arith.constant 0 : index
    %281 = vector.load %arg12[%c4_444, %c0_445] : memref<32x512xf32, #tpu.memory_space<vmem>>, vector<4x32xf32>
    tpu.vector_store %arg12[%c4_444, %c0_445], %280 {strides = array<i32>} : memref<32x512xf32, #tpu.memory_space<vmem>>, vector<4x32xf32>,
    %c38_446 = arith.constant 38 : index
    %c0_447 = arith.constant 0 : index
    %282 = vector.load %arg11[%c38_446, %c0_447] : memref<64x64xf32, #tpu.memory_space<vmem>>, vector<4x32xf32>
    %c4_448 = arith.constant 4 : index
    %c32_449 = arith.constant 32 : index
    %283 = vector.load %arg12[%c4_448, %c32_449] : memref<32x512xf32, #tpu.memory_space<vmem>>, vector<4x32xf32>
    tpu.vector_store %arg12[%c4_448, %c32_449], %282 {strides = array<i32>} : memref<32x512xf32, #tpu.memory_space<vmem>>, vector<4x32xf32>,
    %c39_450 = arith.constant 39 : index
    %c0_451 = arith.constant 0 : index
    %284 = vector.load %arg11[%c39_450, %c0_451] : memref<64x64xf32, #tpu.memory_space<vmem>>, vector<4x32xf32>
    %c4_452 = arith.constant 4 : index
    %c64_453 = arith.constant 64 : index
    %285 = vector.load %arg12[%c4_452, %c64_453] : memref<32x512xf32, #tpu.memory_space<vmem>>, vector<4x32xf32>
    tpu.vector_store %arg12[%c4_452, %c64_453], %284 {strides = array<i32>} : memref<32x512xf32, #tpu.memory_space<vmem>>, vector<4x32xf32>,
    %c40_454 = arith.constant 40 : index
    %c0_455 = arith.constant 0 : index
    %286 = vector.load %arg11[%c40_454, %c0_455] : memref<64x64xf32, #tpu.memory_space<vmem>>, vector<4x32xf32>
    %c4_456 = arith.constant 4 : index
    %c96_457 = arith.constant 96 : index
    %287 = vector.load %arg12[%c4_456, %c96_457] : memref<32x512xf32, #tpu.memory_space<vmem>>, vector<4x32xf32>
    tpu.vector_store %arg12[%c4_456, %c96_457], %286 {strides = array<i32>} : memref<32x512xf32, #tpu.memory_space<vmem>>, vector<4x32xf32>,
    %c41_458 = arith.constant 41 : index
    %c0_459 = arith.constant 0 : index
    %288 = vector.load %arg11[%c41_458, %c0_459] : memref<64x64xf32, #tpu.memory_space<vmem>>, vector<4x32xf32>
    %c4_460 = arith.constant 4 : index
    %c128_461 = arith.constant 128 : index
    %289 = vector.load %arg12[%c4_460, %c128_461] : memref<32x512xf32, #tpu.memory_space<vmem>>, vector<4x32xf32>
    tpu.vector_store %arg12[%c4_460, %c128_461], %288 {strides = array<i32>} : memref<32x512xf32, #tpu.memory_space<vmem>>, vector<4x32xf32>,
    %c42_462 = arith.constant 42 : index
    %c0_463 = arith.constant 0 : index
    %290 = vector.load %arg11[%c42_462, %c0_463] : memref<64x64xf32, #tpu.memory_space<vmem>>, vector<4x32xf32>
    %c4_464 = arith.constant 4 : index
    %c160_465 = arith.constant 160 : index
    %291 = vector.load %arg12[%c4_464, %c160_465] : memref<32x512xf32, #tpu.memory_space<vmem>>, vector<4x32xf32>
    tpu.vector_store %arg12[%c4_464, %c160_465], %290 {strides = array<i32>} : memref<32x512xf32, #tpu.memory_space<vmem>>, vector<4x32xf32>,
    %c43_466 = arith.constant 43 : index
    %c0_467 = arith.constant 0 : index
    %292 = vector.load %arg11[%c43_466, %c0_467] : memref<64x64xf32, #tpu.memory_space<vmem>>, vector<4x32xf32>
    %c4_468 = arith.constant 4 : index
    %c192_469 = arith.constant 192 : index
    %293 = vector.load %arg12[%c4_468, %c192_469] : memref<32x512xf32, #tpu.memory_space<vmem>>, vector<4x32xf32>
    tpu.vector_store %arg12[%c4_468, %c192_469], %292 {strides = array<i32>} : memref<32x512xf32, #tpu.memory_space<vmem>>, vector<4x32xf32>,
    %c44_470 = arith.constant 44 : index
    %c0_471 = arith.constant 0 : index
    %294 = vector.load %arg11[%c44_470, %c0_471] : memref<64x64xf32, #tpu.memory_space<vmem>>, vector<4x32xf32>
    %c4_472 = arith.constant 4 : index
    %c224_473 = arith.constant 224 : index
    %295 = vector.load %arg12[%c4_472, %c224_473] : memref<32x512xf32, #tpu.memory_space<vmem>>, vector<4x32xf32>
    tpu.vector_store %arg12[%c4_472, %c224_473], %294 {strides = array<i32>} : memref<32x512xf32, #tpu.memory_space<vmem>>, vector<4x32xf32>,
    %c0_474 = arith.constant 0 : index
    %c0_475 = arith.constant 0 : index
    %296 = vector.load %arg12[%c0_474, %c0_475] : memref<32x512xf32, #tpu.memory_space<vmem>>, vector<8x256xf32>
    %cst_476 = arith.constant dense<0.000000e+00> : vector<8x32xf32>
    %297 = tpu.matmul %296, %261, %cst_476 {dimension_numbers = #tpu.dot_dimension_numbers<[1], [0], [0], [1], [0, 0, 1, 1], [], []>} : vector<8x256xf32>, vector<256x32xf32>, vector<8x32xf32> -> vector<8x32xf32>
    %298 = vector.broadcast %263 : vector<1x32xf32> to vector<8x32xf32>
    %299 = arith.addf %297, %298 : vector<8x32xf32>
    %cst_477 = arith.constant 0.000000e+00 : f32
    %300 = vector.broadcast %cst_477 : f32 to vector<8x32xf32>
    %301 = arith.maximumf %299, %300 : vector<8x32xf32>
    %c0_478 = arith.constant 0 : index
    %c0_479 = arith.constant 0 : index
    %302 = vector.load %arg13[%c0_478, %c0_479] : memref<32x32xf32, #tpu.memory_space<vmem>>, vector<8x32xf32>
    tpu.vector_store %arg13[%c0_478, %c0_479], %301 {strides = array<i32>} : memref<32x32xf32, #tpu.memory_space<vmem>>, vector<8x32xf32>,
    %c0_480 = arith.constant 0 : index
    %c0_481 = arith.constant 0 : index
    %303 = vector.load %arg13[%c0_480, %c0_481] : memref<32x32xf32, #tpu.memory_space<vmem>>, vector<3x32xf32>
    %cst_482 = arith.constant dense<0xFF800000> : vector<32xf32>
    %304 = vector.multi_reduction <maximumf>, %303, %cst_482 [0] : vector<3x32xf32> to vector<32xf32>
    %305 = vector.shape_cast %304 : vector<32xf32> to vector<1x32xf32>
    %c0_483 = arith.constant 0 : index
    %c0_484 = arith.constant 0 : index
    %306 = vector.load %arg14[%c0_483, %c0_484] : memref<2x32xf32, #tpu.memory_space<vmem>>, vector<1x32xf32>
    tpu.vector_store %arg14[%c0_483, %c0_484], %305 {strides = array<i32>} : memref<2x32xf32, #tpu.memory_space<vmem>>, vector<1x32xf32>,
    %c4_485 = arith.constant 4 : index
    %c0_486 = arith.constant 0 : index
    %307 = vector.load %arg13[%c4_485, %c0_486] : memref<32x32xf32, #tpu.memory_space<vmem>>, vector<3x32xf32>
    %cst_487 = arith.constant dense<0xFF800000> : vector<32xf32>
    %308 = vector.multi_reduction <maximumf>, %307, %cst_487 [0] : vector<3x32xf32> to vector<32xf32>
    %309 = vector.shape_cast %308 : vector<32xf32> to vector<1x32xf32>
    %c1_488 = arith.constant 1 : index
    %c0_489 = arith.constant 0 : index
    %310 = vector.load %arg14[%c1_488, %c0_489] : memref<2x32xf32, #tpu.memory_space<vmem>>, vector<1x32xf32>
    tpu.vector_store %arg14[%c1_488, %c0_489], %309 {strides = array<i32>} : memref<2x32xf32, #tpu.memory_space<vmem>>, vector<1x32xf32>,
    %c0_490 = arith.constant 0 : index
    %c0_491 = arith.constant 0 : index
    %311 = vector.load %arg14[%c0_490, %c0_491] : memref<2x32xf32, #tpu.memory_space<vmem>>, vector<2x32xf32>
    %c0_492 = arith.constant 0 : index
    %c0_493 = arith.constant 0 : index
    %312 = vector.load %arg6[%c0_492, %c0_493] : memref<32x128xf32, #tpu.memory_space<vmem>>, vector<32x128xf32>
    %cst_494 = arith.constant dense<0.000000e+00> : vector<2x128xf32>
    %313 = tpu.matmul %311, %312, %cst_494 {dimension_numbers = #tpu.dot_dimension_numbers<[1], [0], [0], [1], [0, 0, 1, 1], [], []>} : vector<2x32xf32>, vector<32x128xf32>, vector<2x128xf32> -> vector<2x128xf32>
    %c0_495 = arith.constant 0 : index
    %c0_496 = arith.constant 0 : index
    %314 = vector.load %arg7[%c0_495, %c0_496] : memref<1x128xf32, #tpu.memory_space<vmem>>, vector<1x128xf32>
    %315 = vector.broadcast %314 : vector<1x128xf32> to vector<2x128xf32>
    %316 = arith.addf %313, %315 : vector<2x128xf32>
    %cst_497 = arith.constant 0.000000e+00 : f32
    %317 = vector.broadcast %cst_497 : f32 to vector<2x128xf32>
    %318 = arith.maximumf %316, %317 : vector<2x128xf32>
    %c0_498 = arith.constant 0 : index
    %c0_499 = arith.constant 0 : index
    %319 = vector.load %arg8[%c0_498, %c0_499] : memref<128x128xf32, #tpu.memory_space<vmem>>, vector<128x128xf32>
    %cst_500 = arith.constant dense<0.000000e+00> : vector<2x128xf32>
    %320 = tpu.matmul %318, %319, %cst_500 {dimension_numbers = #tpu.dot_dimension_numbers<[1], [0], [0], [1], [0, 0, 1, 1], [], []>} : vector<2x128xf32>, vector<128x128xf32>, vector<2x128xf32> -> vector<2x128xf32>
    %c0_501 = arith.constant 0 : index
    %c0_502 = arith.constant 0 : index
    %321 = vector.load %arg9[%c0_501, %c0_502] : memref<1x128xf32, #tpu.memory_space<vmem>>, vector<1x128xf32>
    %322 = vector.broadcast %321 : vector<1x128xf32> to vector<2x128xf32>
    %323 = arith.addf %320, %322 : vector<2x128xf32>
    %c0_503 = arith.constant 0 : index
    %c0_504 = arith.constant 0 : index
    %c0_505 = arith.constant 0 : index
    %324 = vector.load %arg10[%c0_503, %c0_504, %c0_505] : memref<1x2x128xf32, #tpu.memory_space<vmem>>, vector<1x2x128xf32>
    %325 = vector.shape_cast %324 : vector<1x2x128xf32> to vector<2x128xf32>
    %326 = vector.shape_cast %323 : vector<2x128xf32> to vector<1x2x128xf32>
    tpu.vector_store %arg10[%c0_503, %c0_504, %c0_505], %326 {strides = array<i32>} : memref<1x2x128xf32, #tpu.memory_space<vmem>>, vector<1x2x128xf32>,
    return
  }
  func.func @transform_0(%arg0: i32) -> (i32, i32, i32) {
    %c0_i32 = arith.constant 0 : i32
    %c0_i32_0 = arith.constant 0 : i32
    %c0_i32_1 = arith.constant 0 : i32
    return %arg0, %c0_i32, %c0_i32_0 : i32, i32, i32
  }
  func.func @transform_1(%arg0: i32) -> (i32, i32) {
    %c0_i32 = arith.constant 0 : i32
    %c0_i32_0 = arith.constant 0 : i32
    %c0_i32_1 = arith.constant 0 : i32
    return %c0_i32, %c0_i32_0 : i32, i32
  }
  func.func @transform_2(%arg0: i32) -> (i32, i32) {
    %c0_i32 = arith.constant 0 : i32
    %c0_i32_0 = arith.constant 0 : i32
    %c0_i32_1 = arith.constant 0 : i32
    return %c0_i32, %c0_i32_0 : i32, i32
  }
  func.func @transform_3(%arg0: i32) -> (i32, i32, i32) {
    %c0_i32 = arith.constant 0 : i32
    %c0_i32_0 = arith.constant 0 : i32
    %c0_i32_1 = arith.constant 0 : i32
    %c0_i32_2 = arith.constant 0 : i32
    return %c0_i32, %c0_i32_0, %c0_i32_1 : i32, i32, i32
  }
  func.func @transform_4(%arg0: i32) -> (i32, i32, i32) {
    %c0_i32 = arith.constant 0 : i32
    %c0_i32_0 = arith.constant 0 : i32
    %c0_i32_1 = arith.constant 0 : i32
    %c0_i32_2 = arith.constant 0 : i32
    return %c0_i32, %c0_i32_0, %c0_i32_1 : i32, i32, i32
  }
  func.func @transform_5(%arg0: i32) -> (i32, i32) {
    %c0_i32 = arith.constant 0 : i32
    %c0_i32_0 = arith.constant 0 : i32
    %c0_i32_1 = arith.constant 0 : i32
    return %c0_i32, %c0_i32_0 : i32, i32
  }
  func.func @transform_6(%arg0: i32) -> (i32, i32) {
    %c0_i32 = arith.constant 0 : i32
    %c0_i32_0 = arith.constant 0 : i32
    %c0_i32_1 = arith.constant 0 : i32
    return %c0_i32, %c0_i32_0 : i32, i32
  }
  func.func @transform_7(%arg0: i32) -> (i32, i32) {
    %c0_i32 = arith.constant 0 : i32
    %c0_i32_0 = arith.constant 0 : i32
    %c0_i32_1 = arith.constant 0 : i32
    return %c0_i32, %c0_i32_0 : i32, i32
  }
  func.func @transform_8(%arg0: i32) -> (i32, i32) {
    %c0_i32 = arith.constant 0 : i32
    %c0_i32_0 = arith.constant 0 : i32
    %c0_i32_1 = arith.constant 0 : i32
    return %c0_i32, %c0_i32_0 : i32, i32
  }
  func.func @transform_9(%arg0: i32) -> (i32, i32, i32) {
    %c0_i32 = arith.constant 0 : i32
    %c0_i32_0 = arith.constant 0 : i32
    %c0_i32_1 = arith.constant 0 : i32
    return %arg0, %c0_i32, %c0_i32_0 : i32, i32, i32
  }
}

</mosaic_0001>

<bundles_post_ra>
// kernel: cnn_forward.1
= control target key start
LH: loop header
LB: loop body
LE: loop exit
PB: predicated region body
PF: predicated region fallthrough
CT: control target
= control target key end

     0   :  { %s2065_s30 = smov 0   ;;  %s3095_s0 = inlined_call_operand.vmem [shape: f32[4,16,64], index: 0, kind: input, shape index: {}]   ;;  %s3096_s1 = inlined_call_operand.vmem [shape: f32[512,32], index: 1, kind: input, shape index: {}]   ;;  %s3097_s2 = inlined_call_operand.vmem [shape: f32[1,32], index: 2, kind: input, shape index: {}]   ;;  %s3098_s3 = inlined_call_operand.vmem [shape: f32[5,256,32], index: 3, kind: input, shape index: {}]   ;;  %s3099_s4 = inlined_call_operand.vmem [shape: f32[5,1,32], index: 4, kind: input, shape index: {}]   ;;  %s3100_s5 = inlined_call_operand.vmem [shape: f32[32,128], index: 5, kind: input, shape index: {}]   ;;  %s3101_s6 = inlined_call_operand.vmem [shape: f32[1,128], index: 6, kind: input, shape index: {}]   ;;  %s3102_s7 = inlined_call_operand.vmem [shape: f32[128,128], index: 7, kind: input, shape index: {}]   ;;  %s3103_s8 = inlined_call_operand.vmem [shape: f32[1,128], index: 8, kind: input, shape index: {}]   ;;  %s3104_s9 = inlined_call_operand.vmem [shape: f32[2,2,128], index: 9, kind: output, shape index: {}]  }
   0x1 LB: > { %s2071_s10 = sadd.s32 4294967295, %s2009_s30   ;;  %p1840_p0 = scmp.ge.s32.totalorder %s2009_s30, 1  ;;  %s2009_s30 = sphi %s2065_s30, %s19_s30  }
   0x2   : > { %p289_p1 = scmp.lt.s32.totalorder %s2009_s30, 3 }
   0x4   : > { %p290_p2 = pnand %p1840_p0, %p289_p1 }
   0x5   : > { %s1841_s11 = sshll.u32 (!%p290_p2), %s2071_s10, 1  ;;  %s2012_s16 = smov (!%p290_p2), 64  }
   0x6   : > { %293 = sbr.rel (%p290_p2) target bundleno = 2061 (0x80d), region = 56  ;;  %p326_p3 = scmp.lt.s32.totalorder (!%p290_p2), %s1841_s11, 3 }
   0x7   : > { %s2013_s21 = smov (!%p290_p2), 96   ;;  %s2014_s22 = smov (!%p290_p2), 32  }
   0x8   : > { %p332_p4 = scmp.lt.s32.totalorder (!%p290_p2), %s2071_s10, 1 }
   0xb   : > { %vm336_vm0 = vcmask 518144   ;;  %vm338_vm1 = vcmask 519168   ;;  %v2011_v0 = vmov 0.0   ;;  %s3106_s11 = smov (!%p326_p3, %s1841_s11), 3  ;;  %vm342_vm2 = vcmask 523264   ;;  %v399_v11 = vld [vmem:[%s3096_s1 + $0x178] sm:$0xff] }
   0xc   : > { %337 = vst.msk [vmem:[#allocation2 + $0x5] sm:$0x7] %vm336_vm0, %v2011_v0  ;;  %s1982_s12 = sshll.u32 %s3106_s11, 4  ;;  %v398_v12 = vld [vmem:[%s3096_s1 + $0x170] sm:$0xff]  ;;  %v415_v13 = vld [vmem:[%s3096_s1 + $0x1f8] sm:$0xff]  ;;  %623 = vmatpush.msra.mxu2 %v399_v11  ;;  %v397_v15 = vld [vmem:[%s3096_s1 + $0x168] sm:$0xff] }
   0xd   : > { %345 = vst.msk [vmem:[#allocation2 + $0x25] sm:$0x7] %vm336_vm0, %v2011_v0  ;;  %s330_s15 = scalar_lea.vmem %s3095_s0, %s1982_s12  ;;  %652 = vmatpush.msra.mxu3 %v415_v13  ;;  %v414_v14 = vld [vmem:[%s3096_s1 + $0x1f0] sm:$0xff]  ;;  %v413_v16 = vld [vmem:[%s3096_s1 + $0x1e8] sm:$0xff]  ;;  %v367_v17 = vld [vmem:[%s3096_s1 + $0x78] sm:$0xff]  ;;  %vm431_vm3 = vcmask 1048064  }
   0xe   : > { %339 = vst.msk [vmem:[#allocation2 + $0x18] sm:$0xf] %vm338_vm1, %v2011_v0  ;;  %v340_v1 = vld [vmem:[%s330_s15] sm:$0xff]  ;;  %v341_v2 = vld [vmem:[%s330_s15 + $0x8] sm:$0xff]  ;;  %v1845_v3 = vld [vmem:[%s330_s15 + $0x10] sm:$0xff]  ;;  %624 = vmatpush.msra.mxu2 %v398_v12  ;;  %565 = vmatpush.msra.mxu0 %v367_v17  ;;  %vm685_vm4 = vcmask 261120  }
   0xf   : > { %346 = vst.msk [vmem:[#allocation2 + $0x38] sm:$0xf] %vm338_vm1, %v2011_v0  ;;  %v1846_v4 = vld [vmem:[%s330_s15 + $0x18] sm:$0xff]  ;;  %653 = vmatpush.msra.mxu3 %v414_v14  ;;  %v366_v18 = vld [vmem:[%s3096_s1 + $0x70] sm:$0xff]  ;;  %v396_v23 = vld [vmem:[%s3096_s1 + $0x160] sm:$0xff]  ;;  %vm737_vm5 = vcmask 523520  }
  0x10   : > { %343 = vst.msk [vmem:[#allocation2 + $0x8] sm:$0xff] %vm342_vm2, %v340_v1  ;;  %v383_v19 = vld [vmem:[%s3096_s1 + $0xf8] sm:$0xff]  ;;  %625 = vmatpush.msra.mxu2 %v397_v15  ;;  %v382_v24 = vld [vmem:[%s3096_s1 + $0xf0] sm:$0xff]  ;;  %v412_v25 = vld [vmem:[%s3096_s1 + $0x1e0] sm:$0xff]  ;;  %566 = vmatpush.msra.mxu0 %v366_v18  ;;  %vm750_vm6 = vcmask 785920   ;;  %vm763_vm7 = vcmask 1048320  }
  0x11   : > { %344 = vst.msk [vmem:[#allocation2 + $0x10] sm:$0xff] %vm342_vm2, %v341_v2  ;;  %594 = vmatpush.msra.mxu1 %v383_v19  ;;  %654 = vmatpush.msra.mxu3 %v413_v16  ;;  %v365_v26 = vld [vmem:[%s3096_s1 + $0x68] sm:$0xff]  ;;  %v395_v27 = vld [vmem:[%s3096_s1 + $0x158] sm:$0xff]  ;;  %v364_v30 = vld [vmem:[%s3096_s1 + $0x60] sm:$0xff]  ;;  %vm968_vm8 = vcmask 257024   ;;  %vm1415_vm9 = vcmask 261124  }
  0x12   : > { %350 = vst.msk [vmem:[#allocation2 + $0x28] sm:$0xff] %vm342_vm2, %v1845_v3  ;;  %v381_v28 = vld [vmem:[%s3096_s1 + $0xe8] sm:$0xff]  ;;  %626 = vmatpush.msra.mxu2 %v396_v23  ;;  %v411_v29 = vld [vmem:[%s3096_s1 + $0x1d8] sm:$0xff]  ;;  %v394_v31 = vld [vmem:[%s3096_s1 + $0x150] sm:$0xff]  ;;  %567 = vmatpush.msra.mxu0 %v365_v26  ;;  %vm1375_vm10 = vcmask 519424   ;;  %vm1382_vm11 = vcmask 781824  }
  0x13   : > { %351 = vst.msk [vmem:[#allocation2 + $0x30] sm:$0xff] %vm342_vm2, %v1846_v4  ;;  %595 = vmatpush.msra.mxu1 %v382_v24  ;;  %655 = vmatpush.msra.mxu3 %v412_v25  ;;  %v380_v32 = vld [vmem:[%s3096_s1 + $0xe0] sm:$0xff]  ;;  %v410_v33 = vld [vmem:[%s3096_s1 + $0x1d0] sm:$0xff]  ;;  %v363_v34 = vld [vmem:[%s3096_s1 + $0x58] sm:$0xff]  ;;  %vm1389_vm12 = vcmask 1044224   ;;  %vm1423_vm13 = vcmask 523524  }
  0x14   : > { %627 = vmatpush.msra.mxu2 %v395_v27  ;;  %v393_v35 = vld [vmem:[%s3096_s1 + $0x148] sm:$0xff]  ;;  %568 = vmatpush.msra.mxu0 %v364_v30  ;;  %v379_v36 = vld [vmem:[%s3096_s1 + $0xd8] sm:$0xff]  ;;  %v392_v40 = vld [vmem:[%s3096_s1 + $0x140] sm:$0xff]  ;;  %vm1431_vm14 = vcmask 785924   ;;  %vm1439_vm15 = vcmask 1048324   ;;  %vm1690_vm0 = vcmask 256000  }
  0x15   : > { %596 = vmatpush.msra.mxu1 %v381_v28  ;;  %656 = vmatpush.msra.mxu3 %v411_v29  ;;  %v409_v41 = vld [vmem:[%s3096_s1 + $0x1c8] sm:$0xff]  ;;  %v362_v42 = vld [vmem:[%s3096_s1 + $0x50] sm:$0xff]  ;;  %v391_v43 = vld [vmem:[%s3096_s1 + $0x138] sm:$0xff]  ;;  %vm1698_vm1 = vcmask 253952   ;;  %s3108_s10 = smov (!%p332_p4, %s2071_s10), 1 }
  0x16   : > { %628 = vmatpush.msra.mxu2 %v394_v31  ;;  %569 = vmatpush.msra.mxu0 %v363_v34  ;;  %v378_v44 = vld [vmem:[%s3096_s1 + $0xd0] sm:$0xff]  ;;  %v408_v45 = vld [vmem:[%s3096_s1 + $0x1c0] sm:$0xff]  ;;  %v361_v46 = vld [vmem:[%s3096_s1 + $0x48] sm:$0xff]  ;;  %s1844_s25 = sshll.u32 %s3108_s10, 1 }
  0x17   : > { %v421_v8 = vld [vmem:[#allocation2 + $0x6] sm:$0xff]  ;;  %597 = vmatpush.msra.mxu1 %v380_v32  ;;  %657 = vmatpush.msra.mxu3 %v410_v33  ;;  %v390_v47 = vld [vmem:[%s3096_s1 + $0x130] sm:$0xff]  ;;  %v407_v49 = vld [vmem:[%s3096_s1 + $0x1b8] sm:$0xff]  ;;  %s335_s11 = scalar_lea.vmem %s3104_s9, %s1844_s25 }
  0x18   : > { %v454_v5 = vld [vmem:[#allocation2 + $0xa] sm:$0xff]  ;;  %v455_v7 = vld [vmem:[#allocation2 + $0x12] sm:$0xff]  ;;  %629 = vmatpush.msra.mxu2 %v393_v35  ;;  %570 = vmatpush.msra.mxu0 %v362_v42  ;;  %v360_v50 = vld [vmem:[%s3096_s1 + $0x40] sm:$0xff] }
  0x19   : > { %v470_v6 = vld [vmem:[#allocation2 + $0xc] sm:$0xff]  ;;  %458 = vrot.lane.b32.xlu0 %v454_v5, %s2012_s16  ;;  %460 = vrot.lane.b32.xlu2 %v455_v7, %s2012_s16  ;;  %v471_v20 = vld [vmem:[#allocation2 + $0x14] sm:$0xff]  ;;  %v388_v56 = vld [vmem:[%s3096_s1 + $0x120] sm:$0xff] }
  0x1a   : > { %474 = vrot.lane.b32.xlu1 %v470_v6, %s2012_s16  ;;  %v438_v9 = vld [vmem:[#allocation2 + $0x8] sm:$0xff]  ;;  %v439_v21 = vld [vmem:[#allocation2 + $0x10] sm:$0xff]  ;;  %598 = vmatpush.msra.mxu1 %v379_v36  ;;  %v359_v60 = vld [vmem:[%s3096_s1 + $0x38] sm:$0xff] }
  0x1b   : > { %v422_v10 = vld [vmem:[#allocation2 + $0xe] sm:$0xff]  ;;  %v486_v37 = vld [vmem:[#allocation2 + $0x26] sm:$0xff]  ;;  %630 = vmatpush.msra.mxu2 %v392_v40  ;;  %658 = vmatpush.msra.mxu3 %v409_v41  ;;  %v387_v62 = vld [vmem:[%s3096_s1 + $0x118] sm:$0xff] }
  0x1c   : > { %v518_v22 = vld [vmem:[#allocation2 + $0x2a] sm:$0xff]  ;;  %599 = vmatpush.msra.mxu1 %v378_v44  ;;  %571 = vmatpush.msra.mxu0 %v361_v46  ;;  %v519_v52 = vld [vmem:[#allocation2 + $0x32] sm:$0xff]  ;;  %v376_v61 = vld [vmem:[%s3096_s1 + $0xc0] sm:$0xff] }
  0x1d   : > { %v534_v38 = vld [vmem:[#allocation2 + $0x2c] sm:$0xff]  ;;  %631 = vmatpush.msra.mxu2 %v391_v43  ;;  %659 = vmatpush.msra.mxu3 %v408_v45  ;;  %v535_v54 = vld [vmem:[#allocation2 + $0x34] sm:$0xff]  ;;  %v404_v63 = vld [vmem:[%s3096_s1 + $0x1a0] sm:$0xff] }
  0x1e   : > { %v502_v39 = vld [vmem:[#allocation2 + $0x28] sm:$0xff]  ;;  %v406_v55 = vld [vmem:[%s3096_s1 + $0x1b0] sm:$0xff]  ;;  %572 = vmatpush.msra.mxu0 %v360_v50  ;;  %v375_v3 = vld [vmem:[%s3096_s1 + $0xb8] sm:$0xff] }
  0x1f   : > { %v377_v48 = vld [vmem:[%s3096_s1 + $0xc8] sm:$0xff]  ;;  %632 = vmatpush.msra.mxu2 %v390_v47  ;;  %660 = vmatpush.msra.mxu3 %v407_v49  ;;  %v503_v58 = vld [vmem:[#allocation2 + $0x30] sm:$0xff]  ;;  %v403_v5 = vld [vmem:[%s3096_s1 + $0x198] sm:$0xff] }
  0x20   : > { %v389_v51 = vld [vmem:[%s3096_s1 + $0x128] sm:$0xff]  ;;  %600 = vmatpush.msra.mxu1 %v377_v48  ;;  %573 = vmatpush.msra.mxu0 %v359_v60  ;;  %v358_v2 = vld [vmem:[%s3096_s1 + $0x30] sm:$0xff]  ;;  %v356_v11 = vld [vmem:[%s3096_s1 + $0x20] sm:$0xff] }
  0x21   : > { %425 = vrot.lane.b32.xlu0 %v421_v8, %s2012_s16  ;;  %427 = vrot.lane.b32.xlu2 %v422_v10, %s2012_s16  ;;  %v487_v53 = vld [vmem:[#allocation2 + $0x2e] sm:$0xff]  ;;  %v384_v13 = vld [vmem:[%s3096_s1 + $0x100] sm:$0xff]  ;;  %v355_v17 = vld [vmem:[%s3096_s1 + $0x18] sm:$0xff] }
  0x22   : > { %442 = vrot.lane.b32.xlu1 %v438_v9, %s2012_s16  ;;  %633 = vmatpush.msra.mxu2 %v389_v51  ;;  %v405_v57 = vld [vmem:[%s3096_s1 + $0x1a8] sm:$0xff]  ;;  %v386_v4 = vld [vmem:[%s3096_s1 + $0x110] sm:$0xff]  ;;  %v372_v18 = vld [vmem:[%s3096_s1 + $0xa0] sm:$0xff] }
  0x23   : > { %661 = vmatpush.msra.mxu3 %v406_v55  ;;  %v450_v59 = vld [vmem:[#allocation2 + $0x9] sm:$0xff]  ;;  %601 = vmatpush.msra.mxu1 %v376_v61  ;;  %v451_v10 = vld [vmem:[#allocation2 + $0x11] sm:$0xff]  ;;  %v400_v19 = vld [vmem:[%s3096_s1 + $0x180] sm:$0xff] }
  0x24   : > { %634 = vmatpush.msra.mxu2 %v388_v56  ;;  %452 = vst.msk [vmem:[#allocation3 + $0x10] sm:$0xff] %vm342_vm2, %v450_v59  ;;  %v466_v1 = vld [vmem:[#allocation2 + $0xb] sm:$0xff]  ;;  %574 = vmatpush.msra.mxu0 %v358_v2  ;;  %v467_v26 = vld [vmem:[#allocation2 + $0x13] sm:$0xff]  ;;  %v352_v27 = vld [vmem:[%s3096_s1] sm:$0xff] }
  0x25   : > { %662 = vmatpush.msra.mxu3 %v405_v57  ;;  %468 = vst.msk [vmem:[#allocation3 + $0x18] sm:$0xff] %vm342_vm2, %v466_v1  ;;  %602 = vmatpush.msra.mxu1 %v375_v3  ;;  %v357_v6 = vld [vmem:[%s3096_s1 + $0x28] sm:$0xff]  ;;  %v374_v7 = vld [vmem:[%s3096_s1 + $0xb0] sm:$0xff]  ;;  %v368_v30 = vld [vmem:[%s3096_s1 + $0x80] sm:$0xff] }
  0x26   : > { %635 = vmatpush.msra.mxu2 %v387_v62  ;;  %v385_v8 = vld [vmem:[%s3096_s1 + $0x108] sm:$0xff]  ;;  %v402_v9 = vld [vmem:[%s3096_s1 + $0x190] sm:$0xff]  ;;  %575 = vmatpush.msra.mxu0 %v357_v6  ;;  %453 = vst.msk [vmem:[#allocation3 + $0x30] sm:$0xff] %vm342_vm2, %v451_v10 }
  0x27   : > { %663 = vmatpush.msra.mxu3 %v404_v63  ;;  %603 = vmatpush.msra.mxu1 %v374_v7  ;;  %v373_v12 = vld [vmem:[%s3096_s1 + $0xa8] sm:$0xff]  ;;  %v370_v24 = vld [vmem:[%s3096_s1 + $0x90] sm:$0xff]  ;;  %469 = vst.msk [vmem:[#allocation3 + $0x38] sm:$0xff] %vm342_vm2, %v467_v26  ;;  %v1995_v7 = vld [vmem:[%s3097_s2] ss:$0 sm:$0xff] }
  0x28   : > { %636 = vmatpush.msra.mxu2 %v386_v4  ;;  %v401_v14 = vld [vmem:[%s3096_s1 + $0x188] sm:$0xff]  ;;  %576 = vmatpush.msra.mxu0 %v356_v11  ;;  %v531_v42 = vld [vmem:[#allocation2 + $0x33] sm:$0xff] }
  0x29   : > { %476 = vrot.lane.b32.xlu0 %v471_v20, %s2012_s16  ;;  %522 = vrot.lane.b32.xlu2 %v518_v22, %s2012_s16  ;;  %v417_v15 = vld [vmem:[#allocation2 + $0x5] sm:$0xff]  ;;  %v371_v22 = vld [vmem:[%s3096_s1 + $0x98] sm:$0xff]  ;;  %v418_v25 = vld [vmem:[#allocation2 + $0xd] sm:$0xff]  ;;  %533 = vst.msk [vmem:[#allocation3 + $0x78] sm:$0xff] %vm342_vm2, %v531_v42 }
  0x2a   : > { %444 = vrot.lane.b32.xlu1 %v439_v21, %s2012_s16  ;;  %664 = vmatpush.msra.mxu3 %v403_v5  ;;  %419 = vst.msk [vmem:[#allocation3] sm:$0xff] %vm342_vm2, %v417_v15  ;;  %v434_v20 = vld [vmem:[#allocation2 + $0x7] sm:$0xff]  ;;  %v354_v21 = vld [vmem:[%s3096_s1 + $0x10] sm:$0xff] }
  0x2b   : > { %637 = vmatpush.msra.mxu2 %v385_v8  ;;  %604 = vmatpush.msra.mxu1 %v373_v12  ;;  %436 = vst.msk [vmem:[#allocation3 + $0x8] sm:$0xff] %vm342_vm2, %v434_v20  ;;  %v353_v23 = vld [vmem:[%s3096_s1 + $0x8] sm:$0xff] }
  0x2c   : > { %665 = vmatpush.msra.mxu3 %v402_v9  ;;  %577 = vmatpush.msra.mxu0 %v355_v17  ;;  %420 = vst.msk [vmem:[#allocation3 + $0x20] sm:$0xff] %vm342_vm2, %v418_v25  ;;  %v369_v28 = vld [vmem:[%s3096_s1 + $0x88] sm:$0xff] }
  0x2d   : > { %638 = vmatpush.msra.mxu2 %v384_v13  ;;  %605 = vmatpush.msra.mxu1 %v372_v18  ;;  %v435_v31 = vld [vmem:[#allocation2 + $0xf] sm:$0xff]  ;;  %v482_v33 = vld [vmem:[#allocation2 + $0x25] sm:$0xff] }
  0x2e   : > { %666 = vmatpush.msra.mxu3 %v401_v14  ;;  %578 = vmatpush.msra.mxu0 %v354_v21  ;;  %v514_v32 = vld [vmem:[#allocation2 + $0x29] sm:$0xff]  ;;  %437 = vst.msk [vmem:[#allocation3 + $0x28] sm:$0xff] %vm342_vm2, %v435_v31 }
  0x2f   : > { %606 = vmatpush.msra.mxu1 %v371_v22  ;;  %516 = vst.msk [vmem:[#allocation3 + $0x50] sm:$0xff] %vm342_vm2, %v514_v32  ;;  %v530_v35 = vld [vmem:[#allocation2 + $0x2b] sm:$0xff] }
  0x30   : > { %667 = vmatpush.msra.mxu3 %v400_v19  ;;  %579 = vmatpush.msra.mxu0 %v353_v23  ;;  %484 = vst.msk [vmem:[#allocation3 + $0x40] sm:$0xff] %vm342_vm2, %v482_v33  ;;  %v498_v36 = vld [vmem:[#allocation2 + $0x27] sm:$0xff]  ;;  %v499_v43 = vld [vmem:[#allocation2 + $0x2f] sm:$0xff] }
  0x31   : > { %490 = vrot.lane.b32.xlu0 %v486_v37, %s2012_s16  ;;  %506 = vrot.lane.b32.xlu2 %v502_v39, %s2012_s16  ;;  %v515_v37 = vld [vmem:[#allocation2 + $0x31] sm:$0xff]  ;;  %532 = vst.msk [vmem:[#allocation3 + $0x58] sm:$0xff] %vm342_vm2, %v530_v35 }
  0x32   : > { %538 = vrot.lane.b32.xlu1 %v534_v38, %s2012_s16  ;;  %607 = vmatpush.msra.mxu1 %v370_v24  ;;  %500 = vst.msk [vmem:[#allocation3 + $0x48] sm:$0xff] %vm342_vm2, %v498_v36  ;;  %v483_v41 = vld [vmem:[#allocation2 + $0x2d] sm:$0xff] }
  0x33   : > { %580 = vmatpush.msra.mxu0 %v352_v27  ;;  %517 = vst.msk [vmem:[#allocation3 + $0x70] sm:$0xff] %vm342_vm2, %v515_v37 }
  0x34   : > { %608 = vmatpush.msra.mxu1 %v369_v28  ;;  %485 = vst.msk [vmem:[#allocation3 + $0x60] sm:$0xff] %vm342_vm2, %v483_v41 }
  0x35   : > { %501 = vst.msk [vmem:[#allocation3 + $0x68] sm:$0xff] %vm342_vm2, %v499_v43 }
  0x36   : > { %609 = vmatpush.msra.mxu1 %v368_v30 }
  0x39   : > { %524 = vrot.lane.b32.xlu0 %v519_v52, %s2012_s16  ;;  %540 = vrot.lane.b32.xlu2 %v535_v54, %s2012_s16 }
  0x3a   : > { %492 = vrot.lane.b32.xlu1 %v487_v53, %s2012_s16 }
  0x41   : > { %508 = vrot.lane.b32.xlu0 %v503_v58, %s2012_s16 }
  0x73   : > { %v461_v16 = vpop.permute.xlu2 %460 }
  0x74   : > { %465 = vst.msk [vmem:[#allocation3 + $0x30] sm:$0xff] %vm431_vm3, %v461_v16 }
  0x7b   : > { %v428_v29 = vpop.permute.xlu2 %427  ;;  %v552_v49 = vld [vmem:[#allocation3 + $0x30] sm:$0xff] }
  0x7c   : > { %433 = vst.msk [vmem:[#allocation3 + $0x20] sm:$0xff] %vm431_vm3, %v428_v29 }
  0x83   : > { %v523_v34 = vpop.permute.xlu2 %522  ;;  %v550_v54 = vld [vmem:[#allocation3 + $0x20] sm:$0xff] }
  0x84   : > { %528 = vst.msk [vmem:[#allocation3 + $0x50] sm:$0xff] %vm431_vm3, %v523_v34 }
  0x8b   : > { %v459_v38 = vpop.permute.xlu0 %458  ;;  %v507_v40 = vpop.permute.xlu2 %506  ;;  %v556_v55 = vld [vmem:[#allocation3 + $0x50] sm:$0xff] }
  0x8c   : > { %v475_v39 = vpop.permute.xlu1 %474  ;;  %464 = vst.msk [vmem:[#allocation3 + $0x10] sm:$0xff] %vm431_vm3, %v459_v38 }
  0x8d   : > { %480 = vst.msk [vmem:[#allocation3 + $0x18] sm:$0xff] %vm431_vm3, %v475_v39 }
  0x8e   : > { %512 = vst.msk [vmem:[#allocation3 + $0x48] sm:$0xff] %vm431_vm3, %v507_v40 }
  0x93   : > { %v426_v44 = vpop.permute.xlu0 %425  ;;  %v548_v45 = vld [vmem:[#allocation3 + $0x10] sm:$0xff]  ;;  %v541_v48 = vpop.permute.xlu2 %540 }
  0x94   : > { %v443_v46 = vpop.permute.xlu1 %442  ;;  %432 = vst.msk [vmem:[#allocation3] sm:$0xff] %vm431_vm3, %v426_v44  ;;  %639 = vmatmul.f32.vlgmr.msra.gmra.mxu2 %v548_v45  ;;  %v549_v47 = vld [vmem:[#allocation3 + $0x18] sm:$0xff] }
  0x95   : > { %448 = vst.msk [vmem:[#allocation3 + $0x8] sm:$0xff] %vm431_vm3, %v443_v46  ;;  %668 = vmatmul.f32.vlgmr.msra.gmra.mxu3 %v549_v47  ;;  %v555_v60 = vld [vmem:[#allocation3 + $0x48] sm:$0xff] }
  0x96   : > { %545 = vst.msk [vmem:[#allocation3 + $0x78] sm:$0xff] %vm431_vm3, %v541_v48 }
  0x9b   : > { %v477_v50 = vpop.permute.xlu0 %476  ;;  %v546_v51 = vld [vmem:[#allocation3] sm:$0xff] }
  0x9c   : > { %v445_v52 = vpop.permute.xlu1 %444  ;;  %481 = vst.msk [vmem:[#allocation3 + $0x38] sm:$0xff] %vm431_vm3, %v477_v50  ;;  %581 = vmatmul.f32.vlgmr.msra.gmra.mxu0 %v546_v51  ;;  %642 = vmatmul.f32.gmra.mxu2 %v552_v49  ;;  %v547_v53 = vld [vmem:[#allocation3 + $0x8] sm:$0xff] }
  0x9d   : > { %449 = vst.msk [vmem:[#allocation3 + $0x28] sm:$0xff] %vm431_vm3, %v445_v52  ;;  %610 = vmatmul.f32.vlgmr.msra.gmra.mxu1 %v547_v53  ;;  %v561_v2 = vld [vmem:[#allocation3 + $0x78] sm:$0xff] }
  0xa3   : > { %v491_v56 = vpop.permute.xlu0 %490  ;;  %v553_v57 = vld [vmem:[#allocation3 + $0x38] sm:$0xff] }
  0xa4   : > { %v539_v58 = vpop.permute.xlu1 %538  ;;  %496 = vst.msk [vmem:[#allocation3 + $0x40] sm:$0xff] %vm431_vm3, %v491_v56  ;;  %584 = vmatmul.f32.gmra.mxu0 %v550_v54  ;;  %671 = vmatmul.f32.gmra.mxu3 %v553_v57  ;;  %v551_v59 = vld [vmem:[#allocation3 + $0x28] sm:$0xff] }
  0xa5   : > { %613 = vmatmul.f32.gmra.mxu1 %v551_v59  ;;  %544 = vst.msk [vmem:[#allocation3 + $0x58] sm:$0xff] %vm431_vm3, %v539_v58  ;;  %645 = vmatmul.f32.gmra.mxu2 %v556_v55 }
  0xab   : > { %v525_v61 = vpop.permute.xlu0 %524  ;;  %v554_v63 = vld [vmem:[#allocation3 + $0x40] sm:$0xff] }
  0xac   : > { %v493_v62 = vpop.permute.xlu1 %492  ;;  %529 = vst.msk [vmem:[#allocation3 + $0x70] sm:$0xff] %vm431_vm3, %v525_v61  ;;  %587 = vmatmul.f32.gmra.mxu0 %v554_v63  ;;  %v557_v1 = vld [vmem:[#allocation3 + $0x58] sm:$0xff] }
  0xad   : > { %497 = vst.msk [vmem:[#allocation3 + $0x60] sm:$0xff] %vm431_vm3, %v493_v62  ;;  %674 = vmatmul.f32.gmra.mxu3 %v557_v1  ;;  %616 = vmatmul.f32.gmra.mxu1 %v555_v60 }
  0xb3   : > { %v509_v3 = vpop.permute.xlu0 %508  ;;  %v560_v4 = vld [vmem:[#allocation3 + $0x70] sm:$0xff] }
  0xb4   : > { %513 = vst.msk [vmem:[#allocation3 + $0x68] sm:$0xff] %vm431_vm3, %v509_v3  ;;  %648 = vmatmul.f32.gmra.mxu2 %v560_v4  ;;  %v558_v5 = vld [vmem:[#allocation3 + $0x60] sm:$0xff] }
  0xb5   : > { %590 = vmatmul.f32.gmra.mxu0 %v558_v5  ;;  %677 = vmatmul.f32.gmra.mxu3 %v561_v2 }
  0xbb   : > { %v559_v6 = vld [vmem:[#allocation3 + $0x68] sm:$0xff] }
  0xbc   : > { %619 = vmatmul.f32.gmra.mxu1 %v559_v6 }
 0x117   : > { %v640_v11 = vpop.f32.mrf.mxu2 }
 0x118   : > { %v669_v14 = vpop.f32.mrf.mxu3 }
 0x119   : > { %v582_v8 = vpop.f32.mrf.mxu0 }
 0x11a   : > { %v583_v9 = vadd.f32 %v1995_v7, %v582_v8  ;;  %v611_v10 = vpop.f32.mrf.mxu1 }
 0x11c   : > { %v612_v12 = vadd.f32 %v611_v10, %v583_v9 }
 0x11e   : > { %v641_v13 = vadd.f32 %v640_v11, %v612_v12 }
 0x11f   : > { %v643_v21 = vpop.f32.mrf.mxu2 }
 0x120   : > { %v670_v15 = vadd.f32 %v669_v14, %v641_v13  ;;  %v705_v13 = vld [vmem:[%s3098_s3 + $0x78] sm:$0xff]  ;;  %v704_v14 = vld [vmem:[%s3098_s3 + $0x70] sm:$0xff] }
 0x121   : > { %v585_v16 = vpop.f32.mrf.mxu0  ;;  %897 = vmatpush.msrb.mxu0 %v705_v13 }
 0x122   : > { %v681_v17 = vmax.f32 %v670_v15, 0.0  ;;  %v586_v18 = vadd.f32 %v1995_v7, %v585_v16  ;;  %v614_v19 = vpop.f32.mrf.mxu1  ;;  %v703_v15 = vld [vmem:[%s3098_s3 + $0x68] sm:$0xff]  ;;  %v702_v16 = vld [vmem:[%s3098_s3 + $0x60] sm:$0xff] }
 0x123   : > { %898 = vmatpush.msrb.mxu0 %v704_v14  ;;  %v1996_v14 = vld [vmem:[%s3099_s4] ss:$0 sm:$0xff] }
 0x124   : > { %v615_v20 = vadd.f32 %v614_v19, %v586_v18  ;;  %686 = vst.msk [vmem:[#allocation2 + $0x8] sm:$0xff] %vm685_vm4, %v681_v17  ;;  %v701_v17 = vld [vmem:[%s3098_s3 + $0x58] sm:$0xff]  ;;  %v720_v19 = vld [vmem:[%s3098_s3 + $0xf0] sm:$0xff] }
 0x125   : > { %899 = vmatpush.msrb.mxu0 %v703_v15  ;;  %v721_v18 = vld [vmem:[%s3098_s3 + $0xf8] sm:$0xff] }
 0x126   : > { %v644_v22 = vadd.f32 %v643_v21, %v615_v20  ;;  %926 = vmatpush.msrb.mxu1 %v721_v18  ;;  %v700_v20 = vld [vmem:[%s3098_s3 + $0x50] sm:$0xff]  ;;  %v719_v21 = vld [vmem:[%s3098_s3 + $0xe8] sm:$0xff] }
 0x127   : > { %v672_v23 = vpop.f32.mrf.mxu3  ;;  %900 = vmatpush.msrb.mxu0 %v702_v16 }
 0x128   : > { %v673_v24 = vadd.f32 %v672_v23, %v644_v22  ;;  %v646_v34 = vpop.f32.mrf.mxu2  ;;  %927 = vmatpush.msrb.mxu1 %v720_v19  ;;  %v699_v22 = vld [vmem:[%s3098_s3 + $0x48] sm:$0xff]  ;;  %v698_v23 = vld [vmem:[%s3098_s3 + $0x40] sm:$0xff] }
 0x129   : > { %v588_v25 = vpop.f32.mrf.mxu0  ;;  %901 = vmatpush.msrb.mxu0 %v701_v17 }
 0x12a   : > { %v682_v26 = vmax.f32 %v673_v24, 0.0  ;;  %v589_v27 = vadd.f32 %v1995_v7, %v588_v25  ;;  %v617_v31 = vpop.f32.mrf.mxu1  ;;  %928 = vmatpush.msrb.mxu1 %v719_v21  ;;  %v718_v24 = vld [vmem:[%s3098_s3 + $0xe0] sm:$0xff]  ;;  %v697_v25 = vld [vmem:[%s3098_s3 + $0x38] sm:$0xff] }
 0x12b   : > { %v753_v28 = vld [vmem:[#allocation2 + $0x8] sm:$0xff]  ;;  %902 = vmatpush.msrb.mxu0 %v700_v20 }
 0x12c   : > { %v740_v29 = vld [vmem:[#allocation2 + $0x7] sm:$0xff]  ;;  %757 = vrot.lane.b32.xlu0 %v753_v28, %s2013_s21  ;;  %687 = vst.msk [vmem:[#allocation2 + $0x10] sm:$0xff] %vm685_vm4, %v682_v26  ;;  %v618_v32 = vadd.f32 %v617_v31, %v589_v27  ;;  %929 = vmatpush.msrb.mxu1 %v718_v24  ;;  %v717_v26 = vld [vmem:[%s3098_s3 + $0xd8] sm:$0xff]  ;;  %v696_v27 = vld [vmem:[%s3098_s3 + $0x30] sm:$0xff] }
 0x12d   : > { %v727_v30 = vld [vmem:[#allocation2 + $0x6] sm:$0xff]  ;;  %744 = vrot.lane.b32.xlu2 %v740_v29, %s2012_s16  ;;  %903 = vmatpush.msrb.mxu0 %v699_v22  ;;  %v716_v28 = vld [vmem:[%s3098_s3 + $0xd0] sm:$0xff] }
 0x12e   : > { %v723_v33 = vld [vmem:[#allocation2 + $0x5] sm:$0xff]  ;;  %731 = vrot.lane.b32.xlu1 %v727_v30, %s2014_s22  ;;  %v647_v35 = vadd.f32 %v646_v34, %v618_v32  ;;  %930 = vmatpush.msrb.mxu1 %v717_v26  ;;  %v713_v34 = vld [vmem:[%s3098_s3 + $0xb8] sm:$0xff] }
 0x12f   : > { %725 = vst.msk [vmem:[#allocation3] sm:$0xff] %vm685_vm4, %v723_v33  ;;  %904 = vmatpush.msrb.mxu0 %v698_v23  ;;  %v695_v29 = vld [vmem:[%s3098_s3 + $0x28] sm:$0xff]  ;;  %v694_v31 = vld [vmem:[%s3098_s3 + $0x20] sm:$0xff]  ;;  %v693_v33 = vld [vmem:[%s3098_s3 + $0x18] sm:$0xff] }
 0x130   : > { %v675_v36 = vpop.f32.mrf.mxu3  ;;  %v715_v30 = vld [vmem:[%s3098_s3 + $0xc8] sm:$0xff]  ;;  %931 = vmatpush.msrb.mxu1 %v716_v28  ;;  %v714_v32 = vld [vmem:[%s3098_s3 + $0xc0] sm:$0xff] }
 0x131   : > { %v676_v37 = vadd.f32 %v675_v36, %v647_v35  ;;  %905 = vmatpush.msrb.mxu0 %v697_v25  ;;  %v692_v35 = vld [vmem:[%s3098_s3 + $0x10] sm:$0xff] }
 0x132   : > { %v591_v42 = vpop.f32.mrf.mxu0  ;;  %932 = vmatpush.msrb.mxu1 %v715_v30  ;;  %v712_v36 = vld [vmem:[%s3098_s3 + $0xb0] sm:$0xff] }
 0x133   : > { %v794_v38 = vld [vmem:[#allocation2 + $0xc] sm:$0xff]  ;;  %v683_v41 = vmax.f32 %v676_v37, 0.0  ;;  %v592_v43 = vadd.f32 %v1995_v7, %v591_v42  ;;  %v795_v58 = vld [vmem:[#allocation2 + $0x14] sm:$0xff]  ;;  %906 = vmatpush.msrb.mxu0 %v696_v27 }
 0x134   : > { %v782_v39 = vld [vmem:[#allocation2 + $0xb] sm:$0xff]  ;;  %798 = vrot.lane.b32.xlu0 %v794_v38, %s2013_s21  ;;  %v783_v59 = vld [vmem:[#allocation2 + $0x13] sm:$0xff]  ;;  %933 = vmatpush.msrb.mxu1 %v714_v32 }
 0x135   : > { %v770_v40 = vld [vmem:[#allocation2 + $0xa] sm:$0xff]  ;;  %786 = vrot.lane.b32.xlu2 %v782_v39, %s2012_s16  ;;  %688 = vst.msk [vmem:[#allocation2 + $0x28] sm:$0xff] %vm685_vm4, %v683_v41  ;;  %v771_v60 = vld [vmem:[#allocation2 + $0x12] sm:$0xff]  ;;  %907 = vmatpush.msrb.mxu0 %v695_v29  ;;  %v690_v39 = vld [vmem:[%s3098_s3] sm:$0xff] }
 0x136   : > { %774 = vrot.lane.b32.xlu1 %v770_v40, %s2014_s22  ;;  %v766_v44 = vld [vmem:[#allocation2 + $0x9] sm:$0xff]  ;;  %v767_v46 = vld [vmem:[#allocation2 + $0x11] sm:$0xff]  ;;  %934 = vmatpush.msrb.mxu1 %v713_v34  ;;  %v710_v40 = vld [vmem:[%s3098_s3 + $0xa0] sm:$0xff] }
 0x137   : > { %v724_v45 = vld [vmem:[#allocation2 + $0xd] sm:$0xff]  ;;  %768 = vst.msk [vmem:[#allocation3 + $0x8] sm:$0xff] %vm685_vm4, %v766_v44  ;;  %v649_v48 = vpop.f32.mrf.mxu2  ;;  %908 = vmatpush.msrb.mxu0 %v694_v31  ;;  %v709_v41 = vld [vmem:[%s3098_s3 + $0x98] sm:$0xff] }
 0x138   : > { %726 = vst.msk [vmem:[#allocation3 + $0x20] sm:$0xff] %vm685_vm4, %v724_v45  ;;  %v754_v50 = vld [vmem:[#allocation2 + $0x10] sm:$0xff]  ;;  %v678_v52 = vpop.f32.mrf.mxu3  ;;  %v691_v37 = vld [vmem:[%s3098_s3 + $0x8] sm:$0xff]  ;;  %935 = vmatpush.msrb.mxu1 %v712_v36  ;;  %v706_v45 = vld [vmem:[%s3098_s3 + $0x80] sm:$0xff] }
 0x139   : > { %v620_v47 = vpop.f32.mrf.mxu1  ;;  %769 = vst.msk [vmem:[#allocation3 + $0x28] sm:$0xff] %vm685_vm4, %v767_v46  ;;  %v741_v51 = vld [vmem:[#allocation2 + $0xf] sm:$0xff]  ;;  %909 = vmatpush.msrb.mxu0 %v693_v33 }
 0x13a   : > { %v621_v49 = vadd.f32 %v620_v47, %v592_v43  ;;  %v728_v54 = vld [vmem:[#allocation2 + $0xe] sm:$0xff] }
 0x13b   : > { %v711_v38 = vld [vmem:[%s3098_s3 + $0xa8] sm:$0xff]  ;;  %910 = vmatpush.msrb.mxu0 %v692_v35  ;;  %v708_v42 = vld [vmem:[%s3098_s3 + $0x90] sm:$0xff]  ;;  %969 = vst.msk [vmem:[#allocation2 + $0x10] sm:$0xf] %vm968_vm8, %v2011_v0 }
 0x13c   : > { %v650_v53 = vadd.f32 %v649_v48, %v621_v49  ;;  %759 = vrot.lane.b32.xlu0 %v754_v50, %s2013_s21  ;;  %v806_v55 = vld [vmem:[#allocation2 + $0x25] sm:$0xff]  ;;  %936 = vmatpush.msrb.mxu1 %v711_v38 }
 0x13d   : > { %746 = vrot.lane.b32.xlu2 %v741_v51, %s2012_s16  ;;  %808 = vst.msk [vmem:[#allocation3 + $0x40] sm:$0xff] %vm685_vm4, %v806_v55  ;;  %v834_v61 = vld [vmem:[#allocation2 + $0x28] sm:$0xff]  ;;  %911 = vmatpush.msrb.mxu0 %v691_v37 }
 0x13e   : > { %733 = vrot.lane.b32.xlu1 %v728_v54, %s2014_s22  ;;  %v679_v56 = vadd.f32 %v678_v52, %v650_v53  ;;  %v822_v62 = vld [vmem:[#allocation2 + $0x27] sm:$0xff]  ;;  %937 = vmatpush.msrb.mxu1 %v710_v40 }
 0x13f   : > { %v810_v63 = vld [vmem:[#allocation2 + $0x26] sm:$0xff]  ;;  %912 = vmatpush.msrb.mxu0 %v690_v39 }
 0x140   : > { %v684_v57 = vmax.f32 %v679_v56, 0.0  ;;  %938 = vmatpush.msrb.mxu1 %v709_v41  ;;  %v707_v43 = vld [vmem:[%s3098_s3 + $0x88] sm:$0xff] }
 0x142   : > { %689 = vst.msk [vmem:[#allocation2 + $0x30] sm:$0xff] %vm685_vm4, %v684_v57  ;;  %939 = vmatpush.msrb.mxu1 %v708_v42 }
 0x144   : > { %800 = vrot.lane.b32.xlu0 %v795_v58, %s2013_s21  ;;  %940 = vmatpush.msrb.mxu1 %v707_v43 }
 0x145   : > { %788 = vrot.lane.b32.xlu2 %v783_v59, %s2012_s16 }
 0x146   : > { %776 = vrot.lane.b32.xlu1 %v771_v60, %s2014_s22  ;;  %941 = vmatpush.msrb.mxu1 %v706_v45 }
 0x149   : > { %v846_v1 = vld [vmem:[#allocation2 + $0x29] sm:$0xff]  ;;  %v847_v3 = vld [vmem:[#allocation2 + $0x31] sm:$0xff] }
 0x14a   : > { %v807_v2 = vld [vmem:[#allocation2 + $0x2d] sm:$0xff]  ;;  %848 = vst.msk [vmem:[#allocation3 + $0x48] sm:$0xff] %vm685_vm4, %v846_v1 }
 0x14b   : > { %809 = vst.msk [vmem:[#allocation3 + $0x60] sm:$0xff] %vm685_vm4, %v807_v2  ;;  %v874_v4 = vld [vmem:[#allocation2 + $0x2c] sm:$0xff]  ;;  %v875_v10 = vld [vmem:[#allocation2 + $0x34] sm:$0xff] }
 0x14c   : > { %838 = vrot.lane.b32.xlu0 %v834_v61, %s2013_s21  ;;  %849 = vst.msk [vmem:[#allocation3 + $0x68] sm:$0xff] %vm685_vm4, %v847_v3  ;;  %v862_v5 = vld [vmem:[#allocation2 + $0x2b] sm:$0xff]  ;;  %v863_v11 = vld [vmem:[#allocation2 + $0x33] sm:$0xff] }
 0x14d   : > { %826 = vrot.lane.b32.xlu2 %v822_v62, %s2012_s16  ;;  %v850_v6 = vld [vmem:[#allocation2 + $0x2a] sm:$0xff]  ;;  %v851_v12 = vld [vmem:[#allocation2 + $0x32] sm:$0xff] }
 0x14e   : > { %814 = vrot.lane.b32.xlu1 %v810_v63, %s2014_s22  ;;  %v835_v7 = vld [vmem:[#allocation2 + $0x30] sm:$0xff] }
 0x14f   : > { %v823_v8 = vld [vmem:[#allocation2 + $0x2f] sm:$0xff] }
 0x150   : > { %v811_v9 = vld [vmem:[#allocation2 + $0x2e] sm:$0xff] }
 0x151   : > { %976 = vst.msk [vmem:[#allocation2 + $0x30] sm:$0xf] %vm968_vm8, %v2011_v0 }
 0x154   : > { %878 = vrot.lane.b32.xlu0 %v874_v4, %s2013_s21 }
 0x155   : > { %866 = vrot.lane.b32.xlu2 %v862_v5, %s2012_s16 }
 0x156   : > { %854 = vrot.lane.b32.xlu1 %v850_v6, %s2014_s22 }
 0x15c   : > { %840 = vrot.lane.b32.xlu0 %v835_v7, %s2013_s21 }
 0x15d   : > { %828 = vrot.lane.b32.xlu2 %v823_v8, %s2012_s16 }
 0x15e   : > { %816 = vrot.lane.b32.xlu1 %v811_v9, %s2014_s22 }
 0x164   : > { %880 = vrot.lane.b32.xlu0 %v875_v10, %s2013_s21 }
 0x165   : > { %868 = vrot.lane.b32.xlu2 %v863_v11, %s2012_s16 }
 0x166   : > { %856 = vrot.lane.b32.xlu1 %v851_v12, %s2014_s22 }
 0x187   : > { %v745_v44 = vpop.permute.xlu2 %744 }
 0x18f   : > { %v787_v46 = vpop.permute.xlu2 %786 }
 0x197   : > { %v747_v49 = vpop.permute.xlu2 %746 }
 0x19e   : > { %v758_v47 = vpop.permute.xlu0 %757 }
 0x19f   : > { %v789_v55 = vpop.permute.xlu2 %788 }
 0x1a0   : > { %v732_v48 = vpop.permute.xlu1 %731 }
 0x1a1   : > { %738 = vst.msk [vmem:[#allocation3] sm:$0xff] %vm737_vm5, %v732_v48 }
 0x1a2   : > { %751 = vst.msk [vmem:[#allocation3] sm:$0xff] %vm750_vm6, %v745_v44 }
 0x1a3   : > { %764 = vst.msk [vmem:[#allocation3] sm:$0xff] %vm763_vm7, %v758_v47 }
 0x1a6   : > { %v799_v50 = vpop.permute.xlu0 %798 }
 0x1a7   : > { %v827_v60 = vpop.permute.xlu2 %826 }
 0x1a8   : > { %v775_v51 = vpop.permute.xlu1 %774 }
 0x1a9   : > { %780 = vst.msk [vmem:[#allocation3 + $0x8] sm:$0xff] %vm737_vm5, %v775_v51 }
 0x1aa   : > { %792 = vst.msk [vmem:[#allocation3 + $0x8] sm:$0xff] %vm750_vm6, %v787_v46  ;;  %v886_v52 = vld [vmem:[#allocation3] sm:$0xff] }
 0x1ab   : > { %804 = vst.msk [vmem:[#allocation3 + $0x8] sm:$0xff] %vm763_vm7, %v799_v50  ;;  %913 = vmatmul.f32.vlgmr.msrb.gmra.mxu0 %v886_v52 }
 0x1ae   : > { %v760_v53 = vpop.permute.xlu0 %759 }
 0x1af   : > { %v867_v1 = vpop.permute.xlu2 %866 }
 0x1b0   : > { %v734_v54 = vpop.permute.xlu1 %733 }
 0x1b1   : > { %739 = vst.msk [vmem:[#allocation3 + $0x20] sm:$0xff] %vm737_vm5, %v734_v54 }
 0x1b2   : > { %752 = vst.msk [vmem:[#allocation3 + $0x20] sm:$0xff] %vm750_vm6, %v747_v49  ;;  %v887_v56 = vld [vmem:[#allocation3 + $0x8] sm:$0xff] }
 0x1b3   : > { %765 = vst.msk [vmem:[#allocation3 + $0x20] sm:$0xff] %vm763_vm7, %v760_v53  ;;  %942 = vmatmul.f32.vlgmr.msrb.gmra.mxu1 %v887_v56 }
 0x1b6   : > { %v801_v57 = vpop.permute.xlu0 %800 }
 0x1b7   : > { %v829_v5 = vpop.permute.xlu2 %828 }
 0x1b8   : > { %v777_v58 = vpop.permute.xlu1 %776 }
 0x1b9   : > { %781 = vst.msk [vmem:[#allocation3 + $0x28] sm:$0xff] %vm737_vm5, %v777_v58  ;;  %v1861_v58 = vld [vmem:[%s3098_s3 + $0x170] sm:$0xff] }
 0x1ba   : > { %793 = vst.msk [vmem:[#allocation3 + $0x28] sm:$0xff] %vm750_vm6, %v789_v55  ;;  %v888_v59 = vld [vmem:[#allocation3 + $0x20] sm:$0xff] }
 0x1bb   : > { %805 = vst.msk [vmem:[#allocation3 + $0x28] sm:$0xff] %vm763_vm7, %v801_v57  ;;  %916 = vmatmul.f32.gmra.mxu0 %v888_v59  ;;  %v1862_v57 = vld [vmem:[%s3098_s3 + $0x178] sm:$0xff]  ;;  %v1860_v59 = vld [vmem:[%s3098_s3 + $0x168] sm:$0xff] }
 0x1bc   : > { %1099 = vmatpush.msrb.mxu2 %v1862_v57 }
 0x1be   : > { %v839_v61 = vpop.permute.xlu0 %838  ;;  %1100 = vmatpush.msrb.mxu2 %v1861_v58 }
 0x1bf   : > { %v869_v10 = vpop.permute.xlu2 %868 }
 0x1c0   : > { %v815_v62 = vpop.permute.xlu1 %814  ;;  %1101 = vmatpush.msrb.mxu2 %v1860_v59 }
 0x1c1   : > { %820 = vst.msk [vmem:[#allocation3 + $0x40] sm:$0xff] %vm737_vm5, %v815_v62  ;;  %v1878_v62 = vld [vmem:[%s3098_s3 + $0x1f8] sm:$0xff] }
 0x1c2   : > { %832 = vst.msk [vmem:[#allocation3 + $0x40] sm:$0xff] %vm750_vm6, %v827_v60  ;;  %v889_v63 = vld [vmem:[#allocation3 + $0x28] sm:$0xff]  ;;  %v1859_v60 = vld [vmem:[%s3098_s3 + $0x160] sm:$0xff]  ;;  %1122 = vmatpush.msrb.mxu3 %v1878_v62 }
 0x1c3   : > { %844 = vst.msk [vmem:[#allocation3 + $0x40] sm:$0xff] %vm763_vm7, %v839_v61  ;;  %945 = vmatmul.f32.gmra.mxu1 %v889_v63  ;;  %v1858_v61 = vld [vmem:[%s3098_s3 + $0x158] sm:$0xff]  ;;  %1102 = vmatpush.msrb.mxu2 %v1859_v60  ;;  %v1877_v63 = vld [vmem:[%s3098_s3 + $0x1f0] sm:$0xff] }
 0x1c4   : > { %1123 = vmatpush.msrb.mxu3 %v1877_v63 }
 0x1c5   : > { %1103 = vmatpush.msrb.mxu2 %v1858_v61 }
 0x1c6   : > { %v879_v2 = vpop.permute.xlu0 %878 }
 0x1c8   : > { %v855_v3 = vpop.permute.xlu1 %854 }
 0x1c9   : > { %860 = vst.msk [vmem:[#allocation3 + $0x48] sm:$0xff] %vm737_vm5, %v855_v3  ;;  %v1856_v3 = vld [vmem:[%s3098_s3 + $0x148] sm:$0xff] }
 0x1ca   : > { %872 = vst.msk [vmem:[#allocation3 + $0x48] sm:$0xff] %vm750_vm6, %v867_v1  ;;  %v890_v4 = vld [vmem:[#allocation3 + $0x40] sm:$0xff]  ;;  %v1857_v1 = vld [vmem:[%s3098_s3 + $0x150] sm:$0xff] }
 0x1cb   : > { %884 = vst.msk [vmem:[#allocation3 + $0x48] sm:$0xff] %vm763_vm7, %v879_v2  ;;  %919 = vmatmul.f32.gmra.mxu0 %v890_v4  ;;  %v1876_v2 = vld [vmem:[%s3098_s3 + $0x1e8] sm:$0xff]  ;;  %v1875_v4 = vld [vmem:[%s3098_s3 + $0x1e0] sm:$0xff]  ;;  %1104 = vmatpush.msrb.mxu2 %v1857_v1 }
 0x1cc   : > { %1124 = vmatpush.msrb.mxu3 %v1876_v2 }
 0x1cd   : > { %1105 = vmatpush.msrb.mxu2 %v1856_v3 }
 0x1ce   : > { %v841_v6 = vpop.permute.xlu0 %840  ;;  %1125 = vmatpush.msrb.mxu3 %v1875_v4 }
 0x1d0   : > { %v817_v7 = vpop.permute.xlu1 %816 }
 0x1d1   : > { %821 = vst.msk [vmem:[#allocation3 + $0x60] sm:$0xff] %vm737_vm5, %v817_v7  ;;  %v1854_v7 = vld [vmem:[%s3098_s3 + $0x138] sm:$0xff] }
 0x1d2   : > { %833 = vst.msk [vmem:[#allocation3 + $0x60] sm:$0xff] %vm750_vm6, %v829_v5  ;;  %v891_v8 = vld [vmem:[#allocation3 + $0x48] sm:$0xff]  ;;  %v1855_v5 = vld [vmem:[%s3098_s3 + $0x140] sm:$0xff] }
 0x1d3   : > { %845 = vst.msk [vmem:[#allocation3 + $0x60] sm:$0xff] %vm763_vm7, %v841_v6  ;;  %948 = vmatmul.f32.gmra.mxu1 %v891_v8  ;;  %v1874_v6 = vld [vmem:[%s3098_s3 + $0x1d8] sm:$0xff]  ;;  %v1873_v8 = vld [vmem:[%s3098_s3 + $0x1d0] sm:$0xff]  ;;  %1106 = vmatpush.msrb.mxu2 %v1855_v5 }
 0x1d4   : > { %1126 = vmatpush.msrb.mxu3 %v1874_v6  ;;  %v1895_v6 = vld [vmem:[%s3098_s3 + $0x278] sm:$0xff] }
 0x1d5   : > { %1107 = vmatpush.msrb.mxu2 %v1854_v7  ;;  %v1894_v7 = vld [vmem:[%s3098_s3 + $0x270] sm:$0xff]  ;;  %1271 = vmatpush.msra.mxu0 %v1895_v6 }
 0x1d6   : > { %v881_v11 = vpop.permute.xlu0 %880  ;;  %1127 = vmatpush.msrb.mxu3 %v1873_v8  ;;  %v1893_v8 = vld [vmem:[%s3098_s3 + $0x268] sm:$0xff] }
 0x1d7   : > { %1272 = vmatpush.msra.mxu0 %v1894_v7 }
 0x1d8   : > { %v857_v9 = vpop.permute.xlu1 %856 }
 0x1d9   : > { %861 = vst.msk [vmem:[#allocation3 + $0x68] sm:$0xff] %vm737_vm5, %v857_v9  ;;  %v1853_v9 = vld [vmem:[%s3098_s3 + $0x130] sm:$0xff]  ;;  %1273 = vmatpush.msra.mxu0 %v1893_v8 }
 0x1da   : > { %873 = vst.msk [vmem:[#allocation3 + $0x68] sm:$0xff] %vm750_vm6, %v869_v10  ;;  %v892_v12 = vld [vmem:[#allocation3 + $0x60] sm:$0xff]  ;;  %v1872_v10 = vld [vmem:[%s3098_s3 + $0x1c8] sm:$0xff]  ;;  %1108 = vmatpush.msrb.mxu2 %v1853_v9  ;;  %v1891_v9 = vld [vmem:[%s3098_s3 + $0x258] sm:$0xff] }
 0x1db   : > { %885 = vst.msk [vmem:[#allocation3 + $0x68] sm:$0xff] %vm763_vm7, %v881_v11  ;;  %922 = vmatmul.f32.gmra.mxu0 %v892_v12  ;;  %v1852_v11 = vld [vmem:[%s3098_s3 + $0x128] sm:$0xff]  ;;  %1128 = vmatpush.msrb.mxu3 %v1872_v10  ;;  %v1851_v12 = vld [vmem:[%s3098_s3 + $0x120] sm:$0xff]  ;;  %v1911_v10 = vld [vmem:[%s3098_s3 + $0x2f8] sm:$0xff] }
 0x1dc   : > { %1109 = vmatpush.msrb.mxu2 %v1852_v11  ;;  %1294 = vmatpush.msra.mxu1 %v1911_v10  ;;  %v1910_v11 = vld [vmem:[%s3098_s3 + $0x2f0] sm:$0xff] }
 0x1de   : > { %1110 = vmatpush.msrb.mxu2 %v1851_v12  ;;  %v1890_v12 = vld [vmem:[%s3098_s3 + $0x250] sm:$0xff]  ;;  %1295 = vmatpush.msra.mxu1 %v1910_v11 }
 0x1e2   : > { %v893_v13 = vld [vmem:[#allocation3 + $0x68] sm:$0xff] }
 0x1e3   : > { %951 = vmatmul.f32.gmra.mxu1 %v893_v13  ;;  %v1871_v13 = vld [vmem:[%s3098_s3 + $0x1c0] sm:$0xff] }
 0x1e4   : > { %1129 = vmatpush.msrb.mxu3 %v1871_v13  ;;  %v1909_v13 = vld [vmem:[%s3098_s3 + $0x2e8] sm:$0xff] }
 0x1e5   : > { %1296 = vmatpush.msra.mxu1 %v1909_v13 }
 0x228   : > { %v914_v15 = vpop.f32.mrf.mxu0 }
 0x229   : > { %v915_v16 = vadd.f32 %v1996_v14, %v914_v15  ;;  %v1870_v15 = vld [vmem:[%s3098_s3 + $0x1b8] sm:$0xff] }
 0x22a   : > { %1130 = vmatpush.msrb.mxu3 %v1870_v15  ;;  %v1908_v15 = vld [vmem:[%s3098_s3 + $0x2e0] sm:$0xff] }
 0x22b   : > { %1297 = vmatpush.msra.mxu1 %v1908_v15 }
 0x230   : > { %v943_v17 = vpop.f32.mrf.mxu1 }
 0x231   : > { %v944_v18 = vadd.f32 %v943_v17, %v915_v16  ;;  %v1849_v16 = vld [vmem:[%s3098_s3 + $0x110] sm:$0xff] }
 0x232   : > { %v1869_v17 = vld [vmem:[%s3098_s3 + $0x1b0] sm:$0xff] }
 0x233   : > { %v955_v19 = vmax.f32 %v944_v18, 0.0  ;;  %v1848_v18 = vld [vmem:[%s3098_s3 + $0x108] sm:$0xff]  ;;  %1131 = vmatpush.msrb.mxu3 %v1869_v17  ;;  %v1907_v17 = vld [vmem:[%s3098_s3 + $0x2d8] sm:$0xff] }
 0x234   : > { %1298 = vmatpush.msra.mxu1 %v1907_v17 }
 0x235   : > { %959 = vst.msk [vmem:[#allocation4] sm:$0xff] %vm685_vm4, %v955_v19  ;;  %v1868_v19 = vld [vmem:[%s3098_s3 + $0x1a8] sm:$0xff] }
 0x236   : > { %1132 = vmatpush.msrb.mxu3 %v1868_v19  ;;  %v1906_v19 = vld [vmem:[%s3098_s3 + $0x2d0] sm:$0xff] }
 0x237   : > { %1299 = vmatpush.msra.mxu1 %v1906_v19 }
 0x238   : > { %v917_v20 = vpop.f32.mrf.mxu0 }
 0x239   : > { %v918_v21 = vadd.f32 %v1996_v14, %v917_v20  ;;  %v1847_v20 = vld [vmem:[%s3098_s3 + $0x100] sm:$0xff] }
 0x240   : > { %v946_v22 = vpop.f32.mrf.mxu1 }
 0x241   : > { %v947_v23 = vadd.f32 %v946_v22, %v918_v21  ;;  %v1867_v21 = vld [vmem:[%s3098_s3 + $0x1a0] sm:$0xff]  ;;  %v1866_v22 = vld [vmem:[%s3098_s3 + $0x198] sm:$0xff] }
 0x242   : > { %1133 = vmatpush.msrb.mxu3 %v1867_v21  ;;  %v1905_v21 = vld [vmem:[%s3098_s3 + $0x2c8] sm:$0xff] }
 0x243   : > { %v956_v24 = vmax.f32 %v947_v23, 0.0  ;;  %v1865_v23 = vld [vmem:[%s3098_s3 + $0x190] sm:$0xff]  ;;  %1300 = vmatpush.msra.mxu1 %v1905_v21 }
 0x244   : > { %1134 = vmatpush.msrb.mxu3 %v1866_v22  ;;  %v1885_v22 = vld [vmem:[%s3098_s3 + $0x228] sm:$0xff] }
 0x245   : > { %960 = vst.msk [vmem:[#allocation4 + $0x8] sm:$0xff] %vm685_vm4, %v956_v24  ;;  %v1864_v24 = vld [vmem:[%s3098_s3 + $0x188] sm:$0xff] }
 0x246   : > { %1135 = vmatpush.msrb.mxu3 %v1865_v23  ;;  %v1884_v23 = vld [vmem:[%s3098_s3 + $0x220] sm:$0xff] }
 0x248   : > { %v920_v27 = vpop.f32.mrf.mxu0  ;;  %1136 = vmatpush.msrb.mxu3 %v1864_v24  ;;  %v1904_v24 = vld [vmem:[%s3098_s3 + $0x2c0] sm:$0xff] }
 0x249   : > { %v921_v29 = vadd.f32 %v1996_v14, %v920_v27  ;;  %1301 = vmatpush.msra.mxu1 %v1904_v24 }
 0x24c   : > { %v963_v25 = vld [vmem:[#allocation4] ss:$2 sm:$0xff]  ;;  %v965_v26 = vld [vmem:[#allocation4 + $0x1] ss:$2 sm:$0xff] }
 0x24d   : > { %v966_v28 = vmax.f32 %v963_v25, %v965_v26  ;;  %v1863_v25 = vld [vmem:[%s3098_s3 + $0x180] sm:$0xff] }
 0x24e   : > { %1137 = vmatpush.msrb.mxu3 %v1863_v25  ;;  %v1883_v25 = vld [vmem:[%s3098_s3 + $0x218] sm:$0xff] }
 0x24f   : > { %967 = vst.msk [vmem:[#allocation2 + $0x8] sm:$0xff] %vm685_vm4, %v966_v28 }
 0x250   : > { %v949_v30 = vpop.f32.mrf.mxu1 }
 0x251   : > { %v950_v31 = vadd.f32 %v949_v30, %v921_v29 }
 0x253   : > { %v957_v32 = vmax.f32 %v950_v31, 0.0 }
 0x255   : > { %961 = vst.msk [vmem:[#allocation4 + $0x10] sm:$0xff] %vm685_vm4, %v957_v32 }
 0x256   : > { %v1026_v33 = vld [vmem:[#allocation2 + $0x8] sm:$0xff] }
 0x257   : > { %v1020_v34 = vld [vmem:[#allocation2 + $0x7] sm:$0xff]  ;;  %1028 = vrot.lane.b32.xlu0 %v1026_v33, %s2013_s21 }
 0x258   : > { %v1014_v35 = vld [vmem:[#allocation2 + $0x6] sm:$0xff]  ;;  %1022 = vrot.lane.b32.xlu2 %v1020_v34, %s2012_s16  ;;  %v923_v38 = vpop.f32.mrf.mxu0 }
 0x259   : > { %1016 = vrot.lane.b32.xlu1 %v1014_v35, %s2014_s22  ;;  %v1012_v36 = vld [vmem:[#allocation2 + $0x5] sm:$0xff]  ;;  %v924_v41 = vadd.f32 %v1996_v14, %v923_v38  ;;  %v1850_v14 = vld [vmem:[%s3098_s3 + $0x118] sm:$0xff] }
 0x25a   : > { %v1032_v37 = vld [vmem:[#allocation2 + $0x9] sm:$0xff]  ;;  %1013 = vst.msk [vmem:[#allocation3] sm:$0xff] %vm685_vm4, %v1012_v36  ;;  %1111 = vmatpush.msrb.mxu2 %v1850_v14 }
 0x25b   : > { %1033 = vst.msk [vmem:[#allocation3 + $0x8] sm:$0xff] %vm685_vm4, %v1032_v37  ;;  %v1046_v39 = vld [vmem:[#allocation2 + $0xc] sm:$0xff] }
 0x25c   : > { %v1040_v40 = vld [vmem:[#allocation2 + $0xb] sm:$0xff]  ;;  %1112 = vmatpush.msrb.mxu2 %v1849_v16  ;;  %v1888_v16 = vld [vmem:[%s3098_s3 + $0x240] sm:$0xff] }
 0x25d   : > { %v1034_v42 = vld [vmem:[#allocation2 + $0xa] sm:$0xff] }
 0x25e   : > { %1113 = vmatpush.msrb.mxu2 %v1848_v18  ;;  %v1889_v14 = vld [vmem:[%s3098_s3 + $0x248] sm:$0xff]  ;;  %v1887_v18 = vld [vmem:[%s3098_s3 + $0x238] sm:$0xff] }
 0x25f   : > { %1048 = vrot.lane.b32.xlu0 %v1046_v39, %s2013_s21 }
 0x260   : > { %1042 = vrot.lane.b32.xlu2 %v1040_v40, %s2012_s16  ;;  %v952_v43 = vpop.f32.mrf.mxu1  ;;  %1114 = vmatpush.msrb.mxu2 %v1847_v20  ;;  %v1886_v20 = vld [vmem:[%s3098_s3 + $0x230] sm:$0xff] }
 0x261   : > { %1036 = vrot.lane.b32.xlu1 %v1034_v42, %s2014_s22  ;;  %v953_v44 = vadd.f32 %v952_v43, %v924_v41  ;;  %v1997_v42 = vld [vmem:[%s3099_s4 + $0x1] ss:$0 sm:$0xff] }
 0x263   : > { %v958_v45 = vmax.f32 %v953_v44, 0.0 }
 0x265   : > { %962 = vst.msk [vmem:[#allocation4 + $0x18] sm:$0xff] %vm685_vm4, %v958_v45 }
 0x26c   : > { %v971_v46 = vld [vmem:[#allocation4 + $0x10] ss:$2 sm:$0xff]  ;;  %v973_v47 = vld [vmem:[#allocation4 + $0x11] ss:$2 sm:$0xff] }
 0x26d   : > { %v974_v48 = vmax.f32 %v971_v46, %v973_v47 }
 0x26f   : > { %975 = vst.msk [vmem:[#allocation2 + $0x28] sm:$0xff] %vm685_vm4, %v974_v48 }
 0x276   : > { %v1066_v49 = vld [vmem:[#allocation2 + $0x28] sm:$0xff] }
 0x277   : > { %v1060_v50 = vld [vmem:[#allocation2 + $0x27] sm:$0xff]  ;;  %1068 = vrot.lane.b32.xlu0 %v1066_v49, %s2013_s21 }
 0x278   : > { %v1054_v51 = vld [vmem:[#allocation2 + $0x26] sm:$0xff]  ;;  %1062 = vrot.lane.b32.xlu2 %v1060_v50, %s2012_s16 }
 0x279   : > { %1056 = vrot.lane.b32.xlu1 %v1054_v51, %s2014_s22  ;;  %v1052_v52 = vld [vmem:[#allocation2 + $0x25] sm:$0xff] }
 0x27a   : > { %v1072_v53 = vld [vmem:[#allocation2 + $0x29] sm:$0xff]  ;;  %1053 = vst.msk [vmem:[#allocation3 + $0x20] sm:$0xff] %vm685_vm4, %v1052_v52 }
 0x27b   : > { %1073 = vst.msk [vmem:[#allocation3 + $0x28] sm:$0xff] %vm685_vm4, %v1072_v53  ;;  %v1086_v54 = vld [vmem:[#allocation2 + $0x2c] sm:$0xff] }
 0x27c   : > { %v1080_v55 = vld [vmem:[#allocation2 + $0x2b] sm:$0xff] }
 0x27d   : > { %v1074_v56 = vld [vmem:[#allocation2 + $0x2a] sm:$0xff] }
 0x27f   : > { %1088 = vrot.lane.b32.xlu0 %v1086_v54, %s2013_s21 }
 0x280   : > { %1082 = vrot.lane.b32.xlu2 %v1080_v55, %s2012_s16 }
 0x281   : > { %1076 = vrot.lane.b32.xlu1 %v1074_v56, %s2014_s22 }
 0x2b2   : > { %v1023_v26 = vpop.permute.xlu2 %1022 }
 0x2ba   : > { %v1043_v30 = vpop.permute.xlu2 %1042 }
 0x2c9   : > { %v1029_v27 = vpop.permute.xlu0 %1028 }
 0x2cb   : > { %v1017_v28 = vpop.permute.xlu1 %1016 }
 0x2cc   : > { %1019 = vst.msk [vmem:[#allocation3] sm:$0xff] %vm737_vm5, %v1017_v28  ;;  %v1902_v28 = vld [vmem:[%s3098_s3 + $0x2b0] sm:$0xff] }
 0x2cd   : > { %1025 = vst.msk [vmem:[#allocation3] sm:$0xff] %vm750_vm6, %v1023_v26  ;;  %v1903_v26 = vld [vmem:[%s3098_s3 + $0x2b8] sm:$0xff] }
 0x2ce   : > { %1031 = vst.msk [vmem:[#allocation3] sm:$0xff] %vm763_vm7, %v1029_v27  ;;  %1302 = vmatpush.msra.mxu1 %v1903_v26  ;;  %v1882_v27 = vld [vmem:[%s3098_s3 + $0x210] sm:$0xff] }
 0x2d0   : > { %1303 = vmatpush.msra.mxu1 %v1902_v28 }
 0x2d1   : > { %v1049_v31 = vpop.permute.xlu0 %1048 }
 0x2d2   : > { %v1063_v34 = vpop.permute.xlu2 %1062 }
 0x2d3   : > { %v1037_v29 = vpop.permute.xlu1 %1036 }
 0x2d4   : > { %1039 = vst.msk [vmem:[#allocation3 + $0x8] sm:$0xff] %vm737_vm5, %v1037_v29  ;;  %v1881_v29 = vld [vmem:[%s3098_s3 + $0x208] sm:$0xff] }
 0x2d5   : > { %1045 = vst.msk [vmem:[#allocation3 + $0x8] sm:$0xff] %vm750_vm6, %v1043_v30  ;;  %v1092_v32 = vld [vmem:[#allocation3] sm:$0xff]  ;;  %v1901_v30 = vld [vmem:[%s3098_s3 + $0x2a8] sm:$0xff] }
 0x2d6   : > { %1051 = vst.msk [vmem:[#allocation3 + $0x8] sm:$0xff] %vm763_vm7, %v1049_v31  ;;  %1115 = vmatmul.f32.vlgmr.msrb.gmra.mxu2 %v1092_v32  ;;  %1304 = vmatpush.msra.mxu1 %v1901_v30  ;;  %v1880_v31 = vld [vmem:[%s3098_s3 + $0x200] sm:$0xff]  ;;  %v1928_v30 = vld [vmem:[%s3098_s3 + $0x378] sm:$0xff] }
 0x2d7   : > { %v1900_v32 = vld [vmem:[%s3098_s3 + $0x2a0] sm:$0xff]  ;;  %1472 = vmatpush.msra.mxu2 %v1928_v30 }
 0x2d8   : > { %1305 = vmatpush.msra.mxu1 %v1900_v32  ;;  %v1944_v32 = vld [vmem:[%s3098_s3 + $0x3f8] sm:$0xff] }
 0x2d9   : > { %1492 = vmatpush.msra.mxu3 %v1944_v32 }
 0x2da   : > { %v1083_v38 = vpop.permute.xlu2 %1082 }
 0x2dd   : > { %v1093_v33 = vld [vmem:[#allocation3 + $0x8] sm:$0xff] }
 0x2de   : > { %1138 = vmatmul.f32.vlgmr.msrb.gmra.mxu3 %v1093_v33  ;;  %v1899_v33 = vld [vmem:[%s3098_s3 + $0x298] sm:$0xff] }
 0x2df   : > { %1306 = vmatpush.msra.mxu1 %v1899_v33  ;;  %v1926_v33 = vld [vmem:[%s3098_s3 + $0x368] sm:$0xff] }
 0x2e9   : > { %v1069_v35 = vpop.permute.xlu0 %1068 }
 0x2eb   : > { %v1057_v36 = vpop.permute.xlu1 %1056 }
 0x2ec   : > { %1059 = vst.msk [vmem:[#allocation3 + $0x20] sm:$0xff] %vm737_vm5, %v1057_v36  ;;  %v1896_v36 = vld [vmem:[%s3098_s3 + $0x280] sm:$0xff] }
 0x2ed   : > { %1065 = vst.msk [vmem:[#allocation3 + $0x20] sm:$0xff] %vm750_vm6, %v1063_v34  ;;  %v1898_v34 = vld [vmem:[%s3098_s3 + $0x290] sm:$0xff] }
 0x2ee   : > { %1071 = vst.msk [vmem:[#allocation3 + $0x20] sm:$0xff] %vm763_vm7, %v1069_v35  ;;  %1307 = vmatpush.msra.mxu1 %v1898_v34  ;;  %v1897_v35 = vld [vmem:[%s3098_s3 + $0x288] sm:$0xff]  ;;  %v1943_v34 = vld [vmem:[%s3098_s3 + $0x3f0] sm:$0xff] }
 0x2ef   : > { %1493 = vmatpush.msra.mxu3 %v1943_v34 }
 0x2f0   : > { %1308 = vmatpush.msra.mxu1 %v1897_v35  ;;  %v1942_v35 = vld [vmem:[%s3098_s3 + $0x3e8] sm:$0xff] }
 0x2f1   : > { %v1089_v39 = vpop.permute.xlu0 %1088  ;;  %1494 = vmatpush.msra.mxu3 %v1942_v35 }
 0x2f2   : > { %1309 = vmatpush.msra.mxu1 %v1896_v36  ;;  %v1925_v36 = vld [vmem:[%s3098_s3 + $0x360] sm:$0xff] }
 0x2f3   : > { %v1077_v37 = vpop.permute.xlu1 %1076 }
 0x2f4   : > { %1079 = vst.msk [vmem:[#allocation3 + $0x28] sm:$0xff] %vm737_vm5, %v1077_v37 }
 0x2f5   : > { %1085 = vst.msk [vmem:[#allocation3 + $0x28] sm:$0xff] %vm750_vm6, %v1083_v38  ;;  %v1094_v40 = vld [vmem:[#allocation3 + $0x20] sm:$0xff] }
 0x2f6   : > { %1091 = vst.msk [vmem:[#allocation3 + $0x28] sm:$0xff] %vm763_vm7, %v1089_v39  ;;  %1118 = vmatmul.f32.gmra.mxu2 %v1094_v40 }
 0x2fd   : > { %v1095_v41 = vld [vmem:[#allocation3 + $0x28] sm:$0xff] }
 0x2fe   : > { %1141 = vmatmul.f32.gmra.mxu3 %v1095_v41 }
 0x359   : > { %v1116_v43 = vpop.f32.mrf.mxu2 }
 0x35a   : > { %v1117_v44 = vadd.f32 %v1997_v42, %v1116_v43 }
 0x361   : > { %v1139_v45 = vpop.f32.mrf.mxu3 }
 0x362   : > { %v1140_v46 = vadd.f32 %v1139_v45, %v1117_v44 }
 0x364   : > { %v1145_v47 = vmax.f32 %v1140_v46, 0.0 }
 0x366   : > { %1147 = vst.msk [vmem:[#allocation2 + $0x8] sm:$0xff] %vm685_vm4, %v1145_v47 }
 0x36d   : > { %v1198_v48 = vld [vmem:[#allocation2 + $0x8] sm:$0xff] }
 0x36e   : > { %v1192_v49 = vld [vmem:[#allocation2 + $0x7] sm:$0xff]  ;;  %1200 = vrot.lane.b32.xlu0 %v1198_v48, %s2013_s21 }
 0x36f   : > { %v1186_v50 = vld [vmem:[#allocation2 + $0x6] sm:$0xff]  ;;  %1194 = vrot.lane.b32.xlu2 %v1192_v49, %s2012_s16 }
 0x370   : > { %1188 = vrot.lane.b32.xlu1 %v1186_v50, %s2014_s22  ;;  %v1184_v51 = vld [vmem:[#allocation2 + $0x5] sm:$0xff] }
 0x371   : > { %v1204_v52 = vld [vmem:[#allocation2 + $0x9] sm:$0xff]  ;;  %1185 = vst.msk [vmem:[#allocation3] sm:$0xff] %vm685_vm4, %v1184_v51 }
 0x372   : > { %v1218_v53 = vld [vmem:[#allocation2 + $0xc] sm:$0xff]  ;;  %1205 = vst.msk [vmem:[#allocation3 + $0x8] sm:$0xff] %vm685_vm4, %v1204_v52 }
 0x373   : > { %v1212_v54 = vld [vmem:[#allocation2 + $0xb] sm:$0xff] }
 0x374   : > { %v1206_v55 = vld [vmem:[#allocation2 + $0xa] sm:$0xff] }
 0x375   : > { %1325 = vst.msk [vmem:[#allocation2 + $0xc] sm:$0xf] %vm968_vm8, %v2011_v0 }
 0x376   : > { %1220 = vrot.lane.b32.xlu0 %v1218_v53, %s2013_s21  ;;  %v1998_v53 = vld [vmem:[%s3099_s4 + $0x2] ss:$0 sm:$0xff] }
 0x377   : > { %1214 = vrot.lane.b32.xlu2 %v1212_v54, %s2012_s16 }
 0x378   : > { %1208 = vrot.lane.b32.xlu1 %v1206_v55, %s2014_s22 }
 0x379   : > { %v1119_v56 = vpop.f32.mrf.mxu2 }
 0x37a   : > { %v1120_v57 = vadd.f32 %v1997_v42, %v1119_v56 }
 0x37c   : > { %v1405_v28 = vld [vmem:[#allocation2 + $0xc] sm:$0xf] }
 0x381   : > { %v1142_v58 = vpop.f32.mrf.mxu3 }
 0x382   : > { %v1143_v59 = vadd.f32 %v1142_v58, %v1120_v57 }
 0x384   : > { %v1146_v60 = vmax.f32 %v1143_v59, 0.0 }
 0x386   : > { %1148 = vst.msk [vmem:[#allocation2 + $0x28] sm:$0xff] %vm685_vm4, %v1146_v60 }
 0x38d   : > { %v1238_v61 = vld [vmem:[#allocation2 + $0x28] sm:$0xff] }
 0x38e   : > { %v1232_v62 = vld [vmem:[#allocation2 + $0x27] sm:$0xff]  ;;  %1240 = vrot.lane.b32.xlu0 %v1238_v61, %s2013_s21 }
 0x38f   : > { %v1226_v63 = vld [vmem:[#allocation2 + $0x26] sm:$0xff]  ;;  %1234 = vrot.lane.b32.xlu2 %v1232_v62, %s2012_s16 }
 0x390   : > { %1228 = vrot.lane.b32.xlu1 %v1226_v63, %s2014_s22  ;;  %v1224_v1 = vld [vmem:[#allocation2 + $0x25] sm:$0xff] }
 0x391   : > { %v1244_v2 = vld [vmem:[#allocation2 + $0x29] sm:$0xff]  ;;  %1225 = vst.msk [vmem:[#allocation3 + $0x20] sm:$0xff] %vm685_vm4, %v1224_v1 }
 0x392   : > { %v1258_v3 = vld [vmem:[#allocation2 + $0x2c] sm:$0xff]  ;;  %1245 = vst.msk [vmem:[#allocation3 + $0x28] sm:$0xff] %vm685_vm4, %v1244_v2 }
 0x393   : > { %v1252_v4 = vld [vmem:[#allocation2 + $0x2b] sm:$0xff] }
 0x394   : > { %v1246_v5 = vld [vmem:[#allocation2 + $0x2a] sm:$0xff] }
 0x395   : > { %1332 = vst.msk [vmem:[#allocation2 + $0x2c] sm:$0xf] %vm968_vm8, %v2011_v0  ;;  %v1892_v0 = vld [vmem:[%s3098_s3 + $0x260] sm:$0xff] }
 0x396   : > { %1260 = vrot.lane.b32.xlu0 %v1258_v3, %s2013_s21  ;;  %1274 = vmatpush.msra.mxu0 %v1892_v0 }
 0x397   : > { %1254 = vrot.lane.b32.xlu2 %v1252_v4, %s2012_s16 }
 0x398   : > { %1248 = vrot.lane.b32.xlu1 %v1246_v5, %s2014_s22  ;;  %1275 = vmatpush.msra.mxu0 %v1891_v9 }
 0x39a   : > { %1276 = vmatpush.msra.mxu0 %v1890_v12 }
 0x39c   : > { %1277 = vmatpush.msra.mxu0 %v1889_v14  ;;  %v1460_v10 = vld [vmem:[#allocation2 + $0x2c] sm:$0xf] }
 0x39d   : > { %v1462_v11 = vrot.slane %v1460_v10, 4 }
 0x39e   : > { %1278 = vmatpush.msra.mxu0 %v1888_v16 }
 0x3a0   : > { %1279 = vmatpush.msra.mxu0 %v1887_v18 }
 0x3a2   : > { %1280 = vmatpush.msra.mxu0 %v1886_v20 }
 0x3a4   : > { %1281 = vmatpush.msra.mxu0 %v1885_v22 }
 0x3a6   : > { %1282 = vmatpush.msra.mxu0 %v1884_v23 }
 0x3a8   : > { %1283 = vmatpush.msra.mxu0 %v1883_v25 }
 0x3aa   : > { %1284 = vmatpush.msra.mxu0 %v1882_v27 }
 0x3ac   : > { %1285 = vmatpush.msra.mxu0 %v1881_v29 }
 0x3ae   : > { %1286 = vmatpush.msra.mxu0 %v1880_v31  ;;  %v1927_v31 = vld [vmem:[%s3098_s3 + $0x370] sm:$0xff] }
 0x3af   : > { %1473 = vmatpush.msra.mxu2 %v1927_v31 }
 0x3b1   : > { %1474 = vmatpush.msra.mxu2 %v1926_v33 }
 0x3b3   : > { %1475 = vmatpush.msra.mxu2 %v1925_v36 }
 0x3c9   : > { %v1195_v37 = vpop.permute.xlu2 %1194 }
 0x3d1   : > { %v1215_v41 = vpop.permute.xlu2 %1214 }
 0x3e0   : > { %v1201_v38 = vpop.permute.xlu0 %1200 }
 0x3e2   : > { %v1189_v39 = vpop.permute.xlu1 %1188 }
 0x3e3   : > { %1191 = vst.msk [vmem:[#allocation3] sm:$0xff] %vm737_vm5, %v1189_v39  ;;  %v1922_v39 = vld [vmem:[%s3098_s3 + $0x348] sm:$0xff] }
 0x3e4   : > { %1197 = vst.msk [vmem:[#allocation3] sm:$0xff] %vm750_vm6, %v1195_v37  ;;  %v1924_v37 = vld [vmem:[%s3098_s3 + $0x358] sm:$0xff] }
 0x3e5   : > { %1203 = vst.msk [vmem:[#allocation3] sm:$0xff] %vm763_vm7, %v1201_v38  ;;  %v1923_v38 = vld [vmem:[%s3098_s3 + $0x350] sm:$0xff]  ;;  %1476 = vmatpush.msra.mxu2 %v1924_v37  ;;  %v1635_v37 = vld [vmem:[#allocation2 + $0x2c] sm:$0xf] }
 0x3e7   : > { %1477 = vmatpush.msra.mxu2 %v1923_v38 }
 0x3e8   : > { %v1221_v43 = vpop.permute.xlu0 %1220 }
 0x3e9   : > { %v1235_v45 = vpop.permute.xlu2 %1234  ;;  %1478 = vmatpush.msra.mxu2 %v1922_v39  ;;  %v1637_v39 = vrot.slane %v1635_v37, 4  ;;  %v1754_v37 = vld [vmem:[%s3102_s7 + $0x60] sm:$0xff] }
 0x3ea   : > { %v1209_v40 = vpop.permute.xlu1 %1208 }
 0x3eb   : > { %1211 = vst.msk [vmem:[#allocation3 + $0x8] sm:$0xff] %vm737_vm5, %v1209_v40  ;;  %v1921_v40 = vld [vmem:[%s3098_s3 + $0x340] sm:$0xff] }
 0x3ec   : > { %v1264_v42 = vld [vmem:[#allocation3] sm:$0xff]  ;;  %1217 = vst.msk [vmem:[#allocation3 + $0x8] sm:$0xff] %vm750_vm6, %v1215_v41  ;;  %1479 = vmatpush.msra.mxu2 %v1921_v40  ;;  %v1584_v40 = vld [vmem:[#allocation2 + $0xc] sm:$0xf] }
 0x3ed   : > { %1223 = vst.msk [vmem:[#allocation3 + $0x8] sm:$0xff] %vm763_vm7, %v1221_v43  ;;  %1287 = vmatmul.f32.vlgmr.msra.gmra.mxu0 %v1264_v42 }
 0x3f1   : > { %v1255_v49 = vpop.permute.xlu2 %1254 }
 0x3f4   : > { %v1265_v44 = vld [vmem:[#allocation3 + $0x8] sm:$0xff] }
 0x3f5   : > { %1310 = vmatmul.f32.vlgmr.msra.gmra.mxu1 %v1265_v44  ;;  %v1941_v44 = vld [vmem:[%s3098_s3 + $0x3e0] sm:$0xff] }
 0x3f6   : > { %1495 = vmatpush.msra.mxu3 %v1941_v44  ;;  %v1959_v44 = vld [vmem:[%s3098_s3 + $0x468] sm:$0xff] }
 0x400   : > { %v1241_v46 = vpop.permute.xlu0 %1240 }
 0x402   : > { %v1229_v47 = vpop.permute.xlu1 %1228 }
 0x403   : > { %1231 = vst.msk [vmem:[#allocation3 + $0x20] sm:$0xff] %vm737_vm5, %v1229_v47  ;;  %v1919_v47 = vld [vmem:[%s3098_s3 + $0x330] sm:$0xff] }
 0x404   : > { %1237 = vst.msk [vmem:[#allocation3 + $0x20] sm:$0xff] %vm750_vm6, %v1235_v45  ;;  %v1920_v45 = vld [vmem:[%s3098_s3 + $0x338] sm:$0xff] }
 0x405   : > { %1243 = vst.msk [vmem:[#allocation3 + $0x20] sm:$0xff] %vm763_vm7, %v1241_v46  ;;  %v1940_v46 = vld [vmem:[%s3098_s3 + $0x3d8] sm:$0xff]  ;;  %1480 = vmatpush.msra.mxu2 %v1920_v45  ;;  %v1958_v45 = vld [vmem:[%s3098_s3 + $0x460] sm:$0xff] }
 0x406   : > { %1496 = vmatpush.msra.mxu3 %v1940_v46  ;;  %v1957_v46 = vld [vmem:[%s3098_s3 + $0x458] sm:$0xff] }
 0x407   : > { %1481 = vmatpush.msra.mxu2 %v1919_v47  ;;  %v1977_v47 = vld [vmem:[%s3098_s3 + $0x4f8] sm:$0xff] }
 0x408   : > { %v1261_v50 = vpop.permute.xlu0 %1260  ;;  %1667 = vmatpush.msrb.mxu1 %v1977_v47  ;;  %v1750_v47 = vld [vmem:[%s3102_s7 + $0x40] sm:$0xff] }
 0x40a   : > { %v1249_v48 = vpop.permute.xlu1 %1248 }
 0x40b   : > { %1251 = vst.msk [vmem:[#allocation3 + $0x28] sm:$0xff] %vm737_vm5, %v1249_v48  ;;  %v1939_v48 = vld [vmem:[%s3098_s3 + $0x3d0] sm:$0xff] }
 0x40c   : > { %1257 = vst.msk [vmem:[#allocation3 + $0x28] sm:$0xff] %vm750_vm6, %v1255_v49  ;;  %v1266_v51 = vld [vmem:[#allocation3 + $0x20] sm:$0xff]  ;;  %v1918_v49 = vld [vmem:[%s3098_s3 + $0x328] sm:$0xff]  ;;  %1497 = vmatpush.msra.mxu3 %v1939_v48  ;;  %v1956_v48 = vld [vmem:[%s3098_s3 + $0x450] sm:$0xff] }
 0x40d   : > { %1263 = vst.msk [vmem:[#allocation3 + $0x28] sm:$0xff] %vm763_vm7, %v1261_v50  ;;  %1290 = vmatmul.f32.gmra.mxu0 %v1266_v51  ;;  %v1938_v50 = vld [vmem:[%s3098_s3 + $0x3c8] sm:$0xff]  ;;  %v1917_v51 = vld [vmem:[%s3098_s3 + $0x320] sm:$0xff]  ;;  %1482 = vmatpush.msra.mxu2 %v1918_v49  ;;  %v1976_v49 = vld [vmem:[%s3098_s3 + $0x4f0] sm:$0xff] }
 0x40e   : > { %1498 = vmatpush.msra.mxu3 %v1938_v50  ;;  %v1955_v50 = vld [vmem:[%s3098_s3 + $0x448] sm:$0xff]  ;;  %1668 = vmatpush.msrb.mxu1 %v1976_v49 }
 0x40f   : > { %1483 = vmatpush.msra.mxu2 %v1917_v51  ;;  %v1975_v51 = vld [vmem:[%s3098_s3 + $0x4e8] sm:$0xff] }
 0x410   : > { %1669 = vmatpush.msrb.mxu1 %v1975_v51 }
 0x414   : > { %v1267_v52 = vld [vmem:[#allocation3 + $0x28] sm:$0xff] }
 0x415   : > { %1313 = vmatmul.f32.gmra.mxu1 %v1267_v52 }
 0x46a   : > { %v1288_v54 = vpop.f32.mrf.mxu0 }
 0x46b   : > { %v1289_v55 = vadd.f32 %v1998_v53, %v1288_v54  ;;  %v1937_v54 = vld [vmem:[%s3098_s3 + $0x3c0] sm:$0xff] }
 0x46c   : > { %1499 = vmatpush.msra.mxu3 %v1937_v54  ;;  %v1974_v54 = vld [vmem:[%s3098_s3 + $0x4e0] sm:$0xff] }
 0x46d   : > { %1670 = vmatpush.msrb.mxu1 %v1974_v54 }
 0x472   : > { %v1311_v56 = vpop.f32.mrf.mxu1 }
 0x473   : > { %v1312_v57 = vadd.f32 %v1311_v56, %v1289_v55  ;;  %v1916_v55 = vld [vmem:[%s3098_s3 + $0x318] sm:$0xff] }
 0x474   : > { %v1936_v56 = vld [vmem:[%s3098_s3 + $0x3b8] sm:$0xff]  ;;  %1484 = vmatpush.msra.mxu2 %v1916_v55 }
 0x475   : > { %v1317_v58 = vmax.f32 %v1312_v57, 0.0  ;;  %v1915_v57 = vld [vmem:[%s3098_s3 + $0x310] sm:$0xff]  ;;  %1500 = vmatpush.msra.mxu3 %v1936_v56  ;;  %v1953_v55 = vld [vmem:[%s3098_s3 + $0x438] sm:$0xff] }
 0x476   : > { %1485 = vmatpush.msra.mxu2 %v1915_v57  ;;  %v1973_v56 = vld [vmem:[%s3098_s3 + $0x4d8] sm:$0xff]  ;;  %v1952_v57 = vld [vmem:[%s3098_s3 + $0x430] sm:$0xff] }
 0x477   : > { %1319 = vst.msk [vmem:[#allocation4] sm:$0xff] %vm685_vm4, %v1317_v58  ;;  %v1935_v58 = vld [vmem:[%s3098_s3 + $0x3b0] sm:$0xff]  ;;  %1671 = vmatpush.msrb.mxu1 %v1973_v56  ;;  %v1747_v56 = vld [vmem:[%s3102_s7 + $0x28] sm:$0xff] }
 0x478   : > { %1501 = vmatpush.msra.mxu3 %v1935_v58  ;;  %v1972_v58 = vld [vmem:[%s3098_s3 + $0x4d0] sm:$0xff] }
 0x479   : > { %1672 = vmatpush.msrb.mxu1 %v1972_v58 }
 0x47e   : > { %v1321_v59 = vld [vmem:[#allocation4] ss:$2 sm:$0xf]  ;;  %v1322_v60 = vld [vmem:[#allocation4 + $0x1] ss:$2 sm:$0xf] }
 0x47f   : > { %v1323_v61 = vmax.f32 %v1321_v59, %v1322_v60  ;;  %v1914_v59 = vld [vmem:[%s3098_s3 + $0x308] sm:$0xff] }
 0x480   : > { %v1934_v60 = vld [vmem:[%s3098_s3 + $0x3a8] sm:$0xff]  ;;  %1486 = vmatpush.msra.mxu2 %v1914_v59 }
 0x481   : > { %1324 = vst.msk [vmem:[#allocation2 + $0x8] sm:$0xf] %vm968_vm8, %v1323_v61  ;;  %v1913_v61 = vld [vmem:[%s3098_s3 + $0x300] sm:$0xff]  ;;  %1502 = vmatpush.msra.mxu3 %v1934_v60  ;;  %v1951_v59 = vld [vmem:[%s3098_s3 + $0x428] sm:$0xff] }
 0x482   : > { %1487 = vmatpush.msra.mxu2 %v1913_v61  ;;  %v1971_v60 = vld [vmem:[%s3098_s3 + $0x4c8] sm:$0xff] }
 0x483   : > { %1673 = vmatpush.msrb.mxu1 %v1971_v60 }
 0x488   : > { %v1384_v62 = vld [vmem:[#allocation2 + $0x8] sm:$0xf] }
 0x489   : > { %v1377_v63 = vld [vmem:[#allocation2 + $0x7] sm:$0xf]  ;;  %1386 = vrot.lane.b32.xlu2 %v1384_v62, %s2013_s21  ;;  %v1399_v9 = vld [vmem:[#allocation2 + $0xb] sm:$0xf] }
 0x48a   : > { %v1370_v1 = vld [vmem:[#allocation2 + $0x6] sm:$0xf]  ;;  %1379 = vrot.lane.b32.xlu0 %v1377_v63, %s2012_s16  ;;  %v1291_v4 = vpop.f32.mrf.mxu0  ;;  %v1393_v5 = vld [vmem:[#allocation2 + $0xa] sm:$0xf] }
 0x48b   : > { %v1368_v2 = vld [vmem:[#allocation2 + $0x5] sm:$0xf]  ;;  %1372 = vrot.lane.b32.xlu1 %v1370_v1, %s2014_s22  ;;  %v1391_v3 = vld [vmem:[#allocation2 + $0x9] sm:$0xf]  ;;  %v1292_v6 = vadd.f32 %v1998_v53, %v1291_v4 }
 0x48c   : > { %1369 = vst.msk [vmem:[#allocation3] sm:$0xf] %vm968_vm8, %v1368_v2  ;;  %v1933_v1 = vld [vmem:[%s3098_s3 + $0x3a0] sm:$0xff]  ;;  %v1932_v2 = vld [vmem:[%s3098_s3 + $0x398] sm:$0xff]  ;;  %v1930_v4 = vld [vmem:[%s3098_s3 + $0x388] sm:$0xff] }
 0x48d   : > { %1392 = vst.msk [vmem:[#allocation3 + $0x8] sm:$0xf] %vm968_vm8, %v1391_v3  ;;  %1503 = vmatpush.msra.mxu3 %v1933_v1  ;;  %v1931_v3 = vld [vmem:[%s3098_s3 + $0x390] sm:$0xff]  ;;  %v1949_v1 = vld [vmem:[%s3098_s3 + $0x418] sm:$0xff] }
 0x48f   : > { %1504 = vmatpush.msra.mxu3 %v1932_v2  ;;  %v1969_v2 = vld [vmem:[%s3098_s3 + $0x4b8] sm:$0xff] }
 0x491   : > { %1505 = vmatpush.msra.mxu3 %v1931_v3  ;;  %v1948_v3 = vld [vmem:[%s3098_s3 + $0x410] sm:$0xff] }
 0x492   : > { %1395 = vrot.lane.b32.xlu0 %v1393_v5, %s2014_s22  ;;  %v1314_v7 = vpop.f32.mrf.mxu1  ;;  %v1929_v5 = vld [vmem:[%s3098_s3 + $0x380] sm:$0xff] }
 0x493   : > { %v1315_v8 = vadd.f32 %v1314_v7, %v1292_v6  ;;  %1506 = vmatpush.msra.mxu3 %v1930_v4  ;;  %v1968_v4 = vld [vmem:[%s3098_s3 + $0x4b0] sm:$0xff] }
 0x495   : > { %v1318_v0 = vmax.f32 %v1315_v8, 0.0  ;;  %1507 = vmatpush.msra.mxu3 %v1929_v5  ;;  %v1947_v5 = vld [vmem:[%s3098_s3 + $0x408] sm:$0xff] }
 0x497   : > { %1320 = vst.msk [vmem:[#allocation4 + $0x8] sm:$0xff] %vm685_vm4, %v1318_v0 }
 0x49a   : > { %1401 = vrot.lane.b32.xlu0 %v1399_v9, %s2012_s16 }
 0x49e   : > { %v1327_v12 = vld [vmem:[#allocation4 + $0x8] ss:$2 sm:$0xf]  ;;  %v1329_v13 = vld [vmem:[#allocation4 + $0x9] ss:$2 sm:$0xf] }
 0x49f   : > { %v1330_v14 = vmax.f32 %v1327_v12, %v1329_v13  ;;  %v1999_v12 = vld [vmem:[%s3099_s4 + $0x3] ss:$0 sm:$0xff] }
 0x4a1   : > { %1331 = vst.msk [vmem:[#allocation2 + $0x28] sm:$0xf] %vm968_vm8, %v1330_v14 }
 0x4a2   : > { %1463 = vrot.lane.b32.xlu0 %v1462_v11, %s2013_s21 }
 0x4a8   : > { %v1417_v15 = vld [vmem:[#allocation2 + $0x26] sm:$0xf]  ;;  %v1446_v23 = vld [vmem:[#allocation2 + $0x2a] sm:$0xf] }
 0x4a9   : > { %v1425_v16 = vld [vmem:[#allocation2 + $0x27] sm:$0xf]  ;;  %v1419_v17 = vrot.slane %v1417_v15, 4  ;;  %v1448_v25 = vrot.slane %v1446_v23, 4  ;;  %v1453_v27 = vld [vmem:[#allocation2 + $0x2b] sm:$0xf] }
 0x4aa   : > { %v1427_v18 = vrot.slane %v1425_v16, 4  ;;  %v1411_v19 = vld [vmem:[#allocation2 + $0x25] sm:$0xf]  ;;  %v1441_v21 = vld [vmem:[#allocation2 + $0x29] sm:$0xf]  ;;  %v1455_v29 = vrot.slane %v1453_v27, 4 }
 0x4ab   : > { %1420 = vrot.lane.b32.xlu2 %v1419_v17, %s2014_s22  ;;  %v1413_v20 = vrot.slane %v1411_v19, 4  ;;  %v1443_v22 = vrot.slane %v1441_v21, 4  ;;  %v1433_v24 = vld [vmem:[#allocation2 + $0x28] sm:$0xf] }
 0x4ac   : > { %1428 = vrot.lane.b32.xlu1 %v1427_v18, %s2012_s16  ;;  %v1435_v26 = vrot.slane %v1433_v24, 4 }
 0x4ad   : > { %1416 = vst.msk [vmem:[#allocation3] sm:$0xf0] %vm1415_vm9, %v1413_v20 }
 0x4ae   : > { %1445 = vst.msk [vmem:[#allocation3 + $0x8] sm:$0xf0] %vm1415_vm9, %v1443_v22 }
 0x4b3   : > { %1449 = vrot.lane.b32.xlu2 %v1448_v25, %s2014_s22 }
 0x4b4   : > { %1436 = vrot.lane.b32.xlu1 %v1435_v26, %s2013_s21 }
 0x4bb   : > { %1407 = vrot.lane.b32.xlu2 %v1405_v28, %s2013_s21 }
 0x4bc   : > { %1456 = vrot.lane.b32.xlu1 %v1455_v29, %s2012_s16 }
 0x4e3   : > { %v1387_v43 = vpop.permute.xlu2 %1386 }
 0x4fc   : > { %v1380_v41 = vpop.permute.xlu0 %1379 }
 0x4fd   : > { %v1373_v42 = vpop.permute.xlu1 %1372 }
 0x4fe   : > { %1376 = vst.msk [vmem:[#allocation3] sm:$0xf] %vm1375_vm10, %v1373_v42  ;;  %v1961_v42 = vld [vmem:[%s3098_s3 + $0x478] sm:$0xff] }
 0x4ff   : > { %1383 = vst.msk [vmem:[#allocation3] sm:$0xf] %vm1382_vm11, %v1380_v41  ;;  %1647 = vmatpush.msrb.mxu0 %v1961_v42 }
 0x500   : > { %1390 = vst.msk [vmem:[#allocation3] sm:$0xf] %vm1389_vm12, %v1387_v43  ;;  %v1960_v43 = vld [vmem:[%s3098_s3 + $0x470] sm:$0xff] }
 0x501   : > { %1648 = vmatpush.msrb.mxu0 %v1960_v43 }
 0x503   : > { %1649 = vmatpush.msrb.mxu0 %v1959_v44  ;;  %v1751_v44 = vld [vmem:[%s3102_s7 + $0x48] sm:$0xff] }
 0x504   : > { %v1396_v52 = vpop.permute.xlu0 %1395 }
 0x505   : > { %1398 = vst.msk [vmem:[#allocation3 + $0x8] sm:$0xf] %vm1375_vm10, %v1396_v52  ;;  %v1421_v53 = vpop.permute.xlu2 %1420  ;;  %1650 = vmatpush.msrb.mxu0 %v1958_v45 }
 0x506   : > { %1424 = vst.msk [vmem:[#allocation3] sm:$0xf0] %vm1423_vm13, %v1421_v53  ;;  %v1954_v53 = vld [vmem:[%s3098_s3 + $0x440] sm:$0xff] }
 0x507   : > { %1651 = vmatpush.msrb.mxu0 %v1957_v46 }
 0x509   : > { %1652 = vmatpush.msrb.mxu0 %v1956_v48 }
 0x50b   : > { %1653 = vmatpush.msrb.mxu0 %v1955_v50  ;;  %v1749_v50 = vld [vmem:[%s3102_s7 + $0x38] sm:$0xff] }
 0x50c   : > { %v1402_v62 = vpop.permute.xlu0 %1401 }
 0x50d   : > { %1404 = vst.msk [vmem:[#allocation3 + $0x8] sm:$0xf] %vm1382_vm11, %v1402_v62  ;;  %v1450_v63 = vpop.permute.xlu2 %1449  ;;  %1654 = vmatpush.msrb.mxu0 %v1954_v53  ;;  %v1950_v62 = vld [vmem:[%s3098_s3 + $0x420] sm:$0xff]  ;;  %v1748_v53 = vld [vmem:[%s3102_s7 + $0x30] sm:$0xff] }
 0x50e   : > { %1452 = vst.msk [vmem:[#allocation3 + $0x8] sm:$0xf0] %vm1423_vm13, %v1450_v63  ;;  %v1970_v63 = vld [vmem:[%s3098_s3 + $0x4c0] sm:$0xff] }
 0x50f   : > { %1655 = vmatpush.msrb.mxu0 %v1953_v55  ;;  %1674 = vmatpush.msrb.mxu1 %v1970_v63 }
 0x511   : > { %1656 = vmatpush.msrb.mxu0 %v1952_v57  ;;  %1675 = vmatpush.msrb.mxu1 %v1969_v2  ;;  %v1743_v2 = vld [vmem:[%s3102_s7 + $0x8] sm:$0xff] }
 0x513   : > { %1657 = vmatpush.msrb.mxu0 %v1951_v59  ;;  %1676 = vmatpush.msrb.mxu1 %v1968_v4  ;;  %v1746_v59 = vld [vmem:[%s3102_s7 + $0x20] sm:$0xff] }
 0x514   : > { %v1464_v0 = vpop.permute.xlu0 %1463  ;;  %v2001_v4 = vld [vmem:[%s3101_s6] ss:$0 sm:$0xff] }
 0x515   : > { %v1408_v6 = vpop.permute.xlu2 %1407  ;;  %1658 = vmatpush.msrb.mxu0 %v1950_v62  ;;  %v1745_v62 = vld [vmem:[%s3102_s7 + $0x18] sm:$0xff] }
 0x516   : > { %1410 = vst.msk [vmem:[#allocation3 + $0x8] sm:$0xf] %vm1389_vm12, %v1408_v6  ;;  %v1967_v6 = vld [vmem:[%s3098_s3 + $0x4a8] sm:$0xff] }
 0x517   : > { %1659 = vmatpush.msrb.mxu0 %v1949_v1  ;;  %1677 = vmatpush.msrb.mxu1 %v1967_v6  ;;  %v1744_v1 = vld [vmem:[%s3102_s7 + $0x10] sm:$0xff] }
 0x519   : > { %1660 = vmatpush.msrb.mxu0 %v1948_v3  ;;  %v1742_v3 = vld [vmem:[%s3102_s7] sm:$0xff] }
 0x51b   : > { %1661 = vmatpush.msrb.mxu0 %v1947_v5 }
 0x51e   : > { %v1429_v7 = vpop.permute.xlu1 %1428 }
 0x51f   : > { %1432 = vst.msk [vmem:[#allocation3] sm:$0xf0] %vm1431_vm14, %v1429_v7 }
 0x526   : > { %v1437_v8 = vpop.permute.xlu1 %1436 }
 0x527   : > { %1440 = vst.msk [vmem:[#allocation3] sm:$0xf0] %vm1439_vm15, %v1437_v8  ;;  %v1946_v8 = vld [vmem:[%s3098_s3 + $0x400] sm:$0xff] }
 0x528   : > { %1662 = vmatpush.msrb.mxu0 %v1946_v8  ;;  %v2002_v8 = vld [vmem:[%s3103_s8] ss:$0 sm:$0xff] }
 0x52e   : > { %v1457_v9 = vpop.permute.xlu1 %1456  ;;  %v1467_v10 = vld [vmem:[#allocation3] sm:$0xff] }
 0x52f   : > { %1459 = vst.msk [vmem:[#allocation3 + $0x8] sm:$0xf0] %vm1431_vm14, %v1457_v9  ;;  %1488 = vmatmul.f32.vlgmr.msra.gmra.mxu2 %v1467_v10  ;;  %v1965_v9 = vld [vmem:[%s3098_s3 + $0x498] sm:$0xff]  ;;  %v1964_v10 = vld [vmem:[%s3098_s3 + $0x490] sm:$0xff] }
 0x530   : > { %1466 = vst.msk [vmem:[#allocation3 + $0x8] sm:$0xf0] %vm1439_vm15, %v1464_v0  ;;  %v1966_v0 = vld [vmem:[%s3098_s3 + $0x4a0] sm:$0xff] }
 0x531   : > { %1678 = vmatpush.msrb.mxu1 %v1966_v0 }
 0x533   : > { %1679 = vmatpush.msrb.mxu1 %v1965_v9 }
 0x535   : > { %1680 = vmatpush.msrb.mxu1 %v1964_v10 }
 0x537   : > { %v1468_v11 = vld [vmem:[#allocation3 + $0x8] sm:$0xff] }
 0x538   : > { %1508 = vmatmul.f32.vlgmr.msra.gmra.mxu3 %v1468_v11  ;;  %v1963_v11 = vld [vmem:[%s3098_s3 + $0x488] sm:$0xff] }
 0x539   : > { %1681 = vmatpush.msrb.mxu1 %v1963_v11 }
 0x5b2   : > { %v1489_v13 = vpop.f32.mrf.mxu2 }
 0x5b3   : > { %v1490_v14 = vadd.f32 %v1999_v12, %v1489_v13  ;;  %v1962_v13 = vld [vmem:[%s3098_s3 + $0x480] sm:$0xff] }
 0x5b4   : > { %1682 = vmatpush.msrb.mxu1 %v1962_v13 }
 0x5bb   : > { %v1509_v15 = vpop.f32.mrf.mxu3 }
 0x5bc   : > { %v1510_v16 = vadd.f32 %v1509_v15, %v1490_v14 }
 0x5be   : > { %v1512_v17 = vmax.f32 %v1510_v16, 0.0 }
 0x5c0   : > { %1513 = vst.msk [vmem:[#allocation2 + $0x8] sm:$0xf] %vm968_vm8, %v1512_v17 }
 0x5c1   : > { %1514 = vst.msk [vmem:[#allocation2 + $0x24] sm:$0xf0] %vm1415_vm9, %v1512_v17 }
 0x5c7   : > { %v1564_v18 = vld [vmem:[#allocation2 + $0x8] sm:$0xf] }
 0x5c8   : > { %v1558_v19 = vld [vmem:[#allocation2 + $0x7] sm:$0xf]  ;;  %1566 = vrot.lane.b32.xlu2 %v1564_v18, %s2013_s21  ;;  %v1578_v35 = vld [vmem:[#allocation2 + $0xb] sm:$0xf] }
 0x5c9   : > { %v1552_v20 = vld [vmem:[#allocation2 + $0x6] sm:$0xf]  ;;  %1560 = vrot.lane.b32.xlu0 %v1558_v19, %s2012_s16  ;;  %v1572_v30 = vld [vmem:[#allocation2 + $0xa] sm:$0xf] }
 0x5ca   : > { %1554 = vrot.lane.b32.xlu1 %v1552_v20, %s2014_s22  ;;  %v1595_v21 = vld [vmem:[#allocation2 + $0x26] sm:$0xf]  ;;  %v1621_v32 = vld [vmem:[#allocation2 + $0x2a] sm:$0xf] }
 0x5cb   : > { %v1590_v22 = vld [vmem:[#allocation2 + $0x25] sm:$0xf]  ;;  %v1616_v23 = vld [vmem:[#allocation2 + $0x29] sm:$0xf]  ;;  %v1597_v29 = vrot.slane %v1595_v21, 4  ;;  %v1623_v34 = vrot.slane %v1621_v32, 4 }
 0x5cc   : > { %v1602_v24 = vld [vmem:[#allocation2 + $0x27] sm:$0xf]  ;;  %v1592_v25 = vrot.slane %v1590_v22, 4  ;;  %v1618_v26 = vrot.slane %v1616_v23, 4  ;;  %v1628_v38 = vld [vmem:[#allocation2 + $0x2b] sm:$0xf] }
 0x5cd   : > { %v1550_v27 = vld [vmem:[#allocation2 + $0x5] sm:$0xf]  ;;  %v1570_v28 = vld [vmem:[#allocation2 + $0x9] sm:$0xf]  ;;  %v1604_v31 = vrot.slane %v1602_v24, 4  ;;  %v1630_v41 = vrot.slane %v1628_v38, 4 }
 0x5ce   : > { %1551 = vst.msk [vmem:[#allocation3] sm:$0xf] %vm968_vm8, %v1550_v27  ;;  %v1609_v33 = vld [vmem:[#allocation2 + $0x28] sm:$0xf]  ;;  %v1713_v24 = vld [vmem:[%s3100_s5 + $0x18] sm:$0xff]  ;;  %v1710_v27 = vld [vmem:[%s3100_s5] sm:$0xff] }
 0x5cf   : > { %1594 = vst.msk [vmem:[#allocation3] sm:$0xf0] %vm1415_vm9, %v1592_v25  ;;  %v1611_v36 = vrot.slane %v1609_v33, 4  ;;  %v1712_v25 = vld [vmem:[%s3100_s5 + $0x10] sm:$0xff]  ;;  %1733 = vmatpush.msrb.mxu2 %v1713_v24  ;;  %v1753_v38 = vld [vmem:[%s3102_s7 + $0x58] sm:$0xff] }
 0x5d0   : > { %1620 = vst.msk [vmem:[#allocation3 + $0x8] sm:$0xf0] %vm1415_vm9, %v1618_v26  ;;  %1598 = vrot.lane.b32.xlu2 %v1597_v29, %s2014_s22  ;;  %v1711_v26 = vld [vmem:[%s3100_s5 + $0x8] sm:$0xff] }
 0x5d1   : > { %1574 = vrot.lane.b32.xlu0 %v1572_v30, %s2014_s22  ;;  %1571 = vst.msk [vmem:[#allocation3 + $0x8] sm:$0xf] %vm968_vm8, %v1570_v28  ;;  %1734 = vmatpush.msrb.mxu2 %v1712_v25  ;;  %v2000_v28 = vld [vmem:[%s3099_s4 + $0x4] ss:$0 sm:$0xff] }
 0x5d2   : > { %1605 = vrot.lane.b32.xlu1 %v1604_v31, %s2012_s16 }
 0x5d3   : > { %1735 = vmatpush.msrb.mxu2 %v1711_v26 }
 0x5d5   : > { %1736 = vmatpush.msrb.mxu2 %v1710_v27 }
 0x5d8   : > { %1624 = vrot.lane.b32.xlu2 %v1623_v34, %s2014_s22  ;;  %v1757_v34 = vld [vmem:[%s3102_s7 + $0x78] sm:$0xff] }
 0x5d9   : > { %1580 = vrot.lane.b32.xlu0 %v1578_v35, %s2012_s16  ;;  %v1756_v35 = vld [vmem:[%s3102_s7 + $0x70] sm:$0xff]  ;;  %1762 = vmatpush.msrb.mxu3 %v1757_v34 }
 0x5da   : > { %1612 = vrot.lane.b32.xlu1 %v1611_v36, %s2013_s21  ;;  %v1755_v36 = vld [vmem:[%s3102_s7 + $0x68] sm:$0xff] }
 0x5db   : > { %1763 = vmatpush.msrb.mxu3 %v1756_v35 }
 0x5dd   : > { %1764 = vmatpush.msrb.mxu3 %v1755_v36 }
 0x5df   : > { %1765 = vmatpush.msrb.mxu3 %v1754_v37 }
 0x5e0   : > { %1586 = vrot.lane.b32.xlu2 %v1584_v40, %s2013_s21 }
 0x5e1   : > { %1638 = vrot.lane.b32.xlu0 %v1637_v39, %s2013_s21  ;;  %v1752_v39 = vld [vmem:[%s3102_s7 + $0x50] sm:$0xff]  ;;  %1766 = vmatpush.msrb.mxu3 %v1753_v38 }
 0x5e2   : > { %1631 = vrot.lane.b32.xlu1 %v1630_v41, %s2012_s16 }
 0x5e3   : > { %1767 = vmatpush.msrb.mxu3 %v1752_v39 }
 0x5e5   : > { %1768 = vmatpush.msrb.mxu3 %v1751_v44 }
 0x5e7   : > { %1769 = vmatpush.msrb.mxu3 %v1750_v47 }
 0x5e9   : > { %1770 = vmatpush.msrb.mxu3 %v1749_v50 }
 0x5eb   : > { %1771 = vmatpush.msrb.mxu3 %v1748_v53 }
 0x5ed   : > { %1772 = vmatpush.msrb.mxu3 %v1747_v56 }
 0x5ef   : > { %1773 = vmatpush.msrb.mxu3 %v1746_v59 }
 0x5f1   : > { %1774 = vmatpush.msrb.mxu3 %v1745_v62 }
 0x5f3   : > { %1775 = vmatpush.msrb.mxu3 %v1744_v1 }
 0x5f5   : > { %1776 = vmatpush.msrb.mxu3 %v1743_v2 }
 0x5f7   : > { %1777 = vmatpush.msrb.mxu3 %v1742_v3 }
 0x622   : > { %v1567_v52 = vpop.permute.xlu2 %1566 }
 0x62a   : > { %v1599_v61 = vpop.permute.xlu2 %1598 }
 0x62b   : > { %1601 = vst.msk [vmem:[#allocation3] sm:$0xf0] %vm1423_vm13, %v1599_v61 }
 0x632   : > { %v1625_v7 = vpop.permute.xlu2 %1624 }
 0x633   : > { %1627 = vst.msk [vmem:[#allocation3 + $0x8] sm:$0xf0] %vm1423_vm13, %v1625_v7 }
 0x63a   : > { %v1587_v18 = vpop.permute.xlu2 %1586 }
 0x63b   : > { %v1561_v12 = vpop.permute.xlu0 %1560 }
 0x63c   : > { %v1555_v14 = vpop.permute.xlu1 %1554 }
 0x63d   : > { %1557 = vst.msk [vmem:[#allocation3] sm:$0xf] %vm1375_vm10, %v1555_v14 }
 0x63e   : > { %1563 = vst.msk [vmem:[#allocation3] sm:$0xf] %vm1382_vm11, %v1561_v12 }
 0x63f   : > { %1569 = vst.msk [vmem:[#allocation3] sm:$0xf] %vm1389_vm12, %v1567_v52 }
 0x643   : > { %v1575_v15 = vpop.permute.xlu0 %1574 }
 0x644   : > { %1577 = vst.msk [vmem:[#allocation3 + $0x8] sm:$0xf] %vm1375_vm10, %v1575_v15  ;;  %v1606_v16 = vpop.permute.xlu1 %1605 }
 0x645   : > { %1608 = vst.msk [vmem:[#allocation3] sm:$0xf0] %vm1431_vm14, %v1606_v16 }
 0x64b   : > { %v1581_v17 = vpop.permute.xlu0 %1580 }
 0x64c   : > { %1583 = vst.msk [vmem:[#allocation3 + $0x8] sm:$0xf] %vm1382_vm11, %v1581_v17  ;;  %v1613_v19 = vpop.permute.xlu1 %1612 }
 0x64d   : > { %1615 = vst.msk [vmem:[#allocation3] sm:$0xf0] %vm1439_vm15, %v1613_v19 }
 0x64e   : > { %1589 = vst.msk [vmem:[#allocation3 + $0x8] sm:$0xf] %vm1389_vm12, %v1587_v18 }
 0x653   : > { %v1639_v20 = vpop.permute.xlu0 %1638 }
 0x654   : > { %v1632_v21 = vpop.permute.xlu1 %1631  ;;  %v1642_v22 = vld [vmem:[#allocation3] sm:$0xff] }
 0x655   : > { %1634 = vst.msk [vmem:[#allocation3 + $0x8] sm:$0xf0] %vm1431_vm14, %v1632_v21  ;;  %1663 = vmatmul.f32.vlgmr.msrb.gmra.mxu0 %v1642_v22 }
 0x656   : > { %1641 = vst.msk [vmem:[#allocation3 + $0x8] sm:$0xf0] %vm1439_vm15, %v1639_v20 }
 0x65d   : > { %v1643_v23 = vld [vmem:[#allocation3 + $0x8] sm:$0xff] }
 0x65e   : > { %1683 = vmatmul.f32.vlgmr.msrb.gmra.mxu1 %v1643_v23 }
 0x6d2   : > { %v1664_v29 = vpop.f32.mrf.mxu0 }
 0x6d3   : > { %v1665_v30 = vadd.f32 %v2000_v28, %v1664_v29 }
 0x6db   : > { %v1684_v31 = vpop.f32.mrf.mxu1 }
 0x6dc   : > { %v1685_v32 = vadd.f32 %v1684_v31, %v1665_v30 }
 0x6de   : > { %v1687_v33 = vmax.f32 %v1685_v32, 0.0 }
 0x6e0   : > { %1688 = vst.msk [vmem:[#allocation4] sm:$0xff] %vm685_vm4, %v1687_v33 }
 0x6e7   : > { %v1689_v40 = vld [vmem:[#allocation4] sm:$0x7]  ;;  %v1700_v41 = vld [vmem:[#allocation4 + $0x4] sm:$0x7] }
 0x6e8   : > { %v1691_v42 = vsel %vm1690_vm0, %v1689_v40, -inf  ;;  %v1701_v43 = vsel %vm1690_vm0, %v1700_v41, -inf }
 0x6e9   : > { %v1692_v45 = vrot.slane %v1691_v42, 4  ;;  %v1702_v46 = vrot.slane %v1701_v43, 4 }
 0x6eb   : > { %v1693_v48 = vmax.f32 %v1691_v42, %v1692_v45  ;;  %v1703_v49 = vmax.f32 %v1701_v43, %v1702_v46 }
 0x6ed   : > { %v1694_v51 = vrot.slane %v1693_v48, 2  ;;  %v1704_v52 = vrot.slane %v1703_v49, 2 }
 0x6ef   : > { %v1695_v54 = vmax.f32 %v1693_v48, %v1694_v51  ;;  %v1705_v55 = vmax.f32 %v1703_v49, %v1704_v52 }
 0x6f1   : > { %v1696_v57 = vrot.slane %v1695_v54, 1  ;;  %v1706_v58 = vrot.slane %v1705_v55, 1 }
 0x6f3   : > { %v1697_v60 = vmax.f32 %v1695_v54, %v1696_v57  ;;  %v1707_v61 = vmax.f32 %v1705_v55, %v1706_v58 }
 0x6f5   : > { %1699 = vst.msk [vmem:[#allocation5] sm:$0x1] %vm1698_vm1, %v1697_v60 }
 0x6f6   : > { %1708 = vst.msk [vmem:[#allocation5 + $0x1] sm:$0x1] %vm1698_vm1, %v1707_v61 }
 0x6fd   : > { %v1709_v63 = vld [vmem:[#allocation5] sm:$0x3] }
 0x6fe   : > { %1979 = vmatmul.msk.f32.vlgmr.msrb.gmra.mxu2 %vm685_vm4, %v1709_v63 }
 0x781   : > { %v1738_v5 = vpop.f32.mrf.mxu2 }
 0x782   : > { %v1739_v6 = vadd.f32 %v2001_v4, %v1738_v5 }
 0x784   : > { %v1741_v7 = vmax.f32 %v1739_v6, 0.0 }
 0x786   : > { %1778 = vmatmul.f32.vlgmr.msrb.gmra.mxu3 %v1741_v7 }
 0x809   : > { %v1779_v0 = vpop.f32.mrf.mxu3 }
 0x80a   : > { %v1780_v9 = vadd.f32 %v2002_v8, %v1779_v0 }
 0x80c   : > { %1782 = vst [vmem:[%s335_s11] sm:$0x3] %v1780_v9 }
 0x80d PF: > { %s19_s30 = sadd.s32 1, %s2009_s30  }
 0x80e   : > { %p16_p5 = scmp.ge.s32.totalorder %s19_s30, 4  }
 0x810   :  { %18 = sbr.rel (!%p16_p5) target bundleno = 1 (0x1), region = 100 }

</bundles_post_ra>
